<compile_context>
chip_gen: v5e
topology: v5e:2x2
jax: 0.10.0
libtpu: 0.0.40
codegen_flags: <defaults>
</compile_context>

<pallas_src>
import numpy as np
import jax
import jax.numpy as jnp
from jax.experimental import pallas as pl
from jax.experimental.pallas import tpu as pltpu

# ------------------------- LeNet geometry (fixed by the module) -------------
C_IN, H_IN = 3, 28            # fc1 expects 16*5*5 = 400  =>  28x28x3 input
K1, PAD1, O1 = 3, 1, 6        # conv1: 3->6, 3x3, pad 1
K2, O2 = 5, 16                # conv2: 6->16, 5x5, pad 0
HPAD = H_IN + 2 * PAD1        # 30  padded input height/width
H1 = HPAD - K1 + 1            # 28  conv1 output
HP1 = H1 // 2                 # 14  pool1 output
H2 = HP1 - K2 + 1             # 10  conv2 output
HP2 = H2 // 2                 # 5   pool2 output
FC1, FC2, FC3 = 120, 84, 2
NOUT = 128                    # lane-dense (padded) fc3 output width
KCOLS = K1 * HPAD * C_IN      # 270  conv1 im2row K


# ------------------------------ Pallas kernel -------------------------------

def lenet_kernel(x_ref, w1_ref, b1_ref, w2_ref, b2_ref, c1_ref, c2_ref,
                 wf1_ref, fb1_ref, fw2_ref, fb2_ref, fw3_ref, fb3_ref, o_ref):
    """One grid step = TB images.  Everything stays in VMEM / vregs."""
    f32, bf16 = jnp.float32, jnp.bfloat16
    dot = lambda a, b: jnp.dot(a, b, preferred_element_type=f32)

    tb = o_ref.shape[0]            # images per block (multiple of 16)
    half = HP1 * tb                # 14*TB: size of the even-h conv1-row block

    # ---- conv1 (3x3, pad 1): ONE MXU matmul; im2row / tap-concat done in
    #      the wrapper so there are no in-kernel shifted slices.
    a1 = dot(x_ref[...], w1_ref[...]) + b1_ref[...]            # [28*TB, 168] f32

    # ---- maxpool1 rows: even-h block vs odd-h block (aligned halves, VPU max)
    r1 = jnp.maximum(a1[:half], a1[half:])                     # [14*TB, 168]
    # ---- maxpool1 cols: 0/1 selector matmuls
    r1b = r1.astype(bf16)
    p1 = jnp.maximum(dot(r1b, c1_ref[0]), dot(r1b, c1_ref[1])) # [14*TB, 84] f32
    p1 = p1.astype(bf16)

    # ---- conv2 (5x5, no pad): 5 vertical taps as accumulating matmuls over
    #      aligned h-major slices (offsets i*TB, TB % 16 == 0), M = 10*TB.
    a2 = dot(p1[:H2 * tb], w2_ref[0]) + b2_ref[...]            # [10*TB, 160] f32
    for i in range(1, K2):
        a2 = a2 + dot(p1[i * tb:(i + H2) * tb], w2_ref[i])

    # ---- maxpool2 + fc1 fused per pooled row (5 rows): M = TB matmuls.
    f1 = fb1_ref[...]                                          # [1, 120] -> bcast
    for hp in range(HP2):
        r2 = jnp.maximum(a2[(2 * hp) * tb:(2 * hp + 1) * tb],
                         a2[(2 * hp + 1) * tb:(2 * hp + 2) * tb])   # [TB, 160]
        r2b = r2.astype(bf16)
        p2 = jnp.maximum(dot(r2b, c2_ref[0]), dot(r2b, c2_ref[1]))  # [TB, 80]
        f1 = f1 + dot(p2.astype(bf16), wf1_ref[hp])                 # [TB, 120]

    # ---- fc2 / fc3: weights pre-transposed to [in, out]; fc3 padded to 128
    #      lanes so the output store is a lane-dense (TB, 128) slab.
    f2 = dot(f1.astype(bf16), fw2_ref[...]) + fb2_ref[...]     # [TB, 84]
    f3 = dot(f2.astype(bf16), fw3_ref[...]) + fb3_ref[...]     # [TB, 128]
    o_ref[...] = f3


# --------------------------- weight rearrangement ---------------------------

def _width_toeplitz(w, wp, wo):
    """w: [O, C, KH, KW] -> [KH, wp*C, wo*O].

    Folds the kernel-width and input-channel loops of a stride-1 conv into one
    matmul per vertical tap i:  out[row, wo*O+o] += xrow[row of tap i] @ T[i],
    for the channels-last row layout col = w*C + c."""
    O, C, KH, KW = w.shape
    j = np.arange(KW)[:, None, None]
    wi = np.arange(wp)[None, :, None]
    woi = np.arange(wo)[None, None, :]
    sel = jnp.asarray((wi == woi + j).astype(np.float32))       # [KW, wp, wo]
    t = jnp.einsum("jwv,ocij->iwcvo", sel, w)                   # [KH, wp, C, wo, O]
    return t.reshape(KH, wp * C, wo * O)


def _pool_col_selectors(w, c):
    """2x2/stride-2 max-pool along width as two 0/1 selection matmuls
    for the [row, w*c] layout.  Returns [2, w*c, (w//2)*c]."""
    wh = w // 2
    cc = np.zeros((2, w * c, wh * c), np.float32)
    wp = np.repeat(np.arange(wh), c)
    ch = np.tile(np.arange(c), wh)
    cc[0, (2 * wp) * c + ch, wp * c + ch] = 1.0
    cc[1, (2 * wp + 1) * c + ch, wp * c + ch] = 1.0
    return jnp.asarray(cc)


def _round_up(n, m):
    return ((n + m - 1) // m) * m


def _im2row_conv1(x, b_pad, tb):
    """[B,3,28,28] NCHW -> [nblk*28*TB, 270] bf16, kernel-ready layout.

    One wrapper pass that folds: zero pad, NCHW -> channels-last rows, the 3
    vertical conv1 taps (tap-major concat along the last dim), the even-h /
    odd-h split used by maxpool1's row max, and the h-major / batch-minor row
    ordering (row = h_index*TB + image) used by every later stage."""
    b = x.shape[0]
    xp = jnp.pad(x, ((0, b_pad - b), (0, 0), (PAD1, PAD1), (PAD1, PAD1)))
    xr = jnp.transpose(xp, (0, 2, 3, 1)).reshape(b_pad, HPAD, HPAD * C_IN)
    h_order = np.concatenate([np.arange(0, H1, 2), np.arange(1, H1, 2)])
    taps = h_order[:, None] + np.arange(K1)[None, :]            # [28, 3] static
    rows = xr[:, taps, :].reshape(b_pad, H1, KCOLS)             # [Bp, 28, 270]
    nblk = b_pad // tb
    rows = rows.reshape(nblk, tb, H1, KCOLS)
    rows = jnp.transpose(rows, (0, 2, 1, 3))                    # [blk, h, j, 270]
    return rows.reshape(nblk * H1 * tb, KCOLS).astype(jnp.bfloat16)


# ------------------------------- forward pass -------------------------------

def lenet_forward(x, p, *, tb=64):
    """x: [B, 3, 28, 28] NCHW f32, p: torch-layout params -> [B, 2] f32."""
    B = x.shape[0]
    bf16 = jnp.bfloat16

    # Batch-block size: multiple of 16 (aligned f32 & bf16 sublane slices).
    # Default 64 keeps the per-step VMEM footprint ~10 MB (fits v7x's 32 MiB
    # scoped default with headroom); raise tb + vmem_limit_bytes if desired.
    tb = max(16, min(tb, _round_up(B, 16)))
    tb = (tb // 16) * 16
    b_pad = _round_up(B, tb)
    nblk = b_pad // tb

    # ---- weight-side rearrangement (weights only, < 1 MB, done once per call)
    w1flat = _width_toeplitz(p["w1"], HPAD, H1).reshape(KCOLS, H1 * O1)
    w1flat = w1flat.astype(bf16)                                # [270, 168]
    b1r = jnp.tile(p["b1"], H1)[None, :]                        # [1, 168] f32
    w2t = _width_toeplitz(p["w2"], HP1, H2).astype(bf16)        # [5, 84, 160]
    b2r = jnp.tile(p["b2"], H2)[None, :]                        # [1, 160] f32
    c1 = _pool_col_selectors(H1, O1).astype(bf16)               # [2, 168, 84]
    c2 = _pool_col_selectors(H2, O2).astype(bf16)               # [2, 160, 80]
    # fc1: fold the torch NCHW flatten (c*25 + h*5 + w) into per-pooled-row slabs.
    wf1 = p["fw1"].reshape(FC1, O2, HP2, HP2).transpose(2, 3, 1, 0)
    wf1 = wf1.reshape(HP2, HP2 * O2, FC1).astype(bf16)          # [5, 80, 120]
    fb1 = p["fb1"][None, :]                                     # [1, 120] f32
    fw2t = p["fw2"].T.astype(bf16)                              # [120, 84]
    fb2 = p["fb2"][None, :]                                     # [1, 84] f32
    fw3t = jnp.pad(p["fw3"].T, ((0, 0), (0, NOUT - FC3))).astype(bf16)  # [84, 128]
    fb3 = jnp.pad(p["fb3"], (0, NOUT - FC3))[None, :]           # [1, 128] f32

    # ---- input: single pass pad+transpose+im2row emitting the kernel layout
    xim = _im2row_conv1(x, b_pad, tb)                           # [nblk*28*tb, 270]

    args = (xim, w1flat, b1r, w2t, b2r, c1, c2, wf1, fb1, fw2t, fb2, fw3t, fb3)

    def const_spec(a):                                          # VMEM-resident
        nd = a.ndim
        return pl.BlockSpec(a.shape, lambda i: (0,) * nd)

    in_specs = [pl.BlockSpec((H1 * tb, KCOLS), lambda i: (i, 0))]
    in_specs += [const_spec(a) for a in args[1:]]

    out = pl.pallas_call(
        lenet_kernel,
        out_shape=jax.ShapeDtypeStruct((b_pad, NOUT), jnp.float32),
        grid=(nblk,),
        in_specs=in_specs,
        out_specs=pl.BlockSpec((tb, NOUT), lambda i: (i, 0)),
        compiler_params=pltpu.CompilerParams(
            dimension_semantics=("parallel",)),
    )(*args)
    return out[:B, :FC3]


# --------------------------- reference (pure JAX) ----------------------------

def reference_forward(x, p):
    dn = ("NCHW", "OIHW", "NCHW")
    y = jax.lax.conv_general_dilated(x, p["w1"], (1, 1), ((1, 1), (1, 1)),
                                     dimension_numbers=dn)
    y = y + p["b1"][None, :, None, None]
    y = jax.lax.reduce_window(y, -jnp.inf, jax.lax.max,
                              (1, 1, 2, 2), (1, 1, 2, 2), "VALID")
    y = jax.lax.conv_general_dilated(y, p["w2"], (1, 1), ((0, 0), (0, 0)),
                                     dimension_numbers=dn)
    y = y + p["b2"][None, :, None, None]
    y = jax.lax.reduce_window(y, -jnp.inf, jax.lax.max,
                              (1, 1, 2, 2), (1, 1, 2, 2), "VALID")
    y = y.reshape(y.shape[0], -1)
    y = y @ p["fw1"].T + p["fb1"]
    y = y @ p["fw2"].T + p["fb2"]
    y = y @ p["fw3"].T + p["fb3"]
    return y


# ------------------------------ params / main --------------------------------

def init_params(key):
    ks = jax.random.split(key, 10)

    def uinit(k, shape, fan_in):
        bound = 1.0 / (fan_in ** 0.5)
        return jax.random.uniform(k, shape, jnp.float32, -bound, bound)

    return {
        "w1": uinit(ks[0], (6, 3, 3, 3), 3 * 3 * 3),
        "b1": uinit(ks[1], (6,), 3 * 3 * 3),
        "w2": uinit(ks[2], (16, 6, 5, 5), 6 * 5 * 5),
        "b2": uinit(ks[3], (16,), 6 * 5 * 5),
        "fw1": uinit(ks[4], (120, 400), 400),
        "fb1": uinit(ks[5], (120,), 400),
        "fw2": uinit(ks[6], (84, 120), 120),
        "fb2": uinit(ks[7], (84,), 120),
        "fw3": uinit(ks[8], (2, 84), 84),
        "fb3": uinit(ks[9], (2,), 84),
    }


if __name__ == "__main__":
    key = jax.random.PRNGKey(0)
    k_x, k_p = jax.random.split(key)
    # fc(400) implies a 28x28x3 input (torch LeNet convention): [B, 3, 28, 28]
    x = jax.random.normal(k_x, (2, 3, 28, 28), jnp.float32)
    params = init_params(k_p)

    out = jax.block_until_ready(jax.jit(lenet_forward)(x, params))
    assert out.shape == (2, FC3) and out.dtype == jnp.float32

    ref = jax.block_until_ready(jax.jit(reference_forward)(x, params))
    # bf16 MXU operands with f32 accumulation keep the element-wise error far
    # below this tolerance; any layout/structure bug would show up as O(1)
    # mismatches, so the check still catches real errors.
    assert jnp.allclose(out, ref, atol=2e-2, rtol=2e-2), "mismatch vs reference"

    print("KERNEL_OK")
</pallas_src>

<mosaic_0001>
module attributes {stable_mosaic.version = 11 : i64} {
  func.func @lenet_kernel(%arg0: i32, %arg1: memref<448x270xbf16, #tpu.memory_space<vmem>>, %arg2: memref<270x168xbf16, #tpu.memory_space<vmem>>, %arg3: memref<1x168xf32, #tpu.memory_space<vmem>>, %arg4: memref<5x84x160xbf16, #tpu.memory_space<vmem>>, %arg5: memref<1x160xf32, #tpu.memory_space<vmem>>, %arg6: memref<2x168x84xbf16, #tpu.memory_space<vmem>>, %arg7: memref<2x160x80xbf16, #tpu.memory_space<vmem>>, %arg8: memref<5x80x120xbf16, #tpu.memory_space<vmem>>, %arg9: memref<1x120xf32, #tpu.memory_space<vmem>>, %arg10: memref<120x84xbf16, #tpu.memory_space<vmem>>, %arg11: memref<1x84xf32, #tpu.memory_space<vmem>>, %arg12: memref<84x128xbf16, #tpu.memory_space<vmem>>, %arg13: memref<1x128xf32, #tpu.memory_space<vmem>>, %arg14: memref<16x128xf32, #tpu.memory_space<vmem>>) attributes {dimension_semantics = [#tpu.dimension_semantics<parallel>], iteration_bounds = array<i64: 1>, scalar_prefetch = 0 : i64, scratch_operands = 0 : i64, tpu.core_type = #tpu.core_type<tc>, window_params = [{transform_indices = @transform_0, window_bounds = array<i64: 448, 270>}, {pipeline_mode = #tpu.pipeline_mode<synchronous>, transform_indices = @transform_1, window_bounds = array<i64: 270, 168>}, {pipeline_mode = #tpu.pipeline_mode<synchronous>, transform_indices = @transform_2, window_bounds = array<i64: 1, 168>}, {pipeline_mode = #tpu.pipeline_mode<synchronous>, transform_indices = @transform_3, window_bounds = array<i64: 5, 84, 160>}, {pipeline_mode = #tpu.pipeline_mode<synchronous>, transform_indices = @transform_4, window_bounds = array<i64: 1, 160>}, {pipeline_mode = #tpu.pipeline_mode<synchronous>, transform_indices = @transform_5, window_bounds = array<i64: 2, 168, 84>}, {pipeline_mode = #tpu.pipeline_mode<synchronous>, transform_indices = @transform_6, window_bounds = array<i64: 2, 160, 80>}, {pipeline_mode = #tpu.pipeline_mode<synchronous>, transform_indices = @transform_7, window_bounds = array<i64: 5, 80, 120>}, {pipeline_mode = #tpu.pipeline_mode<synchronous>, transform_indices = @transform_8, window_bounds = array<i64: 1, 120>}, {pipeline_mode = #tpu.pipeline_mode<synchronous>, transform_indices = @transform_9, window_bounds = array<i64: 120, 84>}, {pipeline_mode = #tpu.pipeline_mode<synchronous>, transform_indices = @transform_10, window_bounds = array<i64: 1, 84>}, {pipeline_mode = #tpu.pipeline_mode<synchronous>, transform_indices = @transform_11, window_bounds = array<i64: 84, 128>}, {pipeline_mode = #tpu.pipeline_mode<synchronous>, transform_indices = @transform_12, window_bounds = array<i64: 1, 128>}, {transform_indices = @transform_13, window_bounds = array<i64: 16, 128>}]} {
    %c0 = arith.constant 0 : index
    %c0_0 = arith.constant 0 : index
    %0 = vector.load %arg1[%c0, %c0_0] : memref<448x270xbf16, #tpu.memory_space<vmem>>, vector<448x270xbf16>
    %c0_1 = arith.constant 0 : index
    %c0_2 = arith.constant 0 : index
    %1 = vector.load %arg2[%c0_1, %c0_2] : memref<270x168xbf16, #tpu.memory_space<vmem>>, vector<270x168xbf16>
    %cst = arith.constant dense<0.000000e+00> : vector<448x168xf32>
    %2 = tpu.matmul %0, %1, %cst {dimension_numbers = #tpu.dot_dimension_numbers<[1], [0], [0], [1], [0, 0, 1, 1], [], []>} : vector<448x270xbf16>, vector<270x168xbf16>, vector<448x168xf32> -> vector<448x168xf32>
    %c0_3 = arith.constant 0 : index
    %c0_4 = arith.constant 0 : index
    %3 = vector.load %arg3[%c0_3, %c0_4] : memref<1x168xf32, #tpu.memory_space<vmem>>, vector<1x168xf32>
    %4 = vector.broadcast %3 : vector<1x168xf32> to vector<448x168xf32>
    %5 = arith.addf %2, %4 : vector<448x168xf32>
    %6 = vector.extract_strided_slice %5 {offsets = [0, 0], sizes = [224, 168], strides = [1, 1]} : vector<448x168xf32> to vector<224x168xf32>
    %7 = vector.extract_strided_slice %5 {offsets = [224, 0], sizes = [224, 168], strides = [1, 1]} : vector<448x168xf32> to vector<224x168xf32>
    %8 = arith.maximumf %6, %7 : vector<224x168xf32>
    %9 = arith.truncf %8 : vector<224x168xf32> to vector<224x168xbf16>
    %c0_5 = arith.constant 0 : index
    %c0_6 = arith.constant 0 : index
    %c0_7 = arith.constant 0 : index
    %10 = vector.load %arg6[%c0_5, %c0_6, %c0_7] : memref<2x168x84xbf16, #tpu.memory_space<vmem>>, vector<1x168x84xbf16>
    %11 = vector.shape_cast %10 : vector<1x168x84xbf16> to vector<168x84xbf16>
    %cst_8 = arith.constant dense<0.000000e+00> : vector<224x84xf32>
    %12 = tpu.matmul %9, %11, %cst_8 {dimension_numbers = #tpu.dot_dimension_numbers<[1], [0], [0], [1], [0, 0, 1, 1], [], []>} : vector<224x168xbf16>, vector<168x84xbf16>, vector<224x84xf32> -> vector<224x84xf32>
    %c1 = arith.constant 1 : index
    %c0_9 = arith.constant 0 : index
    %c0_10 = arith.constant 0 : index
    %13 = vector.load %arg6[%c1, %c0_9, %c0_10] : memref<2x168x84xbf16, #tpu.memory_space<vmem>>, vector<1x168x84xbf16>
    %14 = vector.shape_cast %13 : vector<1x168x84xbf16> to vector<168x84xbf16>
    %cst_11 = arith.constant dense<0.000000e+00> : vector<224x84xf32>
    %15 = tpu.matmul %9, %14, %cst_11 {dimension_numbers = #tpu.dot_dimension_numbers<[1], [0], [0], [1], [0, 0, 1, 1], [], []>} : vector<224x168xbf16>, vector<168x84xbf16>, vector<224x84xf32> -> vector<224x84xf32>
    %16 = arith.maximumf %12, %15 : vector<224x84xf32>
    %17 = arith.truncf %16 : vector<224x84xf32> to vector<224x84xbf16>
    %18 = vector.extract_strided_slice %17 {offsets = [0, 0], sizes = [160, 84], strides = [1, 1]} : vector<224x84xbf16> to vector<160x84xbf16>
    %c0_12 = arith.constant 0 : index
    %c0_13 = arith.constant 0 : index
    %c0_14 = arith.constant 0 : index
    %19 = vector.load %arg4[%c0_12, %c0_13, %c0_14] : memref<5x84x160xbf16, #tpu.memory_space<vmem>>, vector<1x84x160xbf16>
    %20 = vector.shape_cast %19 : vector<1x84x160xbf16> to vector<84x160xbf16>
    %cst_15 = arith.constant dense<0.000000e+00> : vector<160x160xf32>
    %21 = tpu.matmul %18, %20, %cst_15 {dimension_numbers = #tpu.dot_dimension_numbers<[1], [0], [0], [1], [0, 0, 1, 1], [], []>} : vector<160x84xbf16>, vector<84x160xbf16>, vector<160x160xf32> -> vector<160x160xf32>
    %c0_16 = arith.constant 0 : index
    %c0_17 = arith.constant 0 : index
    %22 = vector.load %arg5[%c0_16, %c0_17] : memref<1x160xf32, #tpu.memory_space<vmem>>, vector<1x160xf32>
    %23 = vector.broadcast %22 : vector<1x160xf32> to vector<160x160xf32>
    %24 = arith.addf %21, %23 : vector<160x160xf32>
    %25 = vector.extract_strided_slice %17 {offsets = [16, 0], sizes = [160, 84], strides = [1, 1]} : vector<224x84xbf16> to vector<160x84xbf16>
    %c1_18 = arith.constant 1 : index
    %c0_19 = arith.constant 0 : index
    %c0_20 = arith.constant 0 : index
    %26 = vector.load %arg4[%c1_18, %c0_19, %c0_20] : memref<5x84x160xbf16, #tpu.memory_space<vmem>>, vector<1x84x160xbf16>
    %27 = vector.shape_cast %26 : vector<1x84x160xbf16> to vector<84x160xbf16>
    %cst_21 = arith.constant dense<0.000000e+00> : vector<160x160xf32>
    %28 = tpu.matmul %25, %27, %cst_21 {dimension_numbers = #tpu.dot_dimension_numbers<[1], [0], [0], [1], [0, 0, 1, 1], [], []>} : vector<160x84xbf16>, vector<84x160xbf16>, vector<160x160xf32> -> vector<160x160xf32>
    %29 = arith.addf %24, %28 : vector<160x160xf32>
    %30 = vector.extract_strided_slice %17 {offsets = [32, 0], sizes = [160, 84], strides = [1, 1]} : vector<224x84xbf16> to vector<160x84xbf16>
    %c2 = arith.constant 2 : index
    %c0_22 = arith.constant 0 : index
    %c0_23 = arith.constant 0 : index
    %31 = vector.load %arg4[%c2, %c0_22, %c0_23] : memref<5x84x160xbf16, #tpu.memory_space<vmem>>, vector<1x84x160xbf16>
    %32 = vector.shape_cast %31 : vector<1x84x160xbf16> to vector<84x160xbf16>
    %cst_24 = arith.constant dense<0.000000e+00> : vector<160x160xf32>
    %33 = tpu.matmul %30, %32, %cst_24 {dimension_numbers = #tpu.dot_dimension_numbers<[1], [0], [0], [1], [0, 0, 1, 1], [], []>} : vector<160x84xbf16>, vector<84x160xbf16>, vector<160x160xf32> -> vector<160x160xf32>
    %34 = arith.addf %29, %33 : vector<160x160xf32>
    %35 = vector.extract_strided_slice %17 {offsets = [48, 0], sizes = [160, 84], strides = [1, 1]} : vector<224x84xbf16> to vector<160x84xbf16>
    %c3 = arith.constant 3 : index
    %c0_25 = arith.constant 0 : index
    %c0_26 = arith.constant 0 : index
    %36 = vector.load %arg4[%c3, %c0_25, %c0_26] : memref<5x84x160xbf16, #tpu.memory_space<vmem>>, vector<1x84x160xbf16>
    %37 = vector.shape_cast %36 : vector<1x84x160xbf16> to vector<84x160xbf16>
    %cst_27 = arith.constant dense<0.000000e+00> : vector<160x160xf32>
    %38 = tpu.matmul %35, %37, %cst_27 {dimension_numbers = #tpu.dot_dimension_numbers<[1], [0], [0], [1], [0, 0, 1, 1], [], []>} : vector<160x84xbf16>, vector<84x160xbf16>, vector<160x160xf32> -> vector<160x160xf32>
    %39 = arith.addf %34, %38 : vector<160x160xf32>
    %40 = vector.extract_strided_slice %17 {offsets = [64, 0], sizes = [160, 84], strides = [1, 1]} : vector<224x84xbf16> to vector<160x84xbf16>
    %c4 = arith.constant 4 : index
    %c0_28 = arith.constant 0 : index
    %c0_29 = arith.constant 0 : index
    %41 = vector.load %arg4[%c4, %c0_28, %c0_29] : memref<5x84x160xbf16, #tpu.memory_space<vmem>>, vector<1x84x160xbf16>
    %42 = vector.shape_cast %41 : vector<1x84x160xbf16> to vector<84x160xbf16>
    %cst_30 = arith.constant dense<0.000000e+00> : vector<160x160xf32>
    %43 = tpu.matmul %40, %42, %cst_30 {dimension_numbers = #tpu.dot_dimension_numbers<[1], [0], [0], [1], [0, 0, 1, 1], [], []>} : vector<160x84xbf16>, vector<84x160xbf16>, vector<160x160xf32> -> vector<160x160xf32>
    %44 = arith.addf %39, %43 : vector<160x160xf32>
    %c0_31 = arith.constant 0 : index
    %c0_32 = arith.constant 0 : index
    %45 = vector.load %arg9[%c0_31, %c0_32] : memref<1x120xf32, #tpu.memory_space<vmem>>, vector<1x120xf32>
    %46 = vector.extract_strided_slice %44 {offsets = [0, 0], sizes = [16, 160], strides = [1, 1]} : vector<160x160xf32> to vector<16x160xf32>
    %47 = vector.extract_strided_slice %44 {offsets = [16, 0], sizes = [16, 160], strides = [1, 1]} : vector<160x160xf32> to vector<16x160xf32>
    %48 = arith.maximumf %46, %47 : vector<16x160xf32>
    %49 = arith.truncf %48 : vector<16x160xf32> to vector<16x160xbf16>
    %c0_33 = arith.constant 0 : index
    %c0_34 = arith.constant 0 : index
    %c0_35 = arith.constant 0 : index
    %50 = vector.load %arg7[%c0_33, %c0_34, %c0_35] : memref<2x160x80xbf16, #tpu.memory_space<vmem>>, vector<1x160x80xbf16>
    %51 = vector.shape_cast %50 : vector<1x160x80xbf16> to vector<160x80xbf16>
    %cst_36 = arith.constant dense<0.000000e+00> : vector<16x80xf32>
    %52 = tpu.matmul %49, %51, %cst_36 {dimension_numbers = #tpu.dot_dimension_numbers<[1], [0], [0], [1], [0, 0, 1, 1], [], []>} : vector<16x160xbf16>, vector<160x80xbf16>, vector<16x80xf32> -> vector<16x80xf32>
    %c1_37 = arith.constant 1 : index
    %c0_38 = arith.constant 0 : index
    %c0_39 = arith.constant 0 : index
    %53 = vector.load %arg7[%c1_37, %c0_38, %c0_39] : memref<2x160x80xbf16, #tpu.memory_space<vmem>>, vector<1x160x80xbf16>
    %54 = vector.shape_cast %53 : vector<1x160x80xbf16> to vector<160x80xbf16>
    %cst_40 = arith.constant dense<0.000000e+00> : vector<16x80xf32>
    %55 = tpu.matmul %49, %54, %cst_40 {dimension_numbers = #tpu.dot_dimension_numbers<[1], [0], [0], [1], [0, 0, 1, 1], [], []>} : vector<16x160xbf16>, vector<160x80xbf16>, vector<16x80xf32> -> vector<16x80xf32>
    %56 = arith.maximumf %52, %55 : vector<16x80xf32>
    %57 = arith.truncf %56 : vector<16x80xf32> to vector<16x80xbf16>
    %c0_41 = arith.constant 0 : index
    %c0_42 = arith.constant 0 : index
    %c0_43 = arith.constant 0 : index
    %58 = vector.load %arg8[%c0_41, %c0_42, %c0_43] : memref<5x80x120xbf16, #tpu.memory_space<vmem>>, vector<1x80x120xbf16>
    %59 = vector.shape_cast %58 : vector<1x80x120xbf16> to vector<80x120xbf16>
    %cst_44 = arith.constant dense<0.000000e+00> : vector<16x120xf32>
    %60 = tpu.matmul %57, %59, %cst_44 {dimension_numbers = #tpu.dot_dimension_numbers<[1], [0], [0], [1], [0, 0, 1, 1], [], []>} : vector<16x80xbf16>, vector<80x120xbf16>, vector<16x120xf32> -> vector<16x120xf32>
    %61 = vector.broadcast %45 : vector<1x120xf32> to vector<16x120xf32>
    %62 = arith.addf %61, %60 : vector<16x120xf32>
    %63 = vector.extract_strided_slice %44 {offsets = [32, 0], sizes = [16, 160], strides = [1, 1]} : vector<160x160xf32> to vector<16x160xf32>
    %64 = vector.extract_strided_slice %44 {offsets = [48, 0], sizes = [16, 160], strides = [1, 1]} : vector<160x160xf32> to vector<16x160xf32>
    %65 = arith.maximumf %63, %64 : vector<16x160xf32>
    %66 = arith.truncf %65 : vector<16x160xf32> to vector<16x160xbf16>
    %c0_45 = arith.constant 0 : index
    %c0_46 = arith.constant 0 : index
    %c0_47 = arith.constant 0 : index
    %67 = vector.load %arg7[%c0_45, %c0_46, %c0_47] : memref<2x160x80xbf16, #tpu.memory_space<vmem>>, vector<1x160x80xbf16>
    %68 = vector.shape_cast %67 : vector<1x160x80xbf16> to vector<160x80xbf16>
    %cst_48 = arith.constant dense<0.000000e+00> : vector<16x80xf32>
    %69 = tpu.matmul %66, %68, %cst_48 {dimension_numbers = #tpu.dot_dimension_numbers<[1], [0], [0], [1], [0, 0, 1, 1], [], []>} : vector<16x160xbf16>, vector<160x80xbf16>, vector<16x80xf32> -> vector<16x80xf32>
    %c1_49 = arith.constant 1 : index
    %c0_50 = arith.constant 0 : index
    %c0_51 = arith.constant 0 : index
    %70 = vector.load %arg7[%c1_49, %c0_50, %c0_51] : memref<2x160x80xbf16, #tpu.memory_space<vmem>>, vector<1x160x80xbf16>
    %71 = vector.shape_cast %70 : vector<1x160x80xbf16> to vector<160x80xbf16>
    %cst_52 = arith.constant dense<0.000000e+00> : vector<16x80xf32>
    %72 = tpu.matmul %66, %71, %cst_52 {dimension_numbers = #tpu.dot_dimension_numbers<[1], [0], [0], [1], [0, 0, 1, 1], [], []>} : vector<16x160xbf16>, vector<160x80xbf16>, vector<16x80xf32> -> vector<16x80xf32>
    %73 = arith.maximumf %69, %72 : vector<16x80xf32>
    %74 = arith.truncf %73 : vector<16x80xf32> to vector<16x80xbf16>
    %c1_53 = arith.constant 1 : index
    %c0_54 = arith.constant 0 : index
    %c0_55 = arith.constant 0 : index
    %75 = vector.load %arg8[%c1_53, %c0_54, %c0_55] : memref<5x80x120xbf16, #tpu.memory_space<vmem>>, vector<1x80x120xbf16>
    %76 = vector.shape_cast %75 : vector<1x80x120xbf16> to vector<80x120xbf16>
    %cst_56 = arith.constant dense<0.000000e+00> : vector<16x120xf32>
    %77 = tpu.matmul %74, %76, %cst_56 {dimension_numbers = #tpu.dot_dimension_numbers<[1], [0], [0], [1], [0, 0, 1, 1], [], []>} : vector<16x80xbf16>, vector<80x120xbf16>, vector<16x120xf32> -> vector<16x120xf32>
    %78 = arith.addf %62, %77 : vector<16x120xf32>
    %79 = vector.extract_strided_slice %44 {offsets = [64, 0], sizes = [16, 160], strides = [1, 1]} : vector<160x160xf32> to vector<16x160xf32>
    %80 = vector.extract_strided_slice %44 {offsets = [80, 0], sizes = [16, 160], strides = [1, 1]} : vector<160x160xf32> to vector<16x160xf32>
    %81 = arith.maximumf %79, %80 : vector<16x160xf32>
    %82 = arith.truncf %81 : vector<16x160xf32> to vector<16x160xbf16>
    %c0_57 = arith.constant 0 : index
    %c0_58 = arith.constant 0 : index
    %c0_59 = arith.constant 0 : index
    %83 = vector.load %arg7[%c0_57, %c0_58, %c0_59] : memref<2x160x80xbf16, #tpu.memory_space<vmem>>, vector<1x160x80xbf16>
    %84 = vector.shape_cast %83 : vector<1x160x80xbf16> to vector<160x80xbf16>
    %cst_60 = arith.constant dense<0.000000e+00> : vector<16x80xf32>
    %85 = tpu.matmul %82, %84, %cst_60 {dimension_numbers = #tpu.dot_dimension_numbers<[1], [0], [0], [1], [0, 0, 1, 1], [], []>} : vector<16x160xbf16>, vector<160x80xbf16>, vector<16x80xf32> -> vector<16x80xf32>
    %c1_61 = arith.constant 1 : index
    %c0_62 = arith.constant 0 : index
    %c0_63 = arith.constant 0 : index
    %86 = vector.load %arg7[%c1_61, %c0_62, %c0_63] : memref<2x160x80xbf16, #tpu.memory_space<vmem>>, vector<1x160x80xbf16>
    %87 = vector.shape_cast %86 : vector<1x160x80xbf16> to vector<160x80xbf16>
    %cst_64 = arith.constant dense<0.000000e+00> : vector<16x80xf32>
    %88 = tpu.matmul %82, %87, %cst_64 {dimension_numbers = #tpu.dot_dimension_numbers<[1], [0], [0], [1], [0, 0, 1, 1], [], []>} : vector<16x160xbf16>, vector<160x80xbf16>, vector<16x80xf32> -> vector<16x80xf32>
    %89 = arith.maximumf %85, %88 : vector<16x80xf32>
    %90 = arith.truncf %89 : vector<16x80xf32> to vector<16x80xbf16>
    %c2_65 = arith.constant 2 : index
    %c0_66 = arith.constant 0 : index
    %c0_67 = arith.constant 0 : index
    %91 = vector.load %arg8[%c2_65, %c0_66, %c0_67] : memref<5x80x120xbf16, #tpu.memory_space<vmem>>, vector<1x80x120xbf16>
    %92 = vector.shape_cast %91 : vector<1x80x120xbf16> to vector<80x120xbf16>
    %cst_68 = arith.constant dense<0.000000e+00> : vector<16x120xf32>
    %93 = tpu.matmul %90, %92, %cst_68 {dimension_numbers = #tpu.dot_dimension_numbers<[1], [0], [0], [1], [0, 0, 1, 1], [], []>} : vector<16x80xbf16>, vector<80x120xbf16>, vector<16x120xf32> -> vector<16x120xf32>
    %94 = arith.addf %78, %93 : vector<16x120xf32>
    %95 = vector.extract_strided_slice %44 {offsets = [96, 0], sizes = [16, 160], strides = [1, 1]} : vector<160x160xf32> to vector<16x160xf32>
    %96 = vector.extract_strided_slice %44 {offsets = [112, 0], sizes = [16, 160], strides = [1, 1]} : vector<160x160xf32> to vector<16x160xf32>
    %97 = arith.maximumf %95, %96 : vector<16x160xf32>
    %98 = arith.truncf %97 : vector<16x160xf32> to vector<16x160xbf16>
    %c0_69 = arith.constant 0 : index
    %c0_70 = arith.constant 0 : index
    %c0_71 = arith.constant 0 : index
    %99 = vector.load %arg7[%c0_69, %c0_70, %c0_71] : memref<2x160x80xbf16, #tpu.memory_space<vmem>>, vector<1x160x80xbf16>
    %100 = vector.shape_cast %99 : vector<1x160x80xbf16> to vector<160x80xbf16>
    %cst_72 = arith.constant dense<0.000000e+00> : vector<16x80xf32>
    %101 = tpu.matmul %98, %100, %cst_72 {dimension_numbers = #tpu.dot_dimension_numbers<[1], [0], [0], [1], [0, 0, 1, 1], [], []>} : vector<16x160xbf16>, vector<160x80xbf16>, vector<16x80xf32> -> vector<16x80xf32>
    %c1_73 = arith.constant 1 : index
    %c0_74 = arith.constant 0 : index
    %c0_75 = arith.constant 0 : index
    %102 = vector.load %arg7[%c1_73, %c0_74, %c0_75] : memref<2x160x80xbf16, #tpu.memory_space<vmem>>, vector<1x160x80xbf16>
    %103 = vector.shape_cast %102 : vector<1x160x80xbf16> to vector<160x80xbf16>
    %cst_76 = arith.constant dense<0.000000e+00> : vector<16x80xf32>
    %104 = tpu.matmul %98, %103, %cst_76 {dimension_numbers = #tpu.dot_dimension_numbers<[1], [0], [0], [1], [0, 0, 1, 1], [], []>} : vector<16x160xbf16>, vector<160x80xbf16>, vector<16x80xf32> -> vector<16x80xf32>
    %105 = arith.maximumf %101, %104 : vector<16x80xf32>
    %106 = arith.truncf %105 : vector<16x80xf32> to vector<16x80xbf16>
    %c3_77 = arith.constant 3 : index
    %c0_78 = arith.constant 0 : index
    %c0_79 = arith.constant 0 : index
    %107 = vector.load %arg8[%c3_77, %c0_78, %c0_79] : memref<5x80x120xbf16, #tpu.memory_space<vmem>>, vector<1x80x120xbf16>
    %108 = vector.shape_cast %107 : vector<1x80x120xbf16> to vector<80x120xbf16>
    %cst_80 = arith.constant dense<0.000000e+00> : vector<16x120xf32>
    %109 = tpu.matmul %106, %108, %cst_80 {dimension_numbers = #tpu.dot_dimension_numbers<[1], [0], [0], [1], [0, 0, 1, 1], [], []>} : vector<16x80xbf16>, vector<80x120xbf16>, vector<16x120xf32> -> vector<16x120xf32>
    %110 = arith.addf %94, %109 : vector<16x120xf32>
    %111 = vector.extract_strided_slice %44 {offsets = [128, 0], sizes = [16, 160], strides = [1, 1]} : vector<160x160xf32> to vector<16x160xf32>
    %112 = vector.extract_strided_slice %44 {offsets = [144, 0], sizes = [16, 160], strides = [1, 1]} : vector<160x160xf32> to vector<16x160xf32>
    %113 = arith.maximumf %111, %112 : vector<16x160xf32>
    %114 = arith.truncf %113 : vector<16x160xf32> to vector<16x160xbf16>
    %c0_81 = arith.constant 0 : index
    %c0_82 = arith.constant 0 : index
    %c0_83 = arith.constant 0 : index
    %115 = vector.load %arg7[%c0_81, %c0_82, %c0_83] : memref<2x160x80xbf16, #tpu.memory_space<vmem>>, vector<1x160x80xbf16>
    %116 = vector.shape_cast %115 : vector<1x160x80xbf16> to vector<160x80xbf16>
    %cst_84 = arith.constant dense<0.000000e+00> : vector<16x80xf32>
    %117 = tpu.matmul %114, %116, %cst_84 {dimension_numbers = #tpu.dot_dimension_numbers<[1], [0], [0], [1], [0, 0, 1, 1], [], []>} : vector<16x160xbf16>, vector<160x80xbf16>, vector<16x80xf32> -> vector<16x80xf32>
    %c1_85 = arith.constant 1 : index
    %c0_86 = arith.constant 0 : index
    %c0_87 = arith.constant 0 : index
    %118 = vector.load %arg7[%c1_85, %c0_86, %c0_87] : memref<2x160x80xbf16, #tpu.memory_space<vmem>>, vector<1x160x80xbf16>
    %119 = vector.shape_cast %118 : vector<1x160x80xbf16> to vector<160x80xbf16>
    %cst_88 = arith.constant dense<0.000000e+00> : vector<16x80xf32>
    %120 = tpu.matmul %114, %119, %cst_88 {dimension_numbers = #tpu.dot_dimension_numbers<[1], [0], [0], [1], [0, 0, 1, 1], [], []>} : vector<16x160xbf16>, vector<160x80xbf16>, vector<16x80xf32> -> vector<16x80xf32>
    %121 = arith.maximumf %117, %120 : vector<16x80xf32>
    %122 = arith.truncf %121 : vector<16x80xf32> to vector<16x80xbf16>
    %c4_89 = arith.constant 4 : index
    %c0_90 = arith.constant 0 : index
    %c0_91 = arith.constant 0 : index
    %123 = vector.load %arg8[%c4_89, %c0_90, %c0_91] : memref<5x80x120xbf16, #tpu.memory_space<vmem>>, vector<1x80x120xbf16>
    %124 = vector.shape_cast %123 : vector<1x80x120xbf16> to vector<80x120xbf16>
    %cst_92 = arith.constant dense<0.000000e+00> : vector<16x120xf32>
    %125 = tpu.matmul %122, %124, %cst_92 {dimension_numbers = #tpu.dot_dimension_numbers<[1], [0], [0], [1], [0, 0, 1, 1], [], []>} : vector<16x80xbf16>, vector<80x120xbf16>, vector<16x120xf32> -> vector<16x120xf32>
    %126 = arith.addf %110, %125 : vector<16x120xf32>
    %127 = arith.truncf %126 : vector<16x120xf32> to vector<16x120xbf16>
    %c0_93 = arith.constant 0 : index
    %c0_94 = arith.constant 0 : index
    %128 = vector.load %arg10[%c0_93, %c0_94] : memref<120x84xbf16, #tpu.memory_space<vmem>>, vector<120x84xbf16>
    %cst_95 = arith.constant dense<0.000000e+00> : vector<16x84xf32>
    %129 = tpu.matmul %127, %128, %cst_95 {dimension_numbers = #tpu.dot_dimension_numbers<[1], [0], [0], [1], [0, 0, 1, 1], [], []>} : vector<16x120xbf16>, vector<120x84xbf16>, vector<16x84xf32> -> vector<16x84xf32>
    %c0_96 = arith.constant 0 : index
    %c0_97 = arith.constant 0 : index
    %130 = vector.load %arg11[%c0_96, %c0_97] : memref<1x84xf32, #tpu.memory_space<vmem>>, vector<1x84xf32>
    %131 = vector.broadcast %130 : vector<1x84xf32> to vector<16x84xf32>
    %132 = arith.addf %129, %131 : vector<16x84xf32>
    %133 = arith.truncf %132 : vector<16x84xf32> to vector<16x84xbf16>
    %c0_98 = arith.constant 0 : index
    %c0_99 = arith.constant 0 : index
    %134 = vector.load %arg12[%c0_98, %c0_99] : memref<84x128xbf16, #tpu.memory_space<vmem>>, vector<84x128xbf16>
    %cst_100 = arith.constant dense<0.000000e+00> : vector<16x128xf32>
    %135 = tpu.matmul %133, %134, %cst_100 {dimension_numbers = #tpu.dot_dimension_numbers<[1], [0], [0], [1], [0, 0, 1, 1], [], []>} : vector<16x84xbf16>, vector<84x128xbf16>, vector<16x128xf32> -> vector<16x128xf32>
    %c0_101 = arith.constant 0 : index
    %c0_102 = arith.constant 0 : index
    %136 = vector.load %arg13[%c0_101, %c0_102] : memref<1x128xf32, #tpu.memory_space<vmem>>, vector<1x128xf32>
    %137 = vector.broadcast %136 : vector<1x128xf32> to vector<16x128xf32>
    %138 = arith.addf %135, %137 : vector<16x128xf32>
    %c0_103 = arith.constant 0 : index
    %c0_104 = arith.constant 0 : index
    %139 = vector.load %arg14[%c0_103, %c0_104] : memref<16x128xf32, #tpu.memory_space<vmem>>, vector<16x128xf32>
    tpu.vector_store %arg14[%c0_103, %c0_104], %138 {strides = array<i32>} : memref<16x128xf32, #tpu.memory_space<vmem>>, vector<16x128xf32>,
    return
  }
  func.func @transform_0(%arg0: i32) -> (i32, i32) {
    %c0_i32 = arith.constant 0 : i32
    %c0_i32_0 = arith.constant 0 : i32
    return %arg0, %c0_i32 : i32, i32
  }
  func.func @transform_1(%arg0: i32) -> (i32, i32) {
    %c0_i32 = arith.constant 0 : i32
    %c0_i32_0 = arith.constant 0 : i32
    %c0_i32_1 = arith.constant 0 : i32
    return %c0_i32, %c0_i32_0 : i32, i32
  }
  func.func @transform_2(%arg0: i32) -> (i32, i32) {
    %c0_i32 = arith.constant 0 : i32
    %c0_i32_0 = arith.constant 0 : i32
    %c0_i32_1 = arith.constant 0 : i32
    return %c0_i32, %c0_i32_0 : i32, i32
  }
  func.func @transform_3(%arg0: i32) -> (i32, i32, i32) {
    %c0_i32 = arith.constant 0 : i32
    %c0_i32_0 = arith.constant 0 : i32
    %c0_i32_1 = arith.constant 0 : i32
    %c0_i32_2 = arith.constant 0 : i32
    return %c0_i32, %c0_i32_0, %c0_i32_1 : i32, i32, i32
  }
  func.func @transform_4(%arg0: i32) -> (i32, i32) {
    %c0_i32 = arith.constant 0 : i32
    %c0_i32_0 = arith.constant 0 : i32
    %c0_i32_1 = arith.constant 0 : i32
    return %c0_i32, %c0_i32_0 : i32, i32
  }
  func.func @transform_5(%arg0: i32) -> (i32, i32, i32) {
    %c0_i32 = arith.constant 0 : i32
    %c0_i32_0 = arith.constant 0 : i32
    %c0_i32_1 = arith.constant 0 : i32
    %c0_i32_2 = arith.constant 0 : i32
    return %c0_i32, %c0_i32_0, %c0_i32_1 : i32, i32, i32
  }
  func.func @transform_6(%arg0: i32) -> (i32, i32, i32) {
    %c0_i32 = arith.constant 0 : i32
    %c0_i32_0 = arith.constant 0 : i32
    %c0_i32_1 = arith.constant 0 : i32
    %c0_i32_2 = arith.constant 0 : i32
    return %c0_i32, %c0_i32_0, %c0_i32_1 : i32, i32, i32
  }
  func.func @transform_7(%arg0: i32) -> (i32, i32, i32) {
    %c0_i32 = arith.constant 0 : i32
    %c0_i32_0 = arith.constant 0 : i32
    %c0_i32_1 = arith.constant 0 : i32
    %c0_i32_2 = arith.constant 0 : i32
    return %c0_i32, %c0_i32_0, %c0_i32_1 : i32, i32, i32
  }
  func.func @transform_8(%arg0: i32) -> (i32, i32) {
    %c0_i32 = arith.constant 0 : i32
    %c0_i32_0 = arith.constant 0 : i32
    %c0_i32_1 = arith.constant 0 : i32
    return %c0_i32, %c0_i32_0 : i32, i32
  }
  func.func @transform_9(%arg0: i32) -> (i32, i32) {
    %c0_i32 = arith.constant 0 : i32
    %c0_i32_0 = arith.constant 0 : i32
    %c0_i32_1 = arith.constant 0 : i32
    return %c0_i32, %c0_i32_0 : i32, i32
  }
  func.func @transform_10(%arg0: i32) -> (i32, i32) {
    %c0_i32 = arith.constant 0 : i32
    %c0_i32_0 = arith.constant 0 : i32
    %c0_i32_1 = arith.constant 0 : i32
    return %c0_i32, %c0_i32_0 : i32, i32
  }
  func.func @transform_11(%arg0: i32) -> (i32, i32) {
    %c0_i32 = arith.constant 0 : i32
    %c0_i32_0 = arith.constant 0 : i32
    %c0_i32_1 = arith.constant 0 : i32
    return %c0_i32, %c0_i32_0 : i32, i32
  }
  func.func @transform_12(%arg0: i32) -> (i32, i32) {
    %c0_i32 = arith.constant 0 : i32
    %c0_i32_0 = arith.constant 0 : i32
    %c0_i32_1 = arith.constant 0 : i32
    return %c0_i32, %c0_i32_0 : i32, i32
  }
  func.func @transform_13(%arg0: i32) -> (i32, i32) {
    %c0_i32 = arith.constant 0 : i32
    %c0_i32_0 = arith.constant 0 : i32
    return %arg0, %c0_i32 : i32, i32
  }
}

</mosaic_0001>

<bundles_post_ra>
// kernel: tile.13
= control target key start
LH: loop header
LB: loop body
LE: loop exit
PB: predicated region body
PF: predicated region fallthrough
CT: control target
= control target key end

     0   :  { %s40_s0 = inlined_call_operand.vmem [shape: f32[6], index: 0, kind: input, shape index: {}]   ;;  %s41_s1 = inlined_call_operand.vmem [shape: f32[28,6], index: 1, kind: output, shape index: {}]  }
   0x1   :  { %v4_v0 = vld [vmem:[%s40_s0] ss:$0 sm:$0xff] }
   0x2   :  { %5 = vst [vmem:[%s41_s1] sm:$0xff] %v4_v0 }
   0x3   :  { %12 = vst [vmem:[%s41_s1 + $0x8] sm:$0xff] %v4_v0 }
   0x4   :  { %13 = vst [vmem:[%s41_s1 + $0x10] sm:$0xff] %v4_v0 }
   0x5   :  { %14 = vst [vmem:[%s41_s1 + $0x18] sm:$0xff] %v4_v0 }

// kernel: tile.14
= control target key start
LH: loop header
LB: loop body
LE: loop exit
PB: predicated region body
PF: predicated region fallthrough
CT: control target
= control target key end

     0   :  { %vm9_vm0 = vcmask 15360   ;;  %s248_s12 = smov 126   ;;  %s249_s13 = smov 114   ;;  %vm3_vm1 = vcmask 48128   ;;  %vm13_vm2 = vcmask 31744   ;;  %vm16_vm3 = vcmask 1048560   ;;  %s378_s0 = inlined_call_operand.vmem [shape: f32[28,6], index: 0, kind: input, shape index: {}]   ;;  %s379_s1 = inlined_call_operand.vmem [shape: f32[1,168], index: 1, kind: output, shape index: {}]  }
   0x1   :  { %v192_v0 = vld [vmem:[%s378_s0 + $0x15] sm:$0x1]   ;;  %v195_v3 = vld [vmem:[%s378_s0 + $0x13] sm:$0x1]   ;;  %v197_v4 = vld [vmem:[%s378_s0 + $0x11] sm:$0x1]  }
   0x2   :  { %v193_v1 = vld [vmem:[%s378_s0 + $0x15] sm:$0x1]   ;;  %26 = vrot.lane.b32.xlu1 %v195_v3, %s249_s13  ;;  %s250_s16 = smov 102   ;;  %v194_v5 = vld [vmem:[%s378_s0 + $0x14] sm:$0x1]   ;;  %s251_s21 = smov 120  }
   0x3   :  { %v10_v2 = vsel %vm9_vm0, %v193_v1, %v192_v0  ;;  %38 = vrot.lane.b32.xlu2 %v197_v4, %s250_s16  ;;  %v196_v6 = vld [vmem:[%s378_s0 + $0x12] sm:$0x1]   ;;  %s252_s22 = smov 108   ;;  %v198_v7 = vld [vmem:[%s378_s0 + $0x10] sm:$0x1]   ;;  %s253_s25 = smov 96  }
   0x4   :  { %11 = vrot.lane.b32.xlu0 %v10_v2, %s248_s12  ;;  %v199_v8 = vld [vmem:[%s378_s0 + $0xf] sm:$0x1]   ;;  %v200_v9 = vld [vmem:[%s378_s0 + $0xe] sm:$0x1]   ;;  %s254_s30 = smov 90   ;;  %s255_s2 = smov 84  }
   0x5   :  { %v201_v10 = vld [vmem:[%s378_s0 + $0xd] sm:$0x1]   ;;  %s256_s5 = smov 78   ;;  %v202_v11 = vld [vmem:[%s378_s0 + $0xc] sm:$0x1]   ;;  %s257_s10 = smov 72  }
   0x6   :  { %v203_v12 = vld [vmem:[%s378_s0 + $0xb] sm:$0x1]   ;;  %s258_s11 = smov 66   ;;  %v204_v13 = vld [vmem:[%s378_s0 + $0xa] sm:$0x1]   ;;  %s259_s14 = smov 60  }
   0x7   :  { %v205_v14 = vld [vmem:[%s378_s0 + $0x9] sm:$0x1]   ;;  %v206_v15 = vld [vmem:[%s378_s0 + $0x8] sm:$0x1]   ;;  %s260_s19 = smov 54   ;;  %s261_s20 = smov 48  }
   0x8   :  { %v207_v16 = vld [vmem:[%s378_s0 + $0x7] sm:$0x1]   ;;  %s262_s23 = smov 42   ;;  %v208_v17 = vld [vmem:[%s378_s0 + $0x6] sm:$0x1]   ;;  %s263_s28 = smov 36  }
   0x9   :  { %v209_v18 = vld [vmem:[%s378_s0 + $0x1b] sm:$0x1]   ;;  %s264_s29 = smov 34   ;;  %v210_v19 = vld [vmem:[%s378_s0 + $0x5] sm:$0x1]   ;;  %s265_s3 = smov 30  }
   0xa   :  { %32 = vrot.lane.b32.xlu1 %v196_v6, %s252_s22  ;;  %v211_v20 = vld [vmem:[%s378_s0 + $0x1a] sm:$0x1]   ;;  %v212_v21 = vld [vmem:[%s378_s0 + $0x4] sm:$0x1]   ;;  %s266_s8 = smov 28   ;;  %s267_s9 = smov 24  }
   0xb   :  { %44 = vrot.lane.b32.xlu2 %v198_v7, %s253_s25  ;;  %v213_v22 = vld [vmem:[%s378_s0 + $0x19] sm:$0x1]   ;;  %s268_s12 = smov 22   ;;  %v214_v23 = vld [vmem:[%s378_s0 + $0x3] sm:$0x1]   ;;  %s269_s17 = smov 18  }
   0xc   :  { %20 = vrot.lane.b32.xlu0 %v194_v5, %s251_s21  ;;  %v215_v24 = vld [vmem:[%s378_s0 + $0x18] sm:$0x1]   ;;  %s270_s18 = smov 16   ;;  %v216_v25 = vld [vmem:[%s378_s0 + $0x2] sm:$0x1]   ;;  %s271_s21 = smov 12  }
   0xd   :  { %v217_v26 = vld [vmem:[%s378_s0 + $0x17] sm:$0x1]   ;;  %v218_v27 = vld [vmem:[%s378_s0 + $0x1] sm:$0x1]   ;;  %s272_s26 = smov 10   ;;  %s273_s27 = smov 6  }
   0xe   :  { %v219_v28 = vld [vmem:[%s378_s0 + $0x16] sm:$0x1]   ;;  %v2_v29 = vld [vmem:[%s378_s0] sm:$0x1]   ;;  %vm22_vm4 = vcmask 1032128   ;;  %vm28_vm5 = vcmask 982928  }
   0xf   :  { %4 = vst.msk [vmem:[#allocation0] sm:$0x1] %vm3_vm1, %v2_v29   ;;  %vm34_vm6 = vcmask 933728   ;;  %vm40_vm7 = vcmask 884528   ;;  %vm46_vm8 = vcmask 835328   ;;  %vm52_vm9 = vcmask 786128  }
  0x10   :  { %vm58_vm10 = vcmask 736928   ;;  %vm64_vm11 = vcmask 687728   ;;  %vm70_vm12 = vcmask 638528   ;;  %vm76_vm13 = vcmask 589328  }
  0x11   :  { %vm82_vm14 = vcmask 540128   ;;  %vm88_vm15 = vcmask 490928   ;;  %vm94_vm0 = vcmask 441728   ;;  %vm100_vm1 = vcmask 392528  }
  0x12   :  { %56 = vrot.lane.b32.xlu1 %v200_v9, %s255_s2 }
  0x13   :  { %62 = vrot.lane.b32.xlu2 %v201_v10, %s256_s5 }
  0x14   :  { %50 = vrot.lane.b32.xlu0 %v199_v8, %s254_s30  ;;  %s274_s30 = smov 4  }
  0x1a   :  { %74 = vrot.lane.b32.xlu1 %v203_v12, %s258_s11 }
  0x1b   :  { %80 = vrot.lane.b32.xlu2 %v204_v13, %s259_s14 }
  0x1c   :  { %68 = vrot.lane.b32.xlu0 %v202_v11, %s257_s10 }
  0x22   :  { %92 = vrot.lane.b32.xlu1 %v206_v15, %s261_s20 }
  0x23   :  { %98 = vrot.lane.b32.xlu2 %v207_v16, %s262_s23 }
  0x24   :  { %86 = vrot.lane.b32.xlu0 %v205_v14, %s260_s19 }
  0x2a   :  { %110 = vrot.lane.b32.xlu1 %v209_v18, %s264_s29 }
  0x2b   :  { %117 = vrot.lane.b32.xlu2 %v210_v19, %s265_s3 }
  0x2c   :  { %104 = vrot.lane.b32.xlu0 %v208_v17, %s263_s28 }
  0x32   :  { %130 = vrot.lane.b32.xlu1 %v212_v21, %s267_s9 }
  0x33   :  { %136 = vrot.lane.b32.xlu2 %v213_v22, %s268_s12 }
  0x34   :  { %123 = vrot.lane.b32.xlu0 %v211_v20, %s266_s8 }
  0x3a   :  { %149 = vrot.lane.b32.xlu1 %v215_v24, %s270_s18 }
  0x3b   :  { %156 = vrot.lane.b32.xlu2 %v216_v25, %s271_s21 }
  0x3c   :  { %143 = vrot.lane.b32.xlu0 %v214_v23, %s269_s17 }
  0x42   :  { %169 = vrot.lane.b32.xlu1 %v218_v27, %s273_s27 }
  0x43   :  { %175 = vrot.lane.b32.xlu2 %v219_v28, %s274_s30 }
  0x44   :  { %162 = vrot.lane.b32.xlu0 %v217_v26, %s272_s26 }
  0x5d   :  { %v39_v30 = vpop.permute.xlu2 %38  }
  0x65   :  { %v45_v31 = vpop.permute.xlu2 %44  }
  0x6d   :  { %v63_v32 = vpop.permute.xlu2 %62  }
  0x74   :  { %v27_v34 = vpop.permute.xlu1 %26  }
  0x75   :  { %v81_v35 = vpop.permute.xlu2 %80  }
  0x76   :  { %v12_v33 = vpop.permute.xlu0 %11  }
  0x77   :  { %15 = vst.msk [vmem:[#allocation0 + $0x8] sm:$0x1] %vm13_vm2, %v12_v33   ;;  %vm106_vm2 = vcmask 343328  }
  0x78   :  { %17 = vst.msk [vmem:[#allocation0] sm:$0x1] %vm16_vm3, %v12_v33   ;;  %vm119_vm3 = vcmask 294128  }
  0x7c   :  { %v33_v37 = vpop.permute.xlu1 %32  }
  0x7d   :  { %v99_v38 = vpop.permute.xlu2 %98  }
  0x7e   :  { %v21_v36 = vpop.permute.xlu0 %20  }
  0x7f   :  { %23 = vst.msk [vmem:[#allocation0] sm:$0x1] %vm22_vm4, %v21_v36   ;;  %vm112_vm4 = vcmask 326928  }
  0x80   :  { %29 = vst.msk [vmem:[#allocation0] sm:$0x1] %vm28_vm5, %v27_v34   ;;  %vm125_vm5 = vcmask 277728  }
  0x81   :  { %35 = vst.msk [vmem:[#allocation0] sm:$0x1] %vm34_vm6, %v33_v37   ;;  %vm138_vm6 = vcmask 228528  }
  0x82   :  { %41 = vst.msk [vmem:[#allocation0] sm:$0x1] %vm40_vm7, %v39_v30   ;;  %vm132_vm7 = vcmask 244928  }
  0x83   :  { %47 = vst.msk [vmem:[#allocation0] sm:$0x1] %vm46_vm8, %v45_v31   ;;  %vm145_vm8 = vcmask 195728  }
  0x84   :  { %v57_v40 = vpop.permute.xlu1 %56  }
  0x85   :  { %v118_v41 = vpop.permute.xlu2 %117  }
  0x86   :  { %v51_v39 = vpop.permute.xlu0 %50  }
  0x87   :  { %53 = vst.msk [vmem:[#allocation0] sm:$0x1] %vm52_vm9, %v51_v39   ;;  %vm158_vm9 = vcmask 146528  }
  0x88   :  { %59 = vst.msk [vmem:[#allocation0] sm:$0x1] %vm58_vm10, %v57_v40   ;;  %vm151_vm10 = vcmask 179328  }
  0x89   :  { %65 = vst.msk [vmem:[#allocation0] sm:$0x1] %vm64_vm11, %v63_v32   ;;  %vm164_vm11 = vcmask 130128  }
  0x8c   :  { %v75_v43 = vpop.permute.xlu1 %74  }
  0x8d   :  { %v137_v44 = vpop.permute.xlu2 %136  }
  0x8e   :  { %v69_v42 = vpop.permute.xlu0 %68  }
  0x8f   :  { %71 = vst.msk [vmem:[#allocation0] sm:$0x1] %vm70_vm12, %v69_v42   ;;  %vm177_vm12 = vcmask 80928  }
  0x90   :  { %77 = vst.msk [vmem:[#allocation0] sm:$0x1] %vm76_vm13, %v75_v43   ;;  %vm171_vm13 = vcmask 97328  }
  0x91   :  { %83 = vst.msk [vmem:[#allocation0] sm:$0x1] %vm82_vm14, %v81_v35  }
  0x94   :  { %v93_v46 = vpop.permute.xlu1 %92  }
  0x95   :  { %v157_v47 = vpop.permute.xlu2 %156  }
  0x96   :  { %v87_v45 = vpop.permute.xlu0 %86  }
  0x97   :  { %89 = vst.msk [vmem:[#allocation0] sm:$0x1] %vm88_vm15, %v87_v45  }
  0x98   :  { %95 = vst.msk [vmem:[#allocation0] sm:$0x1] %vm94_vm0, %v93_v46  }
  0x99   :  { %101 = vst.msk [vmem:[#allocation0] sm:$0x1] %vm100_vm1, %v99_v38  }
  0x9c   :  { %v111_v49 = vpop.permute.xlu1 %110  }
  0x9d   :  { %114 = vst.msk [vmem:[#allocation0 + $0x8] sm:$0x1] %vm112_vm4, %v111_v49   ;;  %v176_v50 = vpop.permute.xlu2 %175  }
  0x9e   :  { %v105_v48 = vpop.permute.xlu0 %104  }
  0x9f   :  { %107 = vst.msk [vmem:[#allocation0] sm:$0x1] %vm106_vm2, %v105_v48  }
  0xa0   :  { %120 = vst.msk [vmem:[#allocation0] sm:$0x1] %vm119_vm3, %v118_v41  }
  0xa4   :  { %v131_v52 = vpop.permute.xlu1 %130  }
  0xa5   :  { %133 = vst.msk [vmem:[#allocation0] sm:$0x1] %vm132_vm7, %v131_v52  }
  0xa6   :  { %v124_v51 = vpop.permute.xlu0 %123  }
  0xa7   :  { %127 = vst.msk [vmem:[#allocation0 + $0x8] sm:$0x1] %vm125_vm5, %v124_v51  }
  0xa8   :  { %140 = vst.msk [vmem:[#allocation0 + $0x8] sm:$0x1] %vm138_vm6, %v137_v44  }
  0xac   :  { %v150_v54 = vpop.permute.xlu1 %149  }
  0xad   :  { %153 = vst.msk [vmem:[#allocation0 + $0x8] sm:$0x1] %vm151_vm10, %v150_v54  }
  0xae   :  { %v144_v53 = vpop.permute.xlu0 %143  }
  0xaf   :  { %146 = vst.msk [vmem:[#allocation0] sm:$0x1] %vm145_vm8, %v144_v53  }
  0xb0   :  { %159 = vst.msk [vmem:[#allocation0] sm:$0x1] %vm158_vm9, %v157_v47  }
  0xb4   :  { %v170_v56 = vpop.permute.xlu1 %169  }
  0xb5   :  { %172 = vst.msk [vmem:[#allocation0] sm:$0x1] %vm171_vm13, %v170_v56  }
  0xb6   :  { %v163_v55 = vpop.permute.xlu0 %162  }
  0xb7   :  { %166 = vst.msk [vmem:[#allocation0 + $0x8] sm:$0x1] %vm164_vm11, %v163_v55  }
  0xb8   :  { %179 = vst.msk [vmem:[#allocation0 + $0x8] sm:$0x1] %vm177_vm12, %v176_v50  }
  0xbc   :  { %v182_v58 = vld [vmem:[#allocation0] sm:$0x1] }
  0xbd   :  { %185 = vst [vmem:[%s379_s1] sm:$0x1] %v182_v58 }
  0xbf   :  { %v187_v57 = vld [vmem:[#allocation0 + $0x8] sm:$0x1] }
  0xc0   :  { %220 = vst [vmem:[%s379_s1 + $0x1] sm:$0x1] %v187_v57 }

// kernel: tile.18
= control target key start
LH: loop header
LB: loop body
LE: loop exit
PB: predicated region body
PF: predicated region fallthrough
CT: control target
= control target key end

     0   :  { %s28_s0 = inlined_call_operand.vmem [shape: f32[16], index: 0, kind: input, shape index: {}]   ;;  %s29_s1 = inlined_call_operand.vmem [shape: f32[10,16], index: 1, kind: output, shape index: {}]  }
   0x1   :  { %v4_v0 = vld [vmem:[%s28_s0] ss:$0 sm:$0xff] }
   0x2   :  { %5 = vst [vmem:[%s29_s1] sm:$0xff] %v4_v0 }
   0x3   :  { %8 = vst [vmem:[%s29_s1 + $0x8] sm:$0xff] %v4_v0 }

// kernel: tile.19
= control target key start
LH: loop header
LB: loop body
LE: loop exit
PB: predicated region body
PF: predicated region fallthrough
CT: control target
= control target key end

     0   :  { %s76_s10 = smov 112   ;;  %s77_s11 = smov 80   ;;  %vm4_vm0 = vcmask 130048   ;;  %vm10_vm1 = vcmask 1048448   ;;  %vm16_vm2 = vcmask 917248   ;;  %vm22_vm3 = vcmask 786048   ;;  %s123_s0 = inlined_call_operand.vmem [shape: f32[10,16], index: 0, kind: input, shape index: {}]   ;;  %s124_s1 = inlined_call_operand.vmem [shape: f32[1,160], index: 1, kind: output, shape index: {}]  }
   0x1   :  { %v61_v0 = vld [vmem:[%s123_s0 + $0x7] sm:$0x1]   ;;  %v63_v1 = vld [vmem:[%s123_s0 + $0x5] sm:$0x1]   ;;  %v65_v2 = vld [vmem:[%s123_s0 + $0x3] sm:$0x1]  }
   0x2   :  { %8 = vrot.lane.b32.xlu0 %v61_v0, %s76_s10  ;;  %20 = vrot.lane.b32.xlu1 %v63_v1, %s77_s11  ;;  %s78_s14 = smov 48   ;;  %v62_v3 = vld [vmem:[%s123_s0 + $0x6] sm:$0x1]   ;;  %v64_v4 = vld [vmem:[%s123_s0 + $0x4] sm:$0x1]   ;;  %s79_s19 = smov 96  }
   0x3   :  { %32 = vrot.lane.b32.xlu2 %v65_v2, %s78_s14  ;;  %s80_s20 = smov 64   ;;  %v66_v5 = vld [vmem:[%s123_s0 + $0x2] sm:$0x1]   ;;  %s43_s23 = smov 3  ;;  %vm28_vm4 = vcmask 654848   ;;  %vm34_vm5 = vcmask 523648  }
   0x4   :  { %s81_s24 = smov 32   ;;  %v67_v6 = vld [vmem:[%s123_s0 + $0x1] ss:$8 sm:%s43_s23]   ;;  %s82_s27 = smov 16   ;;  %vm40_vm6 = vcmask 392448   ;;  %vm47_vm7 = vcmask 261248  }
   0x5   :  { %s2_s28 = smov 3 }
   0x6   :  { %v3_v7 = vld [vmem:[%s123_s0] ss:$8 sm:%s2_s28]  }
   0x7   :  { %5 = vst.msk [vmem:[#allocation0] ss:$8 sm:$0x3] %vm4_vm0, %v3_v7  }
   0xa   :  { %14 = vrot.lane.b32.xlu0 %v62_v3, %s79_s19  ;;  %26 = vrot.lane.b32.xlu1 %v64_v4, %s80_s20 }
   0xb   :  { %38 = vrot.lane.b32.xlu2 %v66_v5, %s81_s24 }
  0x12   :  { %45 = vrot.lane.b32.xlu0 %v67_v6, %s82_s27 }
  0x5d   :  { %v33_v8 = vpop.permute.xlu2 %32  }
  0x65   :  { %v39_v9 = vpop.permute.xlu2 %38  }
  0x74   :  { %v9_v10 = vpop.permute.xlu0 %8   ;;  %v21_v11 = vpop.permute.xlu1 %20  }
  0x75   :  { %11 = vst.msk [vmem:[#allocation0] sm:$0x1] %vm10_vm1, %v9_v10  }
  0x7c   :  { %v15_v12 = vpop.permute.xlu0 %14   ;;  %v27_v13 = vpop.permute.xlu1 %26  }
  0x7d   :  { %17 = vst.msk [vmem:[#allocation0] sm:$0x1] %vm16_vm2, %v15_v12  }
  0x7e   :  { %23 = vst.msk [vmem:[#allocation0] sm:$0x1] %vm22_vm3, %v21_v11  }
  0x7f   :  { %29 = vst.msk [vmem:[#allocation0] sm:$0x1] %vm28_vm4, %v27_v13  }
  0x80   :  { %35 = vst.msk [vmem:[#allocation0] sm:$0x1] %vm34_vm5, %v33_v8  }
  0x81   :  { %41 = vst.msk [vmem:[#allocation0] sm:$0x1] %vm40_vm6, %v39_v9  }
  0x84   :  { %v46_v14 = vpop.permute.xlu0 %45  }
  0x85   :  { %48 = vst.msk [vmem:[#allocation0] ss:$8 sm:$0x3] %vm47_vm7, %v46_v14  }
  0x8c   :  { %v51_v15 = vld [vmem:[#allocation0] sm:$0x1]  ;;  %v56_v16 = vld [vmem:[#allocation0 + $0x8] sm:$0x1] }
  0x8d   :  { %54 = vst [vmem:[%s124_s1] sm:$0x1] %v51_v15 }
  0x8e   :  { %68 = vst [vmem:[%s124_s1 + $0x1] sm:$0x1] %v56_v16 }

// kernel: lenet_forward.1
= control target key start
LH: loop header
LB: loop body
LE: loop exit
PB: predicated region body
PF: predicated region fallthrough
CT: control target
= control target key end

     0   :  { %vm870_vm0 = vcmask 1046528   ;;  %vm785_vm1 = vcmask 113664   ;;  %vm1982_vm2 = vcmask 1043456   ;;  %vm2599_vm3 = vcmask 1041408   ;;  %s9630_s1 = inlined_call_operand.vmem [shape: bf16[270,168], index: 1, kind: input, shape index: {}]   ;;  %s9631_s0 = inlined_call_operand.vmem [shape: bf16[448,270], index: 0, kind: input, shape index: {}]   ;;  %s9632_s2 = inlined_call_operand.vmem [shape: f32[1,168], index: 2, kind: input, shape index: {}]   ;;  %s9633_s5 = inlined_call_operand.vmem [shape: bf16[2,168,84], index: 5, kind: input, shape index: {}]   ;;  %s9634_s3 = inlined_call_operand.vmem [shape: bf16[5,84,160], index: 3, kind: input, shape index: {}]   ;;  %s9635_s4 = inlined_call_operand.vmem [shape: f32[1,160], index: 4, kind: input, shape index: {}]   ;;  %s9636_s6 = inlined_call_operand.vmem [shape: bf16[2,160,80], index: 6, kind: input, shape index: {}]   ;;  %s9637_s7 = inlined_call_operand.vmem [shape: bf16[5,80,120], index: 7, kind: input, shape index: {}]   ;;  %s9638_s8 = inlined_call_operand.vmem [shape: f32[1,120], index: 8, kind: input, shape index: {}]   ;;  %s9639_s9 = inlined_call_operand.vmem [shape: bf16[120,84], index: 9, kind: input, shape index: {}]   ;;  %s9640_s10 = inlined_call_operand.vmem [shape: f32[1,84], index: 10, kind: input, shape index: {}]   ;;  %s9641_s11 = inlined_call_operand.vmem [shape: bf16[84,128], index: 11, kind: input, shape index: {}]   ;;  %s9642_s12 = inlined_call_operand.vmem [shape: f32[1,128], index: 12, kind: input, shape index: {}]   ;;  %s9643_s13 = inlined_call_operand.vmem [shape: f32[16,128], index: 13, kind: output, shape index: {}]  }
   0x1   :  { %v5041_v0 = vld [vmem:[%s9630_s1 + $0x70] sm:$0xf]  ;;  %v6052_v1 = vld [vmem:[%s9630_s1 + $0x74] sm:$0xf0]  ;;  %v5113_v5 = vld [vmem:[%s9630_s1 + $0x100] sm:$0xf] }
   0x2   :  { %v5105_v2 = vld [vmem:[%s9630_s1 + $0xf0] sm:$0xf]  ;;  %v5042_v3 = vor.u32 %v6052_v1, %v5041_v0  ;;  %v6068_v4 = vld [vmem:[%s9630_s1 + $0xf4] sm:$0xf0]  ;;  %v6070_v6 = vld [vmem:[%s9630_s1 + $0x104] sm:$0x70] }
   0x3   :  { %v5106_v7 = vor.u32 %v6068_v4, %v5105_v2  ;;  %v5114_v8 = vor.u32 %v6070_v6, %v5113_v5  ;;  %v5033_v9 = vld [vmem:[%s9630_s1 + $0x60] sm:$0xf]  ;;  %v6050_v10 = vld [vmem:[%s9630_s1 + $0x64] sm:$0xf0]  ;;  %v5955_v15 = vld [vmem:[%s9631_s0 + $0x10] sm:$0xf0] }
   0x4   :  { %v5097_v11 = vld [vmem:[%s9630_s1 + $0xe0] sm:$0xf]  ;;  %877 = vmatpush.bf16.msra.mxu0 %v5042_v3  ;;  %v5034_v12 = vor.u32 %v6050_v10, %v5033_v9  ;;  %v6066_v13 = vld [vmem:[%s9630_s1 + $0xe4] sm:$0xf0]  ;;  %v5025_v19 = vld [vmem:[%s9630_s1 + $0x50] sm:$0xf] }
   0x5   :  { %v4657_v14 = vld [vmem:[%s9631_s0 + $0x8] sm:$0xf]  ;;  %1026 = vmatpush.bf16.msra.mxu1 %v5106_v7  ;;  %v872_v16 = vsel %vm870_vm0, %v5114_v8, 0  ;;  %v5098_v17 = vor.u32 %v6066_v13, %v5097_v11  ;;  %v6048_v20 = vld [vmem:[%s9630_s1 + $0x54] sm:$0xf0]  ;;  %vm1939_vm4 = vcmask 326656  }
   0x6   :  { %v6311_v18 = vor.u32 %v5955_v15, %v4657_v14  ;;  %1182 = vmatpush.bf16.msra.mxu2 %v872_v16  ;;  %v5089_v21 = vld [vmem:[%s9630_s1 + $0xd0] sm:$0xf]  ;;  %v6064_v22 = vld [vmem:[%s9630_s1 + $0xd4] sm:$0xf0]  ;;  %v5026_v23 = vor.u32 %v6048_v20, %v5025_v19  ;;  %v5017_v25 = vld [vmem:[%s9630_s1 + $0x40] sm:$0xf] }
   0x7   :  { %v5090_v24 = vor.u32 %v6064_v22, %v5089_v21  ;;  %v6046_v26 = vld [vmem:[%s9630_s1 + $0x44] sm:$0xf0]  ;;  %v5081_v27 = vld [vmem:[%s9630_s1 + $0xc0] sm:$0xf]  ;;  %v6067_v29 = vld [vmem:[%s9630_s1 + $0xf4] sm:$0xf] }
   0x8   :  { %878 = vmatpush.bf16.msra.mxu0 %v5034_v12  ;;  %v6062_v28 = vld [vmem:[%s9630_s1 + $0xc4] sm:$0xf0]  ;;  %v5107_v30 = vld [vmem:[%s9630_s1 + $0xf8] sm:$0xf0]  ;;  %v5018_v31 = vor.u32 %v6046_v26, %v5017_v25  ;;  %v5009_v34 = vld [vmem:[%s9630_s1 + $0x30] sm:$0xf] }
   0x9   :  { %1027 = vmatpush.bf16.msra.mxu1 %v5098_v17  ;;  %5119 = vmatmul.msk.bf16.vlgmr.msra.gmra.mxu2 %vm785_vm1, %v6311_v18  ;;  %v5110_v32 = vor.u32 %v6067_v29, %v5107_v30  ;;  %v5082_v33 = vor.u32 %v6062_v28, %v5081_v27  ;;  %v6044_v35 = vld [vmem:[%s9630_s1 + $0x34] sm:$0xf0]  ;;  %v5073_v36 = vld [vmem:[%s9630_s1 + $0xb0] sm:$0xf]  ;;  %v5001_v40 = vld [vmem:[%s9630_s1 + $0x20] sm:$0xf] }
   0xa   :  { %v6060_v37 = vld [vmem:[%s9630_s1 + $0xb4] sm:$0xf0]  ;;  %v5010_v38 = vor.u32 %v6044_v35, %v5009_v34  ;;  %v6042_v41 = vld [vmem:[%s9630_s1 + $0x24] sm:$0xf0]  ;;  %v5065_v42 = vld [vmem:[%s9630_s1 + $0xa0] sm:$0xf] }
   0xb   :  { %1473 = vmatpush.bf16.msrb.mxu2 %v5110_v32  ;;  %v5074_v39 = vor.u32 %v6060_v37, %v5073_v36  ;;  %v6058_v43 = vld [vmem:[%s9630_s1 + $0xa4] sm:$0xf0]  ;;  %v4669_v44 = vld [vmem:[%s9631_s0 + $0x20] sm:$0xf]  ;;  %v5958_v45 = vld [vmem:[%s9631_s0 + $0x28] sm:$0xf0]  ;;  %v5002_v46 = vor.u32 %v6042_v41, %v5001_v40 }
   0xc   :  { %879 = vmatpush.bf16.msra.mxu0 %v5026_v23  ;;  %v5066_v47 = vor.u32 %v6058_v43, %v5065_v42  ;;  %v6375_v48 = vor.u32 %v5958_v45, %v4669_v44  ;;  %v4993_v49 = vld [vmem:[%s9630_s1 + $0x10] sm:$0xf]  ;;  %v6040_v50 = vld [vmem:[%s9630_s1 + $0x14] sm:$0xf0]  ;;  %v6069_v53 = vld [vmem:[%s9630_s1 + $0x104] sm:$0xf] }
   0xd   :  { %1028 = vmatpush.bf16.msra.mxu1 %v5090_v24  ;;  %v5057_v51 = vld [vmem:[%s9630_s1 + $0x90] sm:$0xf]  ;;  %v6056_v52 = vld [vmem:[%s9630_s1 + $0x94] sm:$0xf0]  ;;  %v5115_v54 = vld [vmem:[%s9630_s1 + $0x108] sm:$0x70]  ;;  %v4994_v55 = vor.u32 %v6040_v50, %v4993_v49 }
   0xe   :  { %v5058_v56 = vor.u32 %v6056_v52, %v5057_v51  ;;  %v4985_v57 = vld [vmem:[%s9630_s1] sm:$0xf]  ;;  %v6038_v58 = vld [vmem:[%s9630_s1 + $0x4] sm:$0xf0]  ;;  %v5118_v61 = vor.u32 %v6069_v53, %v5115_v54  ;;  %v5954_v0 = vld [vmem:[%s9631_s0 + $0x8] sm:$0xf0] }
   0xf   :  { %v5049_v59 = vld [vmem:[%s9630_s1 + $0x80] sm:$0xf]  ;;  %v6054_v60 = vld [vmem:[%s9630_s1 + $0x84] sm:$0xf0]  ;;  %v4986_v62 = vor.u32 %v6038_v58, %v4985_v57  ;;  %v5953_v2 = vld [vmem:[%s9631_s0 + $0x4] sm:$0xf] }
  0x10   :  { %880 = vmatpush.bf16.msra.mxu0 %v5018_v31  ;;  %v4649_v63 = vld [vmem:[%s9631_s0] sm:$0xf]  ;;  %v5050_v1 = vor.u32 %v6054_v60, %v5049_v59  ;;  %v4651_v3 = vld [vmem:[%s9631_s0 + $0xc] sm:$0xf0]  ;;  %v875_v4 = vsel %vm870_vm0, %v5118_v61, 0  ;;  %vm2568_vm5 = vcmask 687104  }
  0x11   :  { %1029 = vmatpush.bf16.msra.mxu1 %v5082_v33  ;;  %v6422_v5 = vor.u32 %v5954_v0, %v4649_v63  ;;  %v6424_v6 = vor.u32 %v5953_v2, %v4651_v3  ;;  %v4681_v7 = vld [vmem:[%s9631_s0 + $0x38] sm:$0xf]  ;;  %v5961_v8 = vld [vmem:[%s9631_s0 + $0x40] sm:$0xf0]  ;;  %v5956_v12 = vld [vmem:[%s9631_s0 + $0x1c] sm:$0xf] }
  0x12   :  { %v6434_v9 = vor.u32 %v5961_v8, %v4681_v7  ;;  %v4661_v10 = vld [vmem:[%s9631_s0 + $0x18] sm:$0xf]  ;;  %v5957_v11 = vld [vmem:[%s9631_s0 + $0x20] sm:$0xf0]  ;;  %v4663_v13 = vld [vmem:[%s9631_s0 + $0x24] sm:$0xf0] }
  0x13   :  { %v6450_v14 = vor.u32 %v5957_v11, %v4661_v10  ;;  %v6452_v15 = vor.u32 %v5956_v12, %v4663_v13  ;;  %v4693_v16 = vld [vmem:[%s9631_s0 + $0x50] sm:$0xf]  ;;  %v5964_v17 = vld [vmem:[%s9631_s0 + $0x58] sm:$0xf0]  ;;  %v6065_v19 = vld [vmem:[%s9630_s1 + $0xe4] sm:$0xf] }
  0x14   :  { %881 = vmatpush.bf16.msra.mxu0 %v5010_v38  ;;  %v5099_v20 = vld [vmem:[%s9630_s1 + $0xe8] sm:$0xf0]  ;;  %v6468_v21 = vor.u32 %v5964_v17, %v4693_v16  ;;  %v4673_v23 = vld [vmem:[%s9631_s0 + $0x30] sm:$0xf]  ;;  %v5960_v24 = vld [vmem:[%s9631_s0 + $0x38] sm:$0xf0] }
  0x15   :  { %1030 = vmatpush.bf16.msra.mxu1 %v5074_v39  ;;  %v5102_v22 = vor.u32 %v6065_v19, %v5099_v20  ;;  %v5959_v25 = vld [vmem:[%s9631_s0 + $0x34] sm:$0xf]  ;;  %v4675_v26 = vld [vmem:[%s9631_s0 + $0x3c] sm:$0xf0]  ;;  %v6484_v27 = vor.u32 %v5960_v24, %v4673_v23  ;;  %v4705_v29 = vld [vmem:[%s9631_s0 + $0x68] sm:$0xf] }
  0x16   :  { %v6486_v28 = vor.u32 %v5959_v25, %v4675_v26  ;;  %v5967_v30 = vld [vmem:[%s9631_s0 + $0x70] sm:$0xf0]  ;;  %v4685_v32 = vld [vmem:[%s9631_s0 + $0x48] sm:$0xf]  ;;  %v5962_v34 = vld [vmem:[%s9631_s0 + $0x4c] sm:$0xf] }
  0x17   :  { %1474 = vmatpush.bf16.msrb.mxu2 %v5102_v22  ;;  %v6496_v31 = vor.u32 %v5967_v30, %v4705_v29  ;;  %v5963_v33 = vld [vmem:[%s9631_s0 + $0x50] sm:$0xf0]  ;;  %v4687_v35 = vld [vmem:[%s9631_s0 + $0x54] sm:$0xf0]  ;;  %v4717_v38 = vld [vmem:[%s9631_s0 + $0x80] sm:$0xf] }
  0x18   :  { %882 = vmatpush.bf16.msra.mxu0 %v5002_v46  ;;  %v6512_v36 = vor.u32 %v5963_v33, %v4685_v32  ;;  %v6514_v37 = vor.u32 %v5962_v34, %v4687_v35  ;;  %v5970_v39 = vld [vmem:[%s9631_s0 + $0x88] sm:$0xf0]  ;;  %v4697_v41 = vld [vmem:[%s9631_s0 + $0x60] sm:$0xf]  ;;  %v5965_v43 = vld [vmem:[%s9631_s0 + $0x64] sm:$0xf] }
  0x19   :  { %1031 = vmatpush.bf16.msra.mxu1 %v5066_v47  ;;  %5120 = vmatmul.msk.bf16.gmra.mxu2 %vm785_vm1, %v6375_v48  ;;  %v6524_v40 = vor.u32 %v5970_v39, %v4717_v38  ;;  %v5966_v42 = vld [vmem:[%s9631_s0 + $0x68] sm:$0xf0]  ;;  %v4699_v44 = vld [vmem:[%s9631_s0 + $0x6c] sm:$0xf0]  ;;  %v4729_v47 = vld [vmem:[%s9631_s0 + $0x98] sm:$0xf] }
  0x1a   :  { %v6540_v45 = vor.u32 %v5966_v42, %v4697_v41  ;;  %v6542_v46 = vor.u32 %v5965_v43, %v4699_v44  ;;  %v5973_v49 = vld [vmem:[%s9631_s0 + $0xa0] sm:$0xf0]  ;;  %v4709_v51 = vld [vmem:[%s9631_s0 + $0x78] sm:$0xf]  ;;  %v6063_v53 = vld [vmem:[%s9630_s1 + $0xd4] sm:$0xf] }
  0x1b   :  { %9709 = vst [vmem:[#allocation2_spill] sm:$0xff] %v6524_v40  ;;  %v6552_v50 = vor.u32 %v5973_v49, %v4729_v47  ;;  %v5969_v52 = vld [vmem:[%s9631_s0 + $0x80] sm:$0xf0]  ;;  %v5091_v54 = vld [vmem:[%s9630_s1 + $0xd8] sm:$0xf0]  ;;  %vm3767_vm6 = vcmask 261120  }
  0x1c   :  { %883 = vmatpush.bf16.msra.mxu0 %v4994_v55  ;;  %v5968_v55 = vld [vmem:[%s9631_s0 + $0x7c] sm:$0xf]  ;;  %v5094_v57 = vor.u32 %v6063_v53, %v5091_v54  ;;  %v6574_v58 = vor.u32 %v5969_v52, %v4709_v51  ;;  %v4741_v60 = vld [vmem:[%s9631_s0 + $0xb0] sm:$0xf]  ;;  %v4723_v2 = vld [vmem:[%s9631_s0 + $0x9c] sm:$0xf0] }
  0x1d   :  { %1032 = vmatpush.bf16.msra.mxu1 %v5058_v56  ;;  %9710 = vst [vmem:[#allocation3_spill] sm:$0xff] %v6552_v50  ;;  %v4711_v56 = vld [vmem:[%s9631_s0 + $0x84] sm:$0xf0]  ;;  %v5976_v61 = vld [vmem:[%s9631_s0 + $0xb8] sm:$0xf0]  ;;  %vm3951_vm7 = vcmask 654336  }
  0x1e   :  { %1475 = vmatpush.bf16.msrb.mxu2 %v5094_v57  ;;  %v6576_v59 = vor.u32 %v5968_v55, %v4711_v56  ;;  %v4721_v63 = vld [vmem:[%s9631_s0 + $0x90] sm:$0xf]  ;;  %v5972_v0 = vld [vmem:[%s9631_s0 + $0x98] sm:$0xf0]  ;;  %v4753_v7 = vld [vmem:[%s9631_s0 + $0xc8] sm:$0xf] }
  0x1f   :  { %v6602_v3 = vor.u32 %v5972_v0, %v4721_v63  ;;  %v5979_v8 = vld [vmem:[%s9631_s0 + $0xd0] sm:$0xf0]  ;;  %v4733_v12 = vld [vmem:[%s9631_s0 + $0xa8] sm:$0xf]  ;;  %v5974_v16 = vld [vmem:[%s9631_s0 + $0xac] sm:$0xf] }
  0x20   :  { %884 = vmatpush.bf16.msra.mxu0 %v4986_v62  ;;  %v6586_v62 = vor.u32 %v5976_v61, %v4741_v60  ;;  %v6614_v10 = vor.u32 %v5979_v8, %v4753_v7  ;;  %v5975_v13 = vld [vmem:[%s9631_s0 + $0xb0] sm:$0xf0]  ;;  %v4735_v17 = vld [vmem:[%s9631_s0 + $0xb4] sm:$0xf0]  ;;  %v4765_v22 = vld [vmem:[%s9631_s0 + $0xe0] sm:$0xf] }
  0x21   :  { %1033 = vmatpush.bf16.msra.mxu1 %v5050_v1  ;;  %v5971_v1 = vld [vmem:[%s9631_s0 + $0x94] sm:$0xf]  ;;  %v6630_v19 = vor.u32 %v5975_v13, %v4733_v12  ;;  %v6632_v20 = vor.u32 %v5974_v16, %v4735_v17  ;;  %v5982_v23 = vld [vmem:[%s9631_s0 + $0xe8] sm:$0xf0]  ;;  %v191_v26 = vld [vmem:[%s9632_s2] sm:$0x3] }
  0x22   :  { %9711 = vst [vmem:[#allocation4_spill] sm:$0xff] %v6586_v62  ;;  %v6642_v25 = vor.u32 %v5982_v23, %v4765_v22  ;;  %v4745_v30 = vld [vmem:[%s9631_s0 + $0xc0] sm:$0xf]  ;;  %v5978_v32 = vld [vmem:[%s9631_s0 + $0xc8] sm:$0xf0]  ;;  %v6655_v33 = vperm.slane %v191_v26, 0 }
  0x23   :  { %885 = vmatmul.bf16.vlgmr.msra.gmra.mxu0 %v6422_v5  ;;  %9713 = vst [vmem:[#allocation6_spill] sm:$0xff] %v6614_v10  ;;  %v5977_v34 = vld [vmem:[%s9631_s0 + $0xc4] sm:$0xf]  ;;  %v4747_v35 = vld [vmem:[%s9631_s0 + $0xcc] sm:$0xf0]  ;;  %v6663_v38 = vor.u32 %v5978_v32, %v4745_v30  ;;  %vm4551_vm8 = vcmask 982016  }
  0x24   :  { %1629 = vmatpush.bf16.msrb.mxu0 %v875_v4  ;;  %1034 = vmatmul.bf16.vlgmr.msra.gmra.mxu1 %v6424_v6  ;;  %v6604_v4 = vor.u32 %v5971_v1, %v4723_v2  ;;  %9714 = vst [vmem:[#allocation7_spill] sm:$0xff] %v6632_v20  ;;  %v6665_v41 = vor.u32 %v5977_v34, %v4747_v35  ;;  %v4777_v44 = vld [vmem:[%s9631_s0 + $0xf8] sm:$0xf]  ;;  %v5985_v47 = vld [vmem:[%s9631_s0 + $0x100] sm:$0xf0] }
  0x25   :  { %9715 = vst [vmem:[#allocation8_spill] sm:$0xff] %v6642_v25  ;;  %v6678_v53 = vor.u32 %v5985_v47, %v4777_v44  ;;  %v6061_v54 = vld [vmem:[%s9630_s1 + $0xc4] sm:$0xf]  ;;  %v5083_v55 = vld [vmem:[%s9630_s1 + $0xc8] sm:$0xf0] }
  0x26   :  { %9712 = vst [vmem:[#allocation5_spill] sm:$0xff] %v6604_v4  ;;  %v5086_v56 = vor.u32 %v6061_v54, %v5083_v55  ;;  %v4757_v1 = vld [vmem:[%s9631_s0 + $0xd8] sm:$0xf]  ;;  %v5981_v2 = vld [vmem:[%s9631_s0 + $0xe0] sm:$0xf0] }
  0x27   :  { %9716 = vst [vmem:[#allocation9_spill] sm:$0xff] %v6665_v41  ;;  %v5980_v8 = vld [vmem:[%s9631_s0 + $0xdc] sm:$0xf]  ;;  %v6703_v12 = vor.u32 %v5981_v2, %v4757_v1  ;;  %v4789_v23 = vld [vmem:[%s9631_s0 + $0x110] sm:$0xf] }
  0x28   :  { %9717 = vst [vmem:[#allocation10_spill] sm:$0xff] %v6678_v53  ;;  %1476 = vmatpush.bf16.msrb.mxu2 %v5086_v56  ;;  %v4769_v47 = vld [vmem:[%s9631_s0 + $0xf0] sm:$0xf]  ;;  %v5983_v54 = vld [vmem:[%s9631_s0 + $0xf4] sm:$0xf] }
  0x29   :  { %5121 = vmatmul.msk.bf16.gmra.mxu2 %vm785_vm1, %v6434_v9  ;;  %v4771_v55 = vld [vmem:[%s9631_s0 + $0xfc] sm:$0xf0]  ;;  %v5991_v1 = vld [vmem:[%s9631_s0 + $0x130] sm:$0xf0] }
  0x33   :  { %890 = vmatmul.bf16.gmra.mxu0 %v6450_v14 }
  0x34   :  { %1039 = vmatmul.bf16.gmra.mxu1 %v6452_v15 }
  0x39   :  { %5122 = vmatmul.msk.bf16.gmra.mxu2 %vm785_vm1, %v6468_v21 }
  0x43   :  { %895 = vmatmul.bf16.gmra.mxu0 %v6484_v27 }
  0x44   :  { %1044 = vmatmul.bf16.gmra.mxu1 %v6486_v28 }
  0x49   :  { %5123 = vmatmul.msk.bf16.gmra.mxu2 %vm785_vm1, %v6496_v31 }
  0x53   :  { %900 = vmatmul.bf16.gmra.mxu0 %v6512_v36 }
  0x54   :  { %1049 = vmatmul.bf16.gmra.mxu1 %v6514_v37 }
  0x59   :  { %5124 = vmatmul.msk.bf16.gmra.mxu2 %vm785_vm1, %v6524_v40 }
  0x63   :  { %905 = vmatmul.bf16.gmra.mxu0 %v6540_v45 }
  0x64   :  { %1054 = vmatmul.bf16.gmra.mxu1 %v6542_v46 }
  0x69   :  { %5125 = vmatmul.msk.bf16.gmra.mxu2 %vm785_vm1, %v6552_v50 }
  0x73   :  { %910 = vmatmul.bf16.gmra.mxu0 %v6574_v58 }
  0x74   :  { %1059 = vmatmul.bf16.gmra.mxu1 %v6576_v59 }
  0x79   :  { %5126 = vmatmul.msk.bf16.gmra.mxu2 %vm785_vm1, %v6586_v62 }
  0x83   :  { %915 = vmatmul.bf16.gmra.mxu0 %v6602_v3 }
  0x84   :  { %1064 = vmatmul.bf16.gmra.mxu1 %v6604_v4 }
  0x89   :  { %5127 = vmatmul.msk.bf16.gmra.mxu2 %vm785_vm1, %v6614_v10 }
  0x8c   :  { %v1184_v11 = vpop.f32.mrf.mxu2 }
  0x93   :  { %920 = vmatmul.bf16.gmra.mxu0 %v6630_v19 }
  0x94   :  { %1069 = vmatmul.bf16.gmra.mxu1 %v6632_v20  ;;  %v1186_v24 = vpop.f32.mrf.mxu2 }
  0x99   :  { %5128 = vmatmul.msk.bf16.gmra.mxu2 %vm785_vm1, %v6642_v25 }
  0x9c   :  { %v1189_v29 = vpop.f32.mrf.mxu2 }
  0xa0   :  { %v886_v39 = vpop.f32.mrf.mxu0 }
  0xa1   :  { %v887_v42 = vadd.f32 %v886_v39, %v6655_v33  ;;  %v1035_v43 = vpop.f32.mrf.mxu1 }
  0xa3   :  { %v1036_v49 = vadd.f32 %v1035_v43, %v887_v42  ;;  %925 = vmatmul.bf16.gmra.mxu0 %v6663_v38 }
  0xa4   :  { %1074 = vmatmul.bf16.gmra.mxu1 %v6665_v41  ;;  %v1191_v51 = vpop.f32.mrf.mxu2 }
  0xa5   :  { %v6676_v52 = vadd.f32 %v1184_v11, %v1036_v49  ;;  %v4759_v11 = vld [vmem:[%s9631_s0 + $0xe4] sm:$0xf0] }
  0xa6   :  { %v6705_v16 = vor.u32 %v5980_v8, %v4759_v11 }
  0xa8   :  { %v888_v57 = vpop.f32.mrf.mxu0  ;;  %9718 = vst [vmem:[#allocation11_spill] sm:$0xff] %v6705_v16 }
  0xa9   :  { %v889_v60 = vadd.f32 %v888_v57, %v6655_v33  ;;  %v1037_v61 = vpop.f32.mrf.mxu1  ;;  %5129 = vmatmul.msk.bf16.gmra.mxu2 %vm785_vm1, %v6678_v53 }
  0xab   :  { %v1038_v63 = vadd.f32 %v1037_v61, %v889_v60  ;;  %v6739_v60 = vor.u32 %v5983_v54, %v4771_v55 }
  0xac   :  { %v1194_v0 = vpop.f32.mrf.mxu2 }
  0xad   :  { %v6695_v7 = vadd.f32 %v1186_v24, %v1038_v63  ;;  %v5988_v24 = vld [vmem:[%s9631_s0 + $0x118] sm:$0xf0]  ;;  %9720 = vst [vmem:[#allocation13_spill] sm:$0xff] %v6739_v60 }
  0xae   :  { %v6718_v34 = vor.u32 %v5988_v24, %v4789_v23 }
  0xb0   :  { %v891_v13 = vpop.f32.mrf.mxu0  ;;  %9719 = vst [vmem:[#allocation12_spill] sm:$0xff] %v6718_v34 }
  0xb1   :  { %v892_v17 = vadd.f32 %v891_v13, %v6655_v33  ;;  %v1040_v22 = vpop.f32.mrf.mxu1 }
  0xb3   :  { %v1041_v26 = vadd.f32 %v1040_v22, %v892_v17  ;;  %930 = vmatmul.bf16.gmra.mxu0 %v6703_v12 }
  0xb4   :  { %1079 = vmatmul.bf16.gmra.mxu1 %v6705_v16  ;;  %v1196_v30 = vpop.f32.mrf.mxu2 }
  0xb5   :  { %v6716_v32 = vadd.f32 %v1189_v29, %v1041_v26  ;;  %v5984_v29 = vld [vmem:[%s9631_s0 + $0xf8] sm:$0xf0] }
  0xb6   :  { %v6737_v56 = vor.u32 %v5984_v29, %v4769_v47 }
  0xb8   :  { %v893_v35 = vpop.f32.mrf.mxu0 }
  0xb9   :  { %v894_v39 = vadd.f32 %v893_v35, %v6655_v33  ;;  %v1042_v42 = vpop.f32.mrf.mxu1  ;;  %5130 = vmatmul.msk.bf16.gmra.mxu2 %vm785_vm1, %v6718_v34  ;;  %v4781_v35 = vld [vmem:[%s9631_s0 + $0x108] sm:$0xf] }
  0xbb   :  { %v1043_v43 = vadd.f32 %v1042_v42, %v894_v39  ;;  %v5986_v42 = vld [vmem:[%s9631_s0 + $0x10c] sm:$0xf] }
  0xbc   :  { %v1199_v44 = vpop.f32.mrf.mxu2 }
  0xbd   :  { %v6729_v49 = vadd.f32 %v1191_v51, %v1043_v43  ;;  %v4801_v51 = vld [vmem:[%s9631_s0 + $0x128] sm:$0xf]  ;;  %v4783_v43 = vld [vmem:[%s9631_s0 + $0x114] sm:$0xf0] }
  0xbe   :  { %v6752_v13 = vor.u32 %v5991_v1, %v4801_v51  ;;  %v6773_v54 = vor.u32 %v5986_v42, %v4783_v43  ;;  %v5989_v42 = vld [vmem:[%s9631_s0 + $0x124] sm:$0xf] }
  0xc0   :  { %v896_v57 = vpop.f32.mrf.mxu0  ;;  %9721 = vst [vmem:[#allocation14_spill] sm:$0xff] %v6752_v13 }
  0xc1   :  { %v897_v61 = vadd.f32 %v896_v57, %v6655_v33  ;;  %v1045_v63 = vpop.f32.mrf.mxu1  ;;  %9722 = vst [vmem:[#allocation15_spill] sm:$0xff] %v6773_v54 }
  0xc3   :  { %v1046_v2 = vadd.f32 %v1045_v63, %v897_v61  ;;  %935 = vmatmul.bf16.gmra.mxu0 %v6737_v56  ;;  %v5994_v61 = vld [vmem:[%s9631_s0 + $0x148] sm:$0xf0] }
  0xc4   :  { %1084 = vmatmul.bf16.gmra.mxu1 %v6739_v60  ;;  %v1201_v8 = vpop.f32.mrf.mxu2 }
  0xc5   :  { %v6750_v11 = vadd.f32 %v1194_v0, %v1046_v2  ;;  %v5987_v0 = vld [vmem:[%s9631_s0 + $0x110] sm:$0xf0] }
  0xc6   :  { %v6771_v47 = vor.u32 %v5987_v0, %v4781_v35  ;;  %v4793_v0 = vld [vmem:[%s9631_s0 + $0x120] sm:$0xf] }
  0xc8   :  { %v898_v17 = vpop.f32.mrf.mxu0 }
  0xc9   :  { %v899_v22 = vadd.f32 %v898_v17, %v6655_v33  ;;  %v1047_v23 = vpop.f32.mrf.mxu1  ;;  %5131 = vmatmul.msk.bf16.gmra.mxu2 %vm785_vm1, %v6752_v13 }
  0xcb   :  { %v1048_v24 = vadd.f32 %v1047_v23, %v899_v22 }
  0xcc   :  { %v1204_v26 = vpop.f32.mrf.mxu2 }
  0xcd   :  { %v6763_v39 = vadd.f32 %v1196_v30, %v1048_v24  ;;  %v4813_v30 = vld [vmem:[%s9631_s0 + $0x140] sm:$0xf] }
  0xce   :  { %v6786_v2 = vor.u32 %v5994_v61, %v4813_v30 }
  0xd0   :  { %v901_v29 = vpop.f32.mrf.mxu0  ;;  %9723 = vst [vmem:[#allocation16_spill] sm:$0xff] %v6786_v2 }
  0xd1   :  { %v902_v55 = vadd.f32 %v901_v29, %v6655_v33  ;;  %v1050_v57 = vpop.f32.mrf.mxu1  ;;  %v4795_v29 = vld [vmem:[%s9631_s0 + $0x12c] sm:$0xf0] }
  0xd3   :  { %v1051_v63 = vadd.f32 %v1050_v57, %v902_v55  ;;  %940 = vmatmul.bf16.gmra.mxu0 %v6771_v47  ;;  %v6059_v55 = vld [vmem:[%s9630_s1 + $0xb4] sm:$0xf]  ;;  %v5075_v57 = vld [vmem:[%s9630_s1 + $0xb8] sm:$0xf0] }
  0xd4   :  { %1089 = vmatmul.bf16.gmra.mxu1 %v6773_v54  ;;  %v1206_v51 = vpop.f32.mrf.mxu2  ;;  %v5078_v30 = vor.u32 %v6059_v55, %v5075_v57 }
  0xd5   :  { %v6784_v1 = vadd.f32 %v1199_v44, %v1051_v63  ;;  %v5990_v44 = vld [vmem:[%s9631_s0 + $0x128] sm:$0xf0] }
  0xd6   :  { %v6811_v61 = vor.u32 %v5990_v44, %v4793_v0  ;;  %1477 = vmatpush.bf16.msrb.mxu2 %v5078_v30 }
  0xd8   :  { %v903_v17 = vpop.f32.mrf.mxu0  ;;  %9724 = vst [vmem:[#allocation17_spill] sm:$0xff] %v6811_v61 }
  0xd9   :  { %v904_v22 = vadd.f32 %v903_v17, %v6655_v33  ;;  %v1052_v23 = vpop.f32.mrf.mxu1  ;;  %5132 = vmatmul.msk.bf16.gmra.mxu2 %vm785_vm1, %v6786_v2  ;;  %v6813_v17 = vor.u32 %v5989_v42, %v4795_v29 }
  0xdb   :  { %v1053_v24 = vadd.f32 %v1052_v23, %v904_v22  ;;  %9725 = vst [vmem:[#allocation18_spill] sm:$0xff] %v6813_v17  ;;  %v4825_v23 = vld [vmem:[%s9631_s0 + $0x158] sm:$0xf] }
  0xdc   :  { %v1209_v35 = vpop.f32.mrf.mxu2 }
  0xdd   :  { %v6800_v43 = vadd.f32 %v1201_v8, %v1053_v24  ;;  %v5997_v24 = vld [vmem:[%s9631_s0 + $0x160] sm:$0xf0] }
  0xde   :  { %v6826_v42 = vor.u32 %v5997_v24, %v4825_v23  ;;  %v4807_v23 = vld [vmem:[%s9631_s0 + $0x144] sm:$0xf0] }
  0xe0   :  { %v906_v63 = vpop.f32.mrf.mxu0  ;;  %9726 = vst [vmem:[#allocation19_spill] sm:$0xff] %v6826_v42 }
  0xe1   :  { %v907_v8 = vadd.f32 %v906_v63, %v6655_v33  ;;  %v1055_v22 = vpop.f32.mrf.mxu1 }
  0xe3   :  { %v1056_v2 = vadd.f32 %v1055_v22, %v907_v8  ;;  %945 = vmatmul.bf16.gmra.mxu0 %v6811_v61  ;;  %v4805_v8 = vld [vmem:[%s9631_s0 + $0x138] sm:$0xf]  ;;  %v5992_v22 = vld [vmem:[%s9631_s0 + $0x13c] sm:$0xf] }
  0xe4   :  { %1094 = vmatmul.bf16.gmra.mxu1 %v6813_v17  ;;  %v1211_v0 = vpop.f32.mrf.mxu2 }
  0xe5   :  { %v6824_v44 = vadd.f32 %v1204_v26, %v1056_v2  ;;  %v5993_v26 = vld [vmem:[%s9631_s0 + $0x140] sm:$0xf0] }
  0xe6   :  { %v6845_v24 = vor.u32 %v5993_v26, %v4805_v8 }
  0xe8   :  { %v908_v29 = vpop.f32.mrf.mxu0  ;;  %9727 = vst [vmem:[#allocation20_spill] sm:$0xff] %v6845_v24 }
  0xe9   :  { %v909_v55 = vadd.f32 %v908_v29, %v6655_v33  ;;  %v1057_v57 = vpop.f32.mrf.mxu1  ;;  %5133 = vmatmul.msk.bf16.gmra.mxu2 %vm785_vm1, %v6826_v42 }
  0xeb   :  { %v1058_v30 = vadd.f32 %v1057_v57, %v909_v55  ;;  %v6847_v55 = vor.u32 %v5992_v22, %v4807_v23 }
  0xec   :  { %v1214_v63 = vpop.f32.mrf.mxu2 }
  0xed   :  { %v6837_v2 = vadd.f32 %v1206_v51, %v1058_v30  ;;  %9728 = vst [vmem:[#allocation21_spill] sm:$0xff] %v6847_v55  ;;  %v4837_v51 = vld [vmem:[%s9631_s0 + $0x170] sm:$0xf]  ;;  %v6000_v30 = vld [vmem:[%s9631_s0 + $0x178] sm:$0xf0] }
  0xee   :  { %v6860_v22 = vor.u32 %v6000_v30, %v4837_v51  ;;  %v4819_v51 = vld [vmem:[%s9631_s0 + $0x15c] sm:$0xf0] }
  0xf0   :  { %v911_v29 = vpop.f32.mrf.mxu0  ;;  %9729 = vst [vmem:[#allocation22_spill] sm:$0xff] %v6860_v22 }
  0xf1   :  { %v912_v57 = vadd.f32 %v911_v29, %v6655_v33  ;;  %v1060_v42 = vpop.f32.mrf.mxu1 }
  0xf3   :  { %v1061_v13 = vadd.f32 %v1060_v42, %v912_v57  ;;  %950 = vmatmul.bf16.gmra.mxu0 %v6845_v24  ;;  %v4817_v42 = vld [vmem:[%s9631_s0 + $0x150] sm:$0xf]  ;;  %v5995_v57 = vld [vmem:[%s9631_s0 + $0x154] sm:$0xf] }
  0xf4   :  { %1099 = vmatmul.bf16.gmra.mxu1 %v6847_v55  ;;  %v1216_v8 = vpop.f32.mrf.mxu2 }
  0xf5   :  { %v6858_v26 = vadd.f32 %v1209_v35, %v1061_v13  ;;  %v5996_v13 = vld [vmem:[%s9631_s0 + $0x158] sm:$0xf0] }
  0xf8   :  { %v913_v23 = vpop.f32.mrf.mxu0 }
  0xf9   :  { %v914_v29 = vadd.f32 %v913_v23, %v6655_v33  ;;  %v1062_v34 = vpop.f32.mrf.mxu1  ;;  %5134 = vmatmul.msk.bf16.gmra.mxu2 %vm785_vm1, %v6860_v22  ;;  %v6881_v23 = vor.u32 %v5995_v57, %v4819_v51 }
  0xfb   :  { %v1063_v17 = vadd.f32 %v1062_v34, %v914_v29  ;;  %v6879_v34 = vor.u32 %v5996_v13, %v4817_v42  ;;  %9731 = vst [vmem:[#allocation24_spill] sm:$0xff] %v6881_v23 }
  0xfc   :  { %v1219_v53 = vpop.f32.mrf.mxu2 }
  0xfd   :  { %v6871_v35 = vadd.f32 %v1211_v0, %v1063_v17  ;;  %9730 = vst [vmem:[#allocation23_spill] sm:$0xff] %v6879_v34  ;;  %v4849_v17 = vld [vmem:[%s9631_s0 + $0x188] sm:$0xf]  ;;  %v6003_v0 = vld [vmem:[%s9631_s0 + $0x190] sm:$0xf0] }
  0xfe   :  { %v6894_v57 = vor.u32 %v6003_v0, %v4849_v17  ;;  %v4831_v17 = vld [vmem:[%s9631_s0 + $0x174] sm:$0xf0] }
 0x100   :  { %v916_v30 = vpop.f32.mrf.mxu0  ;;  %9732 = vst [vmem:[#allocation25_spill] sm:$0xff] %v6894_v57 }
 0x101   :  { %v917_v29 = vadd.f32 %v916_v30, %v6655_v33  ;;  %v1065_v22 = vpop.f32.mrf.mxu1 }
 0x103   :  { %v1066_v55 = vadd.f32 %v1065_v22, %v917_v29  ;;  %955 = vmatmul.bf16.gmra.mxu0 %v6879_v34  ;;  %v4829_v22 = vld [vmem:[%s9631_s0 + $0x168] sm:$0xf]  ;;  %v5998_v29 = vld [vmem:[%s9631_s0 + $0x16c] sm:$0xf] }
 0x104   :  { %1104 = vmatmul.bf16.gmra.mxu1 %v6881_v23  ;;  %v1221_v42 = vpop.f32.mrf.mxu2 }
 0x105   :  { %v6892_v13 = vadd.f32 %v1214_v63, %v1066_v55  ;;  %v5999_v63 = vld [vmem:[%s9631_s0 + $0x170] sm:$0xf0] }
 0x108   :  { %v918_v51 = vpop.f32.mrf.mxu0 }
 0x109   :  { %v919_v30 = vadd.f32 %v918_v51, %v6655_v33  ;;  %v1067_v54 = vpop.f32.mrf.mxu1  ;;  %5135 = vmatmul.msk.bf16.gmra.mxu2 %vm785_vm1, %v6894_v57  ;;  %v6915_v51 = vor.u32 %v5998_v29, %v4831_v17  ;;  %v6057_v17 = vld [vmem:[%s9630_s1 + $0xa4] sm:$0xf] }
 0x10b   :  { %v1068_v25 = vadd.f32 %v1067_v54, %v919_v30  ;;  %v6913_v54 = vor.u32 %v5999_v63, %v4829_v22  ;;  %9734 = vst [vmem:[#allocation27_spill] sm:$0xff] %v6915_v51 }
 0x10c   :  { %v1224_v60 = vpop.f32.mrf.mxu2 }
 0x10d   :  { %v6905_v55 = vadd.f32 %v1216_v8, %v1068_v25  ;;  %9733 = vst [vmem:[#allocation26_spill] sm:$0xff] %v6913_v54  ;;  %v4861_v25 = vld [vmem:[%s9631_s0 + $0x1a0] sm:$0xf]  ;;  %v6006_v8 = vld [vmem:[%s9631_s0 + $0x1a8] sm:$0xf0] }
 0x10e   :  { %v6928_v29 = vor.u32 %v6006_v8, %v4861_v25  ;;  %v4841_v25 = vld [vmem:[%s9631_s0 + $0x180] sm:$0xf]  ;;  %v6002_v8 = vld [vmem:[%s9631_s0 + $0x188] sm:$0xf0] }
 0x110   :  { %v921_v0 = vpop.f32.mrf.mxu0  ;;  %9735 = vst [vmem:[#allocation28_spill] sm:$0xff] %v6928_v29 }
 0x111   :  { %v922_v30 = vadd.f32 %v921_v0, %v6655_v33  ;;  %v1070_v57 = vpop.f32.mrf.mxu1  ;;  %v5067_v0 = vld [vmem:[%s9630_s1 + $0xa8] sm:$0xf0] }
 0x112   :  { %v5070_v10 = vor.u32 %v6057_v17, %v5067_v0  ;;  %v6953_v17 = vor.u32 %v6002_v8, %v4841_v25 }
 0x113   :  { %v1071_v23 = vadd.f32 %v1070_v57, %v922_v30  ;;  %960 = vmatmul.bf16.gmra.mxu0 %v6913_v54 }
 0x114   :  { %1109 = vmatmul.bf16.gmra.mxu1 %v6915_v51  ;;  %v1226_v22 = vpop.f32.mrf.mxu2  ;;  %1478 = vmatpush.bf16.msrb.mxu2 %v5070_v10  ;;  %v6001_v10 = vld [vmem:[%s9631_s0 + $0x184] sm:$0xf]  ;;  %9736 = vst [vmem:[#allocation29_spill] sm:$0xff] %v6953_v17 }
 0x115   :  { %v6926_v63 = vadd.f32 %v1219_v53, %v1071_v23 }
 0x118   :  { %v923_v16 = vpop.f32.mrf.mxu0 }
 0x119   :  { %v924_v57 = vadd.f32 %v923_v16, %v6655_v33  ;;  %v1072_v30 = vpop.f32.mrf.mxu1  ;;  %5136 = vmatmul.msk.bf16.gmra.mxu2 %vm785_vm1, %v6928_v29  ;;  %v4843_v16 = vld [vmem:[%s9631_s0 + $0x18c] sm:$0xf0] }
 0x11b   :  { %v1073_v53 = vadd.f32 %v1072_v30, %v924_v57  ;;  %v6955_v57 = vor.u32 %v6001_v10, %v4843_v16 }
 0x11c   :  { %v1229_v23 = vpop.f32.mrf.mxu2 }
 0x11d   :  { %v6945_v51 = vadd.f32 %v1221_v42, %v1073_v53  ;;  %9737 = vst [vmem:[#allocation30_spill] sm:$0xff] %v6955_v57  ;;  %v4873_v42 = vld [vmem:[%s9631_s0 + $0x1b8] sm:$0xf]  ;;  %v6009_v53 = vld [vmem:[%s9631_s0 + $0x1c0] sm:$0xf0] }
 0x11e   :  { %v6968_v10 = vor.u32 %v6009_v53, %v4873_v42  ;;  %v4855_v42 = vld [vmem:[%s9631_s0 + $0x1a4] sm:$0xf0] }
 0x120   :  { %v926_v0 = vpop.f32.mrf.mxu0  ;;  %9738 = vst [vmem:[#allocation31_spill] sm:$0xff] %v6968_v10 }
 0x121   :  { %v927_v30 = vadd.f32 %v926_v0, %v6655_v33  ;;  %v1075_v29 = vpop.f32.mrf.mxu1 }
 0x123   :  { %v1076_v54 = vadd.f32 %v1075_v29, %v927_v30  ;;  %965 = vmatmul.bf16.gmra.mxu0 %v6953_v17  ;;  %v4853_v29 = vld [vmem:[%s9631_s0 + $0x198] sm:$0xf]  ;;  %v6004_v30 = vld [vmem:[%s9631_s0 + $0x19c] sm:$0xf] }
 0x124   :  { %1114 = vmatmul.bf16.gmra.mxu1 %v6955_v57  ;;  %v1231_v25 = vpop.f32.mrf.mxu2 }
 0x125   :  { %v6966_v8 = vadd.f32 %v1224_v60, %v1076_v54  ;;  %v6005_v60 = vld [vmem:[%s9631_s0 + $0x1a0] sm:$0xf0] }
 0x128   :  { %v928_v16 = vpop.f32.mrf.mxu0 }
 0x129   :  { %v929_v0 = vadd.f32 %v928_v16, %v6655_v33  ;;  %v1077_v62 = vpop.f32.mrf.mxu1  ;;  %5137 = vmatmul.msk.bf16.gmra.mxu2 %vm785_vm1, %v6968_v10  ;;  %v6989_v16 = vor.u32 %v6004_v30, %v4855_v42 }
 0x12b   :  { %v1078_v34 = vadd.f32 %v1077_v62, %v929_v0  ;;  %v6987_v62 = vor.u32 %v6005_v60, %v4853_v29  ;;  %9740 = vst [vmem:[#allocation33_spill] sm:$0xff] %v6989_v16 }
 0x12c   :  { %v1234_v41 = vpop.f32.mrf.mxu2 }
 0x12d   :  { %v6979_v54 = vadd.f32 %v1226_v22, %v1078_v34  ;;  %9739 = vst [vmem:[#allocation32_spill] sm:$0xff] %v6987_v62  ;;  %v4885_v34 = vld [vmem:[%s9631_s0 + $0x1d0] sm:$0xf]  ;;  %v6012_v22 = vld [vmem:[%s9631_s0 + $0x1d8] sm:$0xf0] }
 0x12e   :  { %v7002_v30 = vor.u32 %v6012_v22, %v4885_v34  ;;  %v4867_v34 = vld [vmem:[%s9631_s0 + $0x1bc] sm:$0xf0] }
 0x130   :  { %v931_v53 = vpop.f32.mrf.mxu0  ;;  %9741 = vst [vmem:[#allocation34_spill] sm:$0xff] %v7002_v30 }
 0x131   :  { %v932_v0 = vadd.f32 %v931_v53, %v6655_v33  ;;  %v1080_v10 = vpop.f32.mrf.mxu1 }
 0x133   :  { %v1081_v57 = vadd.f32 %v1080_v10, %v932_v0  ;;  %970 = vmatmul.bf16.gmra.mxu0 %v6987_v62  ;;  %v4865_v10 = vld [vmem:[%s9631_s0 + $0x1b0] sm:$0xf]  ;;  %v6007_v0 = vld [vmem:[%s9631_s0 + $0x1b4] sm:$0xf] }
 0x134   :  { %1119 = vmatmul.bf16.gmra.mxu1 %v6989_v16  ;;  %v1236_v29 = vpop.f32.mrf.mxu2 }
 0x135   :  { %v7000_v60 = vadd.f32 %v1229_v23, %v1081_v57  ;;  %v6008_v23 = vld [vmem:[%s9631_s0 + $0x1b8] sm:$0xf0] }
 0x138   :  { %v933_v42 = vpop.f32.mrf.mxu0 }
 0x139   :  { %v934_v53 = vadd.f32 %v933_v42, %v6655_v33  ;;  %v1082_v17 = vpop.f32.mrf.mxu1  ;;  %5138 = vmatmul.msk.bf16.gmra.mxu2 %vm785_vm1, %v7002_v30  ;;  %v7023_v42 = vor.u32 %v6007_v0, %v4867_v34  ;;  %v6051_v34 = vld [vmem:[%s9630_s1 + $0x74] sm:$0xf] }
 0x13b   :  { %v1083_v50 = vadd.f32 %v1082_v17, %v934_v53  ;;  %v7021_v17 = vor.u32 %v6008_v23, %v4865_v10  ;;  %9743 = vst [vmem:[#allocation36_spill] sm:$0xff] %v7023_v42 }
 0x13c   :  { %v1239_v24 = vpop.f32.mrf.mxu2 }
 0x13d   :  { %v7013_v57 = vadd.f32 %v1231_v25, %v1083_v50  ;;  %9742 = vst [vmem:[#allocation35_spill] sm:$0xff] %v7021_v17  ;;  %v4897_v50 = vld [vmem:[%s9631_s0 + $0x1e8] sm:$0xf]  ;;  %v6015_v25 = vld [vmem:[%s9631_s0 + $0x1f0] sm:$0xf0] }
 0x13e   :  { %v7036_v0 = vor.u32 %v6015_v25, %v4897_v50 }
 0x140   :  { %v936_v22 = vpop.f32.mrf.mxu0  ;;  %9744 = vst [vmem:[#allocation37_spill] sm:$0xff] %v7036_v0 }
 0x141   :  { %v937_v53 = vadd.f32 %v936_v22, %v6655_v33  ;;  %v1085_v30 = vpop.f32.mrf.mxu1  ;;  %v5043_v22 = vld [vmem:[%s9630_s1 + $0x78] sm:$0xf0] }
 0x142   :  { %v5046_v20 = vor.u32 %v6051_v34, %v5043_v22  ;;  %v6010_v34 = vld [vmem:[%s9631_s0 + $0x1cc] sm:$0xf] }
 0x143   :  { %v1086_v16 = vadd.f32 %v1085_v30, %v937_v53  ;;  %975 = vmatmul.bf16.gmra.mxu0 %v7021_v17 }
 0x144   :  { %1124 = vmatmul.bf16.gmra.mxu1 %v7023_v42  ;;  %v1241_v10 = vpop.f32.mrf.mxu2  ;;  %1324 = vmatpush.bf16.msra.mxu3 %v5046_v20  ;;  %v6011_v20 = vld [vmem:[%s9631_s0 + $0x1d0] sm:$0xf0] }
 0x145   :  { %v7034_v23 = vadd.f32 %v1234_v41, %v1086_v16  ;;  %v6049_v41 = vld [vmem:[%s9630_s1 + $0x64] sm:$0xf]  ;;  %v5035_v16 = vld [vmem:[%s9630_s1 + $0x68] sm:$0xf0] }
 0x146   :  { %v5038_v25 = vor.u32 %v6049_v41, %v5035_v16  ;;  %v5059_v41 = vld [vmem:[%s9630_s1 + $0x98] sm:$0xf0] }
 0x148   :  { %v938_v62 = vpop.f32.mrf.mxu0  ;;  %1325 = vmatpush.bf16.msra.mxu3 %v5038_v25  ;;  %v4909_v25 = vld [vmem:[%s9631_s0 + $0x200] sm:$0xf] }
 0x149   :  { %v939_v30 = vadd.f32 %v938_v62, %v6655_v33  ;;  %v1087_v53 = vpop.f32.mrf.mxu1  ;;  %5139 = vmatmul.msk.bf16.gmra.mxu2 %vm785_vm1, %v7036_v0  ;;  %v4877_v62 = vld [vmem:[%s9631_s0 + $0x1c8] sm:$0xf]  ;;  %v6047_v0 = vld [vmem:[%s9630_s1 + $0x54] sm:$0xf] }
 0x14b   :  { %v1088_v50 = vadd.f32 %v1087_v53, %v939_v30  ;;  %v4879_v30 = vld [vmem:[%s9631_s0 + $0x1d4] sm:$0xf0]  ;;  %v6055_v53 = vld [vmem:[%s9630_s1 + $0x94] sm:$0xf] }
 0x14c   :  { %v7053_v42 = vpop.f32.mrf.mxu2  ;;  %v5062_v16 = vor.u32 %v6055_v53, %v5059_v41  ;;  %v6018_v53 = vld [vmem:[%s9631_s0 + $0x208] sm:$0xf0] }
 0x14d   :  { %v7064_v22 = vadd.f32 %v1236_v29, %v1088_v50  ;;  %v5027_v29 = vld [vmem:[%s9630_s1 + $0x58] sm:$0xf0]  ;;  %v7081_v50 = vor.u32 %v6011_v20, %v4877_v62  ;;  %v5019_v62 = vld [vmem:[%s9630_s1 + $0x48] sm:$0xf0]  ;;  %v7102_v41 = vor.u32 %v6018_v53, %v4909_v25 }
 0x14e   :  { %v5030_v17 = vor.u32 %v6047_v0, %v5027_v29  ;;  %1479 = vmatpush.bf16.msrb.mxu2 %v5062_v16  ;;  %v6045_v0 = vld [vmem:[%s9630_s1 + $0x44] sm:$0xf]  ;;  %v5011_v16 = vld [vmem:[%s9630_s1 + $0x38] sm:$0xf0]  ;;  %v5003_v25 = vld [vmem:[%s9630_s1 + $0x28] sm:$0xf0] }
 0x14f   :  { %9745 = vst [vmem:[#allocation38_spill] sm:$0xff] %v7064_v22  ;;  %v7083_v22 = vor.u32 %v6010_v34, %v4879_v30 }
 0x150   :  { %9746 = vst [vmem:[#allocation39_spill] sm:$0xff] %v7081_v50  ;;  %v941_v40 = vpop.f32.mrf.mxu0  ;;  %1326 = vmatpush.bf16.msra.mxu3 %v5030_v17  ;;  %v6043_v17 = vld [vmem:[%s9630_s1 + $0x34] sm:$0xf] }
 0x151   :  { %9747 = vst [vmem:[#allocation40_spill] sm:$0xff] %v7083_v22  ;;  %v942_v61 = vadd.f32 %v941_v40, %v6655_v33  ;;  %v1090_v4 = vpop.f32.mrf.mxu1  ;;  %v5022_v40 = vor.u32 %v6045_v0, %v5019_v62 }
 0x152   :  { %9749 = vst [vmem:[#allocation42_spill] sm:$0xff] %v7102_v41 }
 0x153   :  { %v1091_v20 = vadd.f32 %v1090_v4, %v942_v61  ;;  %980 = vmatmul.bf16.gmra.mxu0 %v7081_v50  ;;  %v5014_v61 = vor.u32 %v6043_v17, %v5011_v16  ;;  %v6014_v17 = vld [vmem:[%s9631_s0 + $0x1e8] sm:$0xf0]  ;;  %v6021_v50 = vld [vmem:[%s9631_s0 + $0x220] sm:$0xf0] }
 0x154   :  { %1129 = vmatmul.bf16.gmra.mxu1 %v7083_v22  ;;  %v1246_v34 = vpop.f32.mrf.mxu2  ;;  %1327 = vmatpush.bf16.msra.mxu3 %v5022_v40  ;;  %v4889_v40 = vld [vmem:[%s9631_s0 + $0x1e0] sm:$0xf] }
 0x155   :  { %v7100_v30 = vadd.f32 %v1239_v24, %v1091_v20  ;;  %v6041_v24 = vld [vmem:[%s9630_s1 + $0x24] sm:$0xf] }
 0x156   :  { %v5006_v62 = vor.u32 %v6041_v24, %v5003_v25  ;;  %v7139_v24 = vor.u32 %v6014_v17, %v4889_v40  ;;  %v6037_v40 = vld [vmem:[%s9630_s1 + $0x4] sm:$0xf]  ;;  %v4987_v17 = vld [vmem:[%s9630_s1 + $0x8] sm:$0xf0] }
 0x157   :  { %9748 = vst [vmem:[#allocation41_spill] sm:$0xff] %v7100_v30 }
 0x158   :  { %v943_v4 = vpop.f32.mrf.mxu0  ;;  %1328 = vmatpush.bf16.msra.mxu3 %v5014_v61  ;;  %v4891_v61 = vld [vmem:[%s9631_s0 + $0x1ec] sm:$0xf0]  ;;  %9751 = vst [vmem:[#allocation44_spill] sm:$0xff] %v7139_v24 }
 0x159   :  { %v944_v29 = vadd.f32 %v943_v4, %v6655_v33  ;;  %v1092_v0 = vpop.f32.mrf.mxu1  ;;  %5140 = vmatmul.msk.bf16.gmra.mxu2 %vm785_vm1, %v7102_v41  ;;  %v6013_v4 = vld [vmem:[%s9631_s0 + $0x1e4] sm:$0xf] }
 0x15b   :  { %v1093_v53 = vadd.f32 %v1092_v0, %v944_v29  ;;  %v6039_v29 = vld [vmem:[%s9630_s1 + $0x14] sm:$0xf]  ;;  %v4995_v0 = vld [vmem:[%s9630_s1 + $0x18] sm:$0xf0] }
 0x15c   :  { %v1249_v20 = vpop.f32.mrf.mxu2  ;;  %1329 = vmatpush.bf16.msra.mxu3 %v5006_v62  ;;  %v4921_v62 = vld [vmem:[%s9631_s0 + $0x218] sm:$0xf] }
 0x15d   :  { %v7125_v16 = vadd.f32 %v1241_v10, %v1093_v53  ;;  %v4998_v10 = vor.u32 %v6039_v29, %v4995_v0  ;;  %v7141_v53 = vor.u32 %v6013_v4, %v4891_v61  ;;  %v4990_v61 = vor.u32 %v6037_v40, %v4987_v17  ;;  %v4901_v40 = vld [vmem:[%s9631_s0 + $0x1f8] sm:$0xf] }
 0x15f   :  { %9750 = vst [vmem:[#allocation43_spill] sm:$0xff] %v7125_v16 }
 0x160   :  { %v946_v25 = vpop.f32.mrf.mxu0  ;;  %9752 = vst [vmem:[#allocation45_spill] sm:$0xff] %v7141_v53  ;;  %1330 = vmatpush.bf16.msra.mxu3 %v4998_v10 }
 0x161   :  { %v947_v41 = vadd.f32 %v946_v25, %v6655_v33  ;;  %v1095_v22 = vpop.f32.mrf.mxu1  ;;  %v7161_v25 = vor.u32 %v6021_v50, %v4921_v62  ;;  %v6016_v62 = vld [vmem:[%s9631_s0 + $0x1fc] sm:$0xf] }
 0x163   :  { %v1096_v4 = vadd.f32 %v1095_v22, %v947_v41  ;;  %985 = vmatmul.bf16.gmra.mxu0 %v7139_v24  ;;  %9753 = vst [vmem:[#allocation46_spill] sm:$0xff] %v7161_v25 }
 0x164   :  { %1134 = vmatmul.bf16.gmra.mxu1 %v7141_v53  ;;  %v1251_v29 = vpop.f32.mrf.mxu2  ;;  %1331 = vmatpush.bf16.msra.mxu3 %v4990_v61  ;;  %v6078_v53 = vld [vmem:[%s9633_s5 + $0x38] sm:$0xff] }
 0x165   :  { %v7159_v0 = vadd.f32 %v7053_v42, %v1096_v4  ;;  %v6017_v42 = vld [vmem:[%s9631_s0 + $0x200] sm:$0xf0]  ;;  %1986 = vmatpush.bf16.msrb.mxu1 %v6078_v53 }
 0x167   :  { %1332 = vmatmul.bf16.vlgmr.msra.gmra.mxu3 %v6422_v5  ;;  %v4903_v5 = vld [vmem:[%s9631_s0 + $0x204] sm:$0xf0] }
 0x168   :  { %v948_v10 = vpop.f32.mrf.mxu0  ;;  %v7186_v4 = vor.u32 %v6016_v62, %v4903_v5 }
 0x169   :  { %v949_v16 = vadd.f32 %v948_v10, %v6655_v33  ;;  %v1097_v30 = vpop.f32.mrf.mxu1  ;;  %5141 = vmatmul.msk.bf16.gmra.mxu2 %vm785_vm1, %v7161_v25 }
 0x16a   :  { %9755 = vst [vmem:[#allocation48_spill] sm:$0xff] %v7186_v4 }
 0x16b   :  { %v1098_v22 = vadd.f32 %v1097_v30, %v949_v16  ;;  %v7181_v30 = vor.u32 %v6017_v42, %v4901_v40  ;;  %v1875_v16 = vld [vmem:[%s9633_s5 + $0x50] sm:$0xf]  ;;  %v6024_v40 = vld [vmem:[%s9631_s0 + $0x238] sm:$0xf0] }
 0x16c   :  { %v1254_v41 = vpop.f32.mrf.mxu2  ;;  %v1917_v61 = vunpack.c.l.b16 %v1875_v16 }
 0x16d   :  { %v7173_v50 = vadd.f32 %v1246_v34, %v1098_v22  ;;  %9754 = vst [vmem:[#allocation47_spill] sm:$0xff] %v7181_v30  ;;  %v4933_v22 = vld [vmem:[%s9631_s0 + $0x230] sm:$0xf] }
 0x16e   :  { %v1928_v42 = vpack.c.b16 %v1917_v61, %v1917_v61 }
 0x170   :  { %v951_v17 = vpop.f32.mrf.mxu0  ;;  %v1984_v5 = vsel %vm1982_vm2, %v1928_v42, 0 }
 0x171   :  { %v952_v34 = vadd.f32 %v951_v17, %v6655_v33  ;;  %v1100_v10 = vpop.f32.mrf.mxu1  ;;  %v7200_v17 = vor.u32 %v6024_v40, %v4933_v22  ;;  %2070 = vmatpush.bf16.msrb.mxu3 %v1984_v5  ;;  %v6020_v22 = vld [vmem:[%s9631_s0 + $0x218] sm:$0xf0] }
 0x173   :  { %v1101_v25 = vadd.f32 %v1100_v10, %v952_v34  ;;  %990 = vmatmul.bf16.gmra.mxu0 %v7181_v30  ;;  %9756 = vst [vmem:[#allocation49_spill] sm:$0xff] %v7200_v17 }
 0x174   :  { %1139 = vmatmul.bf16.gmra.mxu1 %v7186_v4  ;;  %v1256_v62 = vpop.f32.mrf.mxu2  ;;  %v5051_v4 = vld [vmem:[%s9630_s1 + $0x88] sm:$0xf0] }
 0x175   :  { %v7198_v16 = vadd.f32 %v1249_v20, %v1101_v25  ;;  %v4913_v25 = vld [vmem:[%s9631_s0 + $0x210] sm:$0xf] }
 0x176   :  { %v7223_v53 = vor.u32 %v6020_v22, %v4913_v25 }
 0x177   :  { %1337 = vmatmul.bf16.gmra.mxu3 %v6450_v14  ;;  %v4915_v14 = vld [vmem:[%s9631_s0 + $0x21c] sm:$0xf0] }
 0x178   :  { %v953_v24 = vpop.f32.mrf.mxu0  ;;  %9757 = vst [vmem:[#allocation50_spill] sm:$0xff] %v7223_v53 }
 0x179   :  { %v954_v61 = vadd.f32 %v953_v24, %v6655_v33  ;;  %v1102_v34 = vpop.f32.mrf.mxu1  ;;  %5142 = vmatmul.msk.bf16.gmra.mxu2 %vm785_vm1, %v7200_v17  ;;  %v6019_v24 = vld [vmem:[%s9631_s0 + $0x214] sm:$0xf] }
 0x17a   :  { %v7225_v5 = vor.u32 %v6019_v24, %v4915_v14 }
 0x17b   :  { %v1103_v10 = vadd.f32 %v1102_v34, %v954_v61 }
 0x17c   :  { %v1259_v20 = vpop.f32.mrf.mxu2  ;;  %9758 = vst [vmem:[#allocation51_spill] sm:$0xff] %v7225_v5 }
 0x17d   :  { %v7215_v40 = vadd.f32 %v1251_v29, %v1103_v10  ;;  %v4945_v29 = vld [vmem:[%s9631_s0 + $0x248] sm:$0xf]  ;;  %v6027_v10 = vld [vmem:[%s9631_s0 + $0x250] sm:$0xf0] }
 0x17e   :  { %v7236_v24 = vor.u32 %v6027_v10, %v4945_v29  ;;  %v6023_v29 = vld [vmem:[%s9631_s0 + $0x230] sm:$0xf0]  ;;  %v4927_v10 = vld [vmem:[%s9631_s0 + $0x234] sm:$0xf0] }
 0x180   :  { %v956_v42 = vpop.f32.mrf.mxu0  ;;  %9759 = vst [vmem:[#allocation52_spill] sm:$0xff] %v7236_v24 }
 0x181   :  { %v957_v61 = vadd.f32 %v956_v42, %v6655_v33  ;;  %v1105_v34 = vpop.f32.mrf.mxu1  ;;  %v6053_v42 = vld [vmem:[%s9630_s1 + $0x84] sm:$0xf] }
 0x183   :  { %v1106_v17 = vadd.f32 %v1105_v34, %v957_v61  ;;  %995 = vmatmul.bf16.gmra.mxu0 %v7223_v53  ;;  %v5054_v61 = vor.u32 %v6053_v42, %v5051_v4 }
 0x184   :  { %1144 = vmatmul.bf16.gmra.mxu1 %v7225_v5  ;;  %v1261_v25 = vpop.f32.mrf.mxu2 }
 0x185   :  { %v1255_v22 = vadd.f32 %v1254_v41, %v1106_v17  ;;  %1480 = vmatpush.bf16.msrb.mxu2 %v5054_v61  ;;  %v4925_v17 = vld [vmem:[%s9631_s0 + $0x228] sm:$0xf] }
 0x187   :  { %v1771_v14 = vmax.f32 %v6676_v52, %v1255_v22  ;;  %1342 = vmatmul.bf16.gmra.mxu3 %v6484_v27 }
 0x188   :  { %v958_v30 = vpop.f32.mrf.mxu0 }
 0x189   :  { %v959_v34 = vadd.f32 %v958_v30, %v6655_v33  ;;  %v1107_v53 = vpop.f32.mrf.mxu1  ;;  %5143 = vmatmul.msk.bf16.gmra.mxu2 %vm785_vm1, %v7236_v24  ;;  %v6022_v30 = vld [vmem:[%s9631_s0 + $0x22c] sm:$0xf] }
 0x18a   :  { %v7264_v42 = vor.u32 %v6022_v30, %v4927_v10 }
 0x18b   :  { %v1108_v52 = vadd.f32 %v1107_v53, %v959_v34  ;;  %v7262_v53 = vor.u32 %v6023_v29, %v4925_v17 }
 0x18c   :  { %v1264_v41 = vpop.f32.mrf.mxu2 }
 0x18d   :  { %v1257_v4 = vadd.f32 %v1256_v62, %v1108_v52  ;;  %v4957_v62 = vld [vmem:[%s9631_s0 + $0x260] sm:$0xf]  ;;  %v6030_v52 = vld [vmem:[%s9631_s0 + $0x268] sm:$0xf0] }
 0x18e   :  { %v7277_v29 = vor.u32 %v6030_v52, %v4957_v62 }
 0x18f   :  { %v1773_v27 = vmax.f32 %v6695_v7, %v1257_v4 }
 0x190   :  { %v961_v22 = vpop.f32.mrf.mxu0  ;;  %9760 = vst [vmem:[#allocation53_spill] sm:$0xff] %v7277_v29 }
 0x191   :  { %v962_v61 = vadd.f32 %v961_v22, %v6655_v33  ;;  %v1110_v34 = vpop.f32.mrf.mxu1  ;;  %v7267_v24 = vpack.c.bf16 %v1773_v27, %v1771_v14 }
 0x193   :  { %v1111_v5 = vadd.f32 %v1110_v34, %v962_v61  ;;  %1000 = vmatmul.bf16.gmra.mxu0 %v7262_v53  ;;  %v4937_v61 = vld [vmem:[%s9631_s0 + $0x240] sm:$0xf]  ;;  %v4939_v34 = vld [vmem:[%s9631_s0 + $0x24c] sm:$0xf0] }
 0x194   :  { %1149 = vmatmul.bf16.gmra.mxu1 %v7264_v42  ;;  %v1266_v7 = vpop.f32.mrf.mxu2 }
 0x195   :  { %v1260_v17 = vadd.f32 %v1259_v20, %v1111_v5  ;;  %v6026_v20 = vld [vmem:[%s9631_s0 + $0x248] sm:$0xf0]  ;;  %v6025_v5 = vld [vmem:[%s9631_s0 + $0x244] sm:$0xf] }
 0x196   :  { %v7297_v62 = vor.u32 %v6026_v20, %v4937_v61 }
 0x197   :  { %v1775_v14 = vmax.f32 %v6716_v32, %v1260_v17  ;;  %1347 = vmatmul.bf16.gmra.mxu3 %v6512_v36  ;;  %v7299_v17 = vor.u32 %v6025_v5, %v4939_v34 }
 0x198   :  { %v963_v4 = vpop.f32.mrf.mxu0 }
 0x199   :  { %v964_v30 = vadd.f32 %v963_v4, %v6655_v33  ;;  %v1112_v10 = vpop.f32.mrf.mxu1  ;;  %5144 = vmatmul.msk.bf16.gmra.mxu2 %vm785_vm1, %v7277_v29 }
 0x19b   :  { %v1113_v27 = vadd.f32 %v1112_v10, %v964_v30 }
 0x19c   :  { %v1269_v22 = vpop.f32.mrf.mxu2 }
 0x19d   :  { %v1262_v32 = vadd.f32 %v1261_v25, %v1113_v27  ;;  %v4969_v25 = vld [vmem:[%s9631_s0 + $0x278] sm:$0xf]  ;;  %v6033_v27 = vld [vmem:[%s9631_s0 + $0x280] sm:$0xf0] }
 0x19e   :  { %v7312_v20 = vor.u32 %v6033_v27, %v4969_v25  ;;  %v6028_v25 = vld [vmem:[%s9631_s0 + $0x25c] sm:$0xf] }
 0x19f   :  { %v1777_v36 = vmax.f32 %v6729_v49, %v1262_v32  ;;  %v6077_v32 = vld [vmem:[%s9633_s5 + $0x30] sm:$0xff] }
 0x1a0   :  { %v966_v52 = vpop.f32.mrf.mxu0  ;;  %9761 = vst [vmem:[#allocation54_spill] sm:$0xff] %v7312_v20  ;;  %1987 = vmatpush.bf16.msrb.mxu1 %v6077_v32  ;;  %v6075_v32 = vld [vmem:[%s9633_s5 + $0x20] sm:$0xff] }
 0x1a1   :  { %v967_v4 = vadd.f32 %v966_v52, %v6655_v33  ;;  %v1115_v30 = vpop.f32.mrf.mxu1  ;;  %v7302_v10 = vpack.c.bf16 %v1777_v36, %v1775_v14 }
 0x1a3   :  { %v1116_v29 = vadd.f32 %v1115_v30, %v967_v4  ;;  %1005 = vmatmul.bf16.gmra.mxu0 %v7297_v62  ;;  %v6029_v4 = vld [vmem:[%s9631_s0 + $0x260] sm:$0xf0] }
 0x1a4   :  { %1154 = vmatmul.bf16.gmra.mxu1 %v7299_v17  ;;  %v1271_v49 = vpop.f32.mrf.mxu2 }
 0x1a5   :  { %v1265_v61 = vadd.f32 %v1264_v41, %v1116_v29  ;;  %v6076_v41 = vld [vmem:[%s9633_s5 + $0x28] sm:$0xff]  ;;  %v4949_v29 = vld [vmem:[%s9631_s0 + $0x258] sm:$0xf] }
 0x1a6   :  { %1988 = vmatpush.bf16.msrb.mxu1 %v6076_v41  ;;  %v4981_v41 = vld [vmem:[%s9631_s0 + $0x290] sm:$0xf] }
 0x1a7   :  { %v1779_v14 = vmax.f32 %v6750_v11, %v1265_v61  ;;  %1352 = vmatmul.bf16.gmra.mxu3 %v6540_v45  ;;  %v4951_v45 = vld [vmem:[%s9631_s0 + $0x264] sm:$0xf0]  ;;  %v7338_v61 = vor.u32 %v6029_v4, %v4949_v29  ;;  %v6074_v4 = vld [vmem:[%s9633_s5 + $0x18] sm:$0xff] }
 0x1a8   :  { %v968_v5 = vpop.f32.mrf.mxu0 }
 0x1a9   :  { %v969_v34 = vadd.f32 %v968_v5, %v6655_v33  ;;  %v1117_v36 = vpop.f32.mrf.mxu1  ;;  %5145 = vmatmul.msk.bf16.gmra.mxu2 %vm785_vm1, %v7312_v20 }
 0x1aa   :  { %1989 = vmatpush.bf16.msrb.mxu1 %v6075_v32 }
 0x1ab   :  { %v1118_v52 = vadd.f32 %v1117_v36, %v969_v34  ;;  %v7343_v34 = vor.u32 %v6028_v25, %v4951_v45 }
 0x1ac   :  { %v1274_v11 = vpop.f32.mrf.mxu2 }
 0x1ad   :  { %v1267_v30 = vadd.f32 %v1266_v7, %v1118_v52 }
 0x1ae   :  { %1990 = vmatpush.bf16.msrb.mxu1 %v6074_v4  ;;  %v6031_v4 = vld [vmem:[%s9631_s0 + $0x274] sm:$0xf] }
 0x1af   :  { %v1781_v27 = vmax.f32 %v6763_v39, %v1267_v30  ;;  %v6036_v39 = vld [vmem:[%s9631_s0 + $0x298] sm:$0xf0] }
 0x1b0   :  { %v971_v5 = vpop.f32.mrf.mxu0  ;;  %v7359_v25 = vor.u32 %v6036_v39, %v4981_v41  ;;  %v4961_v41 = vld [vmem:[%s9631_s0 + $0x270] sm:$0xf]  ;;  %v6032_v39 = vld [vmem:[%s9631_s0 + $0x278] sm:$0xf0] }
 0x1b1   :  { %v972_v7 = vadd.f32 %v971_v5, %v6655_v33  ;;  %v1120_v36 = vpop.f32.mrf.mxu1  ;;  %v7346_v52 = vpack.c.bf16 %v1781_v27, %v1779_v14  ;;  %v6073_v27 = vld [vmem:[%s9633_s5 + $0x10] sm:$0xff] }
 0x1b2   :  { %9762 = vst [vmem:[#allocation55_spill] sm:$0xff] %v7359_v25  ;;  %1991 = vmatpush.bf16.msrb.mxu1 %v6073_v27  ;;  %v7385_v27 = vor.u32 %v6032_v39, %v4961_v41 }
 0x1b3   :  { %v1121_v29 = vadd.f32 %v1120_v36, %v972_v7  ;;  %1010 = vmatmul.bf16.gmra.mxu0 %v7338_v61  ;;  %v6072_v36 = vld [vmem:[%s9633_s5 + $0x8] sm:$0xff] }
 0x1b4   :  { %1159 = vmatmul.bf16.gmra.mxu1 %v7343_v34  ;;  %v1276_v30 = vpop.f32.mrf.mxu2 }
 0x1b5   :  { %v1270_v14 = vadd.f32 %v1269_v22, %v1121_v29 }
 0x1b6   :  { %1992 = vmatpush.bf16.msrb.mxu1 %v6072_v36 }
 0x1b7   :  { %v1783_v45 = vmax.f32 %v6784_v1, %v1270_v14  ;;  %1357 = vmatmul.bf16.gmra.mxu3 %v6574_v58  ;;  %v4963_v58 = vld [vmem:[%s9631_s0 + $0x27c] sm:$0xf0] }
 0x1b8   :  { %v973_v32 = vpop.f32.mrf.mxu0 }
 0x1b9   :  { %v974_v5 = vadd.f32 %v973_v32, %v6655_v33  ;;  %v1122_v7 = vpop.f32.mrf.mxu1  ;;  %5146 = vmatmul.msk.bf16.gmra.mxu2 %vm785_vm1, %v7359_v25  ;;  %v6071_v32 = vld [vmem:[%s9633_s5] sm:$0xff] }
 0x1ba   :  { %1993 = vmatpush.bf16.msrb.mxu1 %v6071_v32 }
 0x1bb   :  { %v1123_v22 = vadd.f32 %v1122_v7, %v974_v5  ;;  %v7390_v7 = vor.u32 %v6031_v4, %v4963_v58 }
 0x1bc   :  { %v1279_v1 = vpop.f32.mrf.mxu2 }
 0x1bd   :  { %v1272_v29 = vadd.f32 %v1271_v49, %v1123_v22 }
 0x1bf   :  { %v1785_v14 = vmax.f32 %v6800_v43, %v1272_v29 }
 0x1c0   :  { %v976_v5 = vpop.f32.mrf.mxu0 }
 0x1c1   :  { %v977_v49 = vadd.f32 %v976_v5, %v6655_v33  ;;  %v1125_v22 = vpop.f32.mrf.mxu1  ;;  %v7393_v25 = vpack.c.bf16 %v1785_v14, %v1783_v45  ;;  %v4973_v14 = vld [vmem:[%s9631_s0 + $0x288] sm:$0xf] }
 0x1c3   :  { %v1126_v20 = vadd.f32 %v1125_v22, %v977_v49  ;;  %1015 = vmatmul.bf16.gmra.mxu0 %v7385_v27 }
 0x1c4   :  { %1164 = vmatmul.bf16.gmra.mxu1 %v7390_v7  ;;  %v1281_v43 = vpop.f32.mrf.mxu2 }
 0x1c5   :  { %v1275_v36 = vadd.f32 %v1274_v11, %v1126_v20  ;;  %v6035_v20 = vld [vmem:[%s9631_s0 + $0x290] sm:$0xf0] }
 0x1c6   :  { %v7414_v32 = vor.u32 %v6035_v20, %v4973_v14 }
 0x1c7   :  { %v1787_v41 = vmax.f32 %v6824_v44, %v1275_v36  ;;  %1362 = vmatmul.bf16.gmra.mxu3 %v6602_v3  ;;  %v6034_v44 = vld [vmem:[%s9631_s0 + $0x28c] sm:$0xf] }
 0x1c8   :  { %v978_v39 = vpop.f32.mrf.mxu0 }
 0x1c9   :  { %v979_v29 = vadd.f32 %v978_v39, %v6655_v33  ;;  %v1127_v4 = vpop.f32.mrf.mxu1  ;;  %1481 = vmatmul.bf16.vlgmr.msrb.gmra.mxu2 %v6424_v6  ;;  %v4975_v6 = vld [vmem:[%s9631_s0 + $0x294] sm:$0xf0] }
 0x1ca   :  { %v7416_v49 = vor.u32 %v6034_v44, %v4975_v6 }
 0x1cb   :  { %v1128_v58 = vadd.f32 %v1127_v4, %v979_v29 }
 0x1cc   :  { %v1284_v45 = vpop.f32.mrf.mxu2 }
 0x1cd   :  { %v1277_v11 = vadd.f32 %v1276_v30, %v1128_v58 }
 0x1cf   :  { %v1789_v3 = vmax.f32 %v6837_v2, %v1277_v11 }
 0x1d0   :  { %v981_v5 = vpop.f32.mrf.mxu0 }
 0x1d1   :  { %v982_v22 = vadd.f32 %v981_v5, %v6655_v33  ;;  %v1130_v36 = vpop.f32.mrf.mxu1  ;;  %v7419_v39 = vpack.c.bf16 %v1789_v3, %v1787_v41 }
 0x1d3   :  { %v1131_v30 = vadd.f32 %v1130_v36, %v982_v22  ;;  %1020 = vmatmul.bf16.gmra.mxu0 %v7414_v32 }
 0x1d4   :  { %1169 = vmatmul.bf16.gmra.mxu1 %v7416_v49  ;;  %v1286_v29 = vpop.f32.mrf.mxu2 }
 0x1d5   :  { %v1280_v4 = vadd.f32 %v1279_v1, %v1131_v30 }
 0x1d7   :  { %v1791_v58 = vmax.f32 %v6858_v26, %v1280_v4  ;;  %1367 = vmatmul.bf16.gmra.mxu3 %v6630_v19 }
 0x1d8   :  { %v983_v2 = vpop.f32.mrf.mxu0 }
 0x1d9   :  { %v984_v14 = vadd.f32 %v983_v2, %v6655_v33  ;;  %v1132_v20 = vpop.f32.mrf.mxu1  ;;  %1486 = vmatmul.bf16.gmra.mxu2 %v6452_v15 }
 0x1db   :  { %v1133_v11 = vadd.f32 %v1132_v20, %v984_v14 }
 0x1dc   :  { %v1289_v41 = vpop.f32.mrf.mxu2 }
 0x1dd   :  { %v1282_v44 = vadd.f32 %v1281_v43, %v1133_v11 }
 0x1df   :  { %v1793_v6 = vmax.f32 %v6871_v35, %v1282_v44 }
 0x1e0   :  { %v986_v3 = vpop.f32.mrf.mxu0 }
 0x1e1   :  { %v987_v5 = vadd.f32 %v986_v3, %v6655_v33  ;;  %v1135_v22 = vpop.f32.mrf.mxu1  ;;  %v7429_v1 = vpack.c.bf16 %v1793_v6, %v1791_v58 }
 0x1e3   :  { %v1136_v26 = vadd.f32 %v1135_v22, %v987_v5  ;;  %5147 = vmatmul.msk.bf16.vlgmr.msrb.gmra.mxu0 %vm785_vm1, %v6311_v18 }
 0x1e4   :  { %v1291_v36 = vpop.f32.mrf.mxu2  ;;  %1994 = vmatmul.bf16.vlgmr.msrb.gmra.mxu1 %v7267_v24 }
 0x1e5   :  { %v1285_v15 = vadd.f32 %v1284_v45, %v1136_v26 }
 0x1e7   :  { %v1795_v19 = vmax.f32 %v6892_v13, %v1285_v15  ;;  %1372 = vmatmul.bf16.gmra.mxu3 %v6663_v38 }
 0x1e8   :  { %v988_v30 = vpop.f32.mrf.mxu0 }
 0x1e9   :  { %v989_v43 = vadd.f32 %v988_v30, %v6655_v33  ;;  %v1137_v35 = vpop.f32.mrf.mxu1  ;;  %1491 = vmatmul.bf16.gmra.mxu2 %v6486_v28 }
 0x1ea   :  { %v7438_v2 = vpop.f32.mrf.mxu3 }
 0x1eb   :  { %v1138_v4 = vadd.f32 %v1137_v35, %v989_v43 }
 0x1ec   :  { %v1294_v58 = vpop.f32.mrf.mxu2 }
 0x1ed   :  { %v1287_v14 = vadd.f32 %v1286_v29, %v1138_v4 }
 0x1ef   :  { %v1797_v18 = vmax.f32 %v6905_v55, %v1287_v14 }
 0x1f0   :  { %v991_v20 = vpop.f32.mrf.mxu0 }
 0x1f1   :  { %v992_v45 = vadd.f32 %v991_v20, %v6655_v33  ;;  %v1140_v11 = vpop.f32.mrf.mxu1  ;;  %v7442_v13 = vpack.c.bf16 %v1797_v18, %v1795_v19 }
 0x1f2   :  { %v7447_v38 = vpop.f32.mrf.mxu3 }
 0x1f3   :  { %v1141_v44 = vadd.f32 %v1140_v11, %v992_v45  ;;  %5148 = vmatmul.msk.bf16.gmra.mxu0 %vm785_vm1, %v6375_v48 }
 0x1f4   :  { %v1296_v28 = vpop.f32.mrf.mxu2  ;;  %1999 = vmatmul.bf16.gmra.mxu1 %v7302_v10 }
 0x1f5   :  { %v1290_v6 = vadd.f32 %v1289_v41, %v1141_v44 }
 0x1f7   :  { %v1799_v29 = vmax.f32 %v6926_v63, %v1290_v6  ;;  %1377 = vmatmul.bf16.gmra.mxu3 %v6703_v12 }
 0x1f8   :  { %v993_v3 = vpop.f32.mrf.mxu0 }
 0x1f9   :  { %v994_v55 = vadd.f32 %v993_v3, %v6655_v33  ;;  %v1142_v5 = vpop.f32.mrf.mxu1  ;;  %1496 = vmatmul.bf16.gmra.mxu2 %v6514_v37 }
 0x1fa   :  { %v7453_v48 = vpop.f32.mrf.mxu3 }
 0x1fb   :  { %v1143_v22 = vadd.f32 %v1142_v5, %v994_v55 }
 0x1fc   :  { %v1299_v26 = vpop.f32.mrf.mxu2 }
 0x1fd   :  { %v1292_v15 = vadd.f32 %v1291_v36, %v1143_v22 }
 0x1ff   :  { %v1801_v19 = vmax.f32 %v6945_v51, %v1292_v15  ;;  %v6080_v51 = vld [vmem:[%s9633_s5 + $0x48] sm:$0xff] }
 0x200   :  { %v996_v30 = vpop.f32.mrf.mxu0  ;;  %2071 = vmatpush.bf16.msrb.mxu3 %v6080_v51 }
 0x201   :  { %v997_v41 = vadd.f32 %v996_v30, %v6655_v33  ;;  %v1145_v43 = vpop.f32.mrf.mxu1  ;;  %v7457_v63 = vpack.c.bf16 %v1801_v19, %v1799_v29 }
 0x202   :  { %v7462_v4 = vpop.f32.mrf.mxu3 }
 0x203   :  { %v1146_v35 = vadd.f32 %v1145_v43, %v997_v41  ;;  %5149 = vmatmul.msk.bf16.gmra.mxu0 %vm785_vm1, %v6434_v9 }
 0x204   :  { %v1301_v37 = vpop.f32.mrf.mxu2  ;;  %2004 = vmatmul.bf16.gmra.mxu1 %v7346_v52 }
 0x205   :  { %v1295_v12 = vadd.f32 %v1294_v58, %v1146_v35 }
 0x207   :  { %v1803_v36 = vmax.f32 %v6966_v8, %v1295_v12  ;;  %1382 = vmatmul.bf16.gmra.mxu3 %v6737_v56 }
 0x208   :  { %v998_v14 = vpop.f32.mrf.mxu0 }
 0x209   :  { %v999_v18 = vadd.f32 %v998_v14, %v6655_v33  ;;  %v1147_v20 = vpop.f32.mrf.mxu1  ;;  %1501 = vmatmul.bf16.gmra.mxu2 %v6542_v46 }
 0x20a   :  { %v7471_v11 = vpop.f32.mrf.mxu3 }
 0x20b   :  { %v1148_v9 = vadd.f32 %v1147_v20, %v999_v18  ;;  %v9763_v20 = vld [vmem:[#allocation5_spill] sm:$0xff] }
 0x20c   :  { %v1304_v45 = vpop.f32.mrf.mxu2 }
 0x20d   :  { %v1297_v58 = vadd.f32 %v1296_v28, %v1148_v9  ;;  %v9764_v9 = vld [vmem:[#allocation17_spill] sm:$0xff] }
 0x20f   :  { %v1805_v8 = vmax.f32 %v6979_v54, %v1297_v58 }
 0x210   :  { %v1001_v44 = vpop.f32.mrf.mxu0 }
 0x211   :  { %v1002_v6 = vadd.f32 %v1001_v44, %v6655_v33  ;;  %v1150_v29 = vpop.f32.mrf.mxu1  ;;  %v7475_v3 = vpack.c.bf16 %v1805_v8, %v1803_v36 }
 0x212   :  { %v7480_v5 = vpop.f32.mrf.mxu3 }
 0x213   :  { %v1151_v55 = vadd.f32 %v1150_v29, %v1002_v6  ;;  %5150 = vmatmul.msk.bf16.gmra.mxu0 %vm785_vm1, %v6468_v21  ;;  %v9765_v6 = vld [vmem:[#allocation38_spill] sm:$0xff] }
 0x214   :  { %v1306_v46 = vpop.f32.mrf.mxu2  ;;  %2009 = vmatmul.bf16.gmra.mxu1 %v7393_v25 }
 0x215   :  { %v1300_v56 = vadd.f32 %v1299_v26, %v1151_v55 }
 0x217   :  { %v1807_v28 = vmax.f32 %v7000_v60, %v1300_v56  ;;  %1387 = vmatmul.bf16.gmra.mxu3 %v6771_v47 }
 0x218   :  { %v1003_v22 = vpop.f32.mrf.mxu0 }
 0x219   :  { %v1004_v54 = vadd.f32 %v1003_v22, %v6655_v33  ;;  %v1152_v15 = vpop.f32.mrf.mxu1  ;;  %1506 = vmatmul.bf16.gmra.mxu2 %v6576_v59  ;;  %v9766_v22 = vld [vmem:[#allocation2_spill] sm:$0xff] }
 0x21a   :  { %v7486_v21 = vpop.f32.mrf.mxu3 }
 0x21b   :  { %v1153_v19 = vadd.f32 %v1152_v15, %v1004_v54 }
 0x21c   :  { %v1309_v30 = vpop.f32.mrf.mxu2 }
 0x21d   :  { %v1302_v41 = vadd.f32 %v1301_v37, %v1153_v19 }
 0x21f   :  { %v1809_v43 = vmax.f32 %v7013_v57, %v1302_v41 }
 0x220   :  { %v1006_v26 = vpop.f32.mrf.mxu0 }
 0x221   :  { %v1007_v35 = vadd.f32 %v1006_v26, %v6655_v33  ;;  %v1155_v12 = vpop.f32.mrf.mxu1  ;;  %v7490_v60 = vpack.c.bf16 %v1809_v43, %v1807_v28 }
 0x222   :  { %v7495_v51 = vpop.f32.mrf.mxu3 }
 0x223   :  { %v1156_v36 = vadd.f32 %v1155_v12, %v1007_v35  ;;  %5151 = vmatmul.msk.bf16.gmra.mxu0 %vm785_vm1, %v6496_v31  ;;  %v9768_v12 = vld [vmem:[#allocation7_spill] sm:$0xff] }
 0x224   :  { %v1311_v59 = vpop.f32.mrf.mxu2  ;;  %2014 = vmatmul.bf16.gmra.mxu1 %v7419_v39 }
 0x225   :  { %v1305_v47 = vadd.f32 %v1304_v45, %v1156_v36  ;;  %v9769_v36 = vld [vmem:[#allocation20_spill] sm:$0xff] }
 0x227   :  { %v1811_v37 = vmax.f32 %v7034_v23, %v1305_v47  ;;  %1392 = vmatmul.bf16.gmra.mxu3 %v9764_v9 }
 0x228   :  { %v1008_v14 = vpop.f32.mrf.mxu0 }
 0x229   :  { %v1009_v57 = vadd.f32 %v1008_v14, %v6655_v33  ;;  %v1157_v18 = vpop.f32.mrf.mxu1  ;;  %1511 = vmatmul.bf16.gmra.mxu2 %v9763_v20 }
 0x22a   :  { %v7501_v31 = vpop.f32.mrf.mxu3 }
 0x22b   :  { %v1158_v58 = vadd.f32 %v1157_v18, %v1009_v57  ;;  %v9770_v18 = vld [vmem:[#allocation43_spill] sm:$0xff] }
 0x22c   :  { %v1314_v8 = vpop.f32.mrf.mxu2 }
 0x22d   :  { %v1307_v44 = vadd.f32 %v1306_v46, %v1158_v58  ;;  %v9767_v46 = vld [vmem:[#allocation41_spill] sm:$0xff] }
 0x22f   :  { %v1813_v29 = vmax.f32 %v9765_v6, %v1307_v44 }
 0x230   :  { %v1011_v45 = vpop.f32.mrf.mxu0 }
 0x231   :  { %v1012_v55 = vadd.f32 %v1011_v45, %v6655_v33  ;;  %v1160_v56 = vpop.f32.mrf.mxu1  ;;  %v7505_v23 = vpack.c.bf16 %v1813_v29, %v1811_v37  ;;  %v9771_v29 = vld [vmem:[#allocation3_spill] sm:$0xff] }
 0x232   :  { %v7510_v19 = vpop.f32.mrf.mxu3 }
 0x233   :  { %v1161_v28 = vadd.f32 %v1160_v56, %v1012_v55  ;;  %5152 = vmatmul.msk.bf16.gmra.mxu0 %vm785_vm1, %v9766_v22 }
 0x234   :  { %v1316_v54 = vpop.f32.mrf.mxu2  ;;  %2019 = vmatmul.bf16.gmra.mxu1 %v7429_v1 }
 0x235   :  { %v1310_v15 = vadd.f32 %v1309_v30, %v1161_v28 }
 0x237   :  { %v1815_v41 = vmax.f32 %v9767_v46, %v1310_v15  ;;  %1397 = vmatmul.bf16.gmra.mxu3 %v9769_v36 }
 0x238   :  { %v1013_v43 = vpop.f32.mrf.mxu0 }
 0x239   :  { %v1014_v26 = vadd.f32 %v1013_v43, %v6655_v33  ;;  %v1162_v35 = vpop.f32.mrf.mxu1  ;;  %1516 = vmatmul.bf16.gmra.mxu2 %v9768_v12  ;;  %v9772_v43 = vld [vmem:[#allocation9_spill] sm:$0xff] }
 0x23a   :  { %v7516_v57 = vpop.f32.mrf.mxu3 }
 0x23b   :  { %v1163_v47 = vadd.f32 %v1162_v35, %v1014_v26  ;;  %v9773_v26 = vld [vmem:[#allocation23_spill] sm:$0xff] }
 0x23c   :  { %v1319_v37 = vpop.f32.mrf.mxu2 }
 0x23d   :  { %v1312_v14 = vadd.f32 %v1311_v59, %v1163_v47  ;;  %v6201_v59 = vld [vmem:[%s9632_s2] sm:$0x3] }
 0x23e   :  { %v7530_v28 = vperm.slane %v6201_v59, 1 }
 0x23f   :  { %v1817_v20 = vmax.f32 %v9770_v18, %v1312_v14 }
 0x240   :  { %v1016_v30 = vpop.f32.mrf.mxu0 }
 0x241   :  { %v1017_v9 = vadd.f32 %v1016_v30, %v6655_v33  ;;  %v1165_v58 = vpop.f32.mrf.mxu1  ;;  %v7520_v44 = vpack.c.bf16 %v1817_v20, %v1815_v41 }
 0x242   :  { %v7525_v56 = vpop.f32.mrf.mxu3 }
 0x243   :  { %v1166_v6 = vadd.f32 %v1165_v58, %v1017_v9  ;;  %5153 = vmatmul.msk.bf16.gmra.mxu0 %vm785_vm1, %v9771_v29  ;;  %v1336_v58 = vadd.f32 %v7447_v38, %v7530_v28  ;;  %v9774_v29 = vld [vmem:[#allocation4_spill] sm:$0xff]  ;;  %v9776_v38 = vld [vmem:[#allocation26_spill] sm:$0xff] }
 0x244   :  { %v1321_v45 = vpop.f32.mrf.mxu2  ;;  %2024 = vmatmul.bf16.gmra.mxu1 %v7442_v13 }
 0x245   :  { %v1315_v55 = vadd.f32 %v1314_v8, %v1166_v6  ;;  %v1334_v8 = vadd.f32 %v7438_v2, %v7530_v28 }
 0x247   :  { %v1819_v22 = vmax.f32 %v7159_v0, %v1315_v55  ;;  %1402 = vmatmul.bf16.gmra.mxu3 %v9773_v26 }
 0x248   :  { %v1018_v15 = vpop.f32.mrf.mxu0 }
 0x249   :  { %v1019_v46 = vadd.f32 %v1018_v15, %v6655_v33  ;;  %v1167_v41 = vpop.f32.mrf.mxu1  ;;  %1521 = vmatmul.bf16.gmra.mxu2 %v9772_v43  ;;  %v1339_v43 = vadd.f32 %v7453_v48, %v7530_v28 }
 0x24a   :  { %v7538_v14 = vpop.f32.mrf.mxu3 }
 0x24b   :  { %v1168_v35 = vadd.f32 %v1167_v41, %v1019_v46  ;;  %v9775_v41 = vld [vmem:[#allocation11_spill] sm:$0xff] }
 0x24c   :  { %v1482_v12 = vpop.f32.mrf.mxu2 }
 0x24d   :  { %v1317_v36 = vadd.f32 %v1316_v54, %v1168_v35  ;;  %v1483_v47 = vadd.f32 %v1482_v12, %v1334_v8 }
 0x24f   :  { %v1821_v18 = vmax.f32 %v7173_v50, %v1317_v36 }
 0x250   :  { %v1021_v0 = vpop.f32.mrf.mxu0 }
 0x251   :  { %v1022_v20 = vadd.f32 %v1021_v0, %v6655_v33  ;;  %v1170_v30 = vpop.f32.mrf.mxu1  ;;  %v7542_v9 = vpack.c.bf16 %v1821_v18, %v1819_v22 }
 0x252   :  { %v7549_v59 = vpop.f32.mrf.mxu3 }
 0x253   :  { %v1171_v6 = vadd.f32 %v1170_v30, %v1022_v20  ;;  %5154 = vmatmul.msk.bf16.gmra.mxu0 %vm785_vm1, %v9774_v29  ;;  %v1341_v20 = vadd.f32 %v7462_v4, %v7530_v28  ;;  %v9778_v30 = vld [vmem:[#allocation6_spill] sm:$0xff]  ;;  %v1344_v4 = vadd.f32 %v7471_v11, %v7530_v28 }
 0x254   :  { %v1484_v2 = vpop.f32.mrf.mxu2  ;;  %2029 = vmatmul.bf16.gmra.mxu1 %v7457_v63 }
 0x255   :  { %v1320_v54 = vadd.f32 %v1319_v37, %v1171_v6  ;;  %v1485_v55 = vadd.f32 %v1484_v2, %v1336_v58  ;;  %v9779_v6 = vld [vmem:[#allocation13_spill] sm:$0xff] }
 0x256   :  { %v9781_v2 = vld [vmem:[#allocation29_spill] sm:$0xff] }
 0x257   :  { %v1823_v50 = vmax.f32 %v7198_v16, %v1320_v54  ;;  %1407 = vmatmul.bf16.gmra.mxu3 %v9776_v38  ;;  %v9783_v38 = vld [vmem:[#allocation8_spill] sm:$0xff] }
 0x258   :  { %v1023_v15 = vpop.f32.mrf.mxu0 }
 0x259   :  { %v1024_v22 = vadd.f32 %v1023_v15, %v6655_v33  ;;  %v1172_v46 = vpop.f32.mrf.mxu1  ;;  %1526 = vmatmul.bf16.gmra.mxu2 %v9775_v41 }
 0x25a   :  { %v7557_v12 = vpop.f32.mrf.mxu3 }
 0x25b   :  { %v1173_v26 = vadd.f32 %v1172_v46, %v1024_v22 }
 0x25c   :  { %v1487_v8 = vpop.f32.mrf.mxu2 }
 0x25d   :  { %v1322_v35 = vadd.f32 %v1321_v45, %v1173_v26  ;;  %v1488_v37 = vadd.f32 %v1487_v8, %v1339_v43 }
 0x25f   :  { %v1825_v36 = vmax.f32 %v7215_v40, %v1322_v35  ;;  %v9784_v35 = vld [vmem:[#allocation15_spill] sm:$0xff] }
 0x260   :  { %v1631_v16 = vpop.f32.mrf.mxu0 }
 0x261   :  { %v7560_v18 = vadd.f32 %v1631_v16, %v1483_v47  ;;  %v7562_v33 = vpop.f32.mrf.mxu1  ;;  %v7564_v0 = vpack.c.bf16 %v1825_v36, %v1823_v50  ;;  %v1349_v16 = vadd.f32 %v7486_v21, %v7530_v28 }
 0x262   :  { %9777 = vst [vmem:[#allocation5_spill] sm:$0xff] %v7562_v33  ;;  %v7571_v58 = vpop.f32.mrf.mxu3 }
 0x263   :  { %5155 = vmatmul.msk.bf16.gmra.mxu0 %vm785_vm1, %v9778_v30 }
 0x264   :  { %v1489_v48 = vpop.f32.mrf.mxu2  ;;  %2034 = vmatmul.bf16.gmra.mxu1 %v7475_v3 }
 0x265   :  { %v1490_v45 = vadd.f32 %v1489_v48, %v1341_v20 }
 0x267   :  { %1412 = vmatmul.bf16.gmra.mxu3 %v9781_v2  ;;  %v1351_v2 = vadd.f32 %v7495_v51, %v7530_v28  ;;  %v6087_v51 = vld [vmem:[%s9633_s5 + $0x84] sm:$0xff] }
 0x268   :  { %v1633_v40 = vpop.f32.mrf.mxu0 }
 0x269   :  { %1531 = vmatmul.bf16.gmra.mxu2 %v9779_v6  ;;  %v7574_v47 = vadd.f32 %v1633_v40, %v1485_v55  ;;  %v7576_v29 = vpop.f32.mrf.mxu1  ;;  %v1346_v55 = vadd.f32 %v7480_v5, %v7530_v28 }
 0x26a   :  { %9780 = vst [vmem:[#allocation17_spill] sm:$0xff] %v7576_v29  ;;  %v7581_v15 = vpop.f32.mrf.mxu3 }
 0x26c   :  { %v1492_v54 = vpop.f32.mrf.mxu2 }
 0x26d   :  { %v1493_v50 = vadd.f32 %v1492_v54, %v1344_v4  ;;  %v9787_v4 = vld [vmem:[#allocation10_spill] sm:$0xff] }
 0x270   :  { %v1636_v22 = vpop.f32.mrf.mxu0 }
 0x271   :  { %v7583_v46 = vadd.f32 %v1636_v22, %v1488_v37  ;;  %v7585_v41 = vpop.f32.mrf.mxu1  ;;  %v9785_v37 = vld [vmem:[#allocation32_spill] sm:$0xff] }
 0x272   :  { %9782 = vst [vmem:[#allocation38_spill] sm:$0xff] %v7585_v41  ;;  %v7592_v11 = vpop.f32.mrf.mxu3 }
 0x273   :  { %5156 = vmatmul.msk.bf16.gmra.mxu0 %vm785_vm1, %v9783_v38  ;;  %v9789_v38 = vld [vmem:[#allocation18_spill] sm:$0xff] }
 0x274   :  { %v1494_v43 = vpop.f32.mrf.mxu2  ;;  %2039 = vmatmul.bf16.gmra.mxu1 %v7490_v60 }
 0x275   :  { %v1495_v26 = vadd.f32 %v1494_v43, %v1346_v55 }
 0x277   :  { %1417 = vmatmul.bf16.gmra.mxu3 %v9785_v37  ;;  %v6086_v37 = vld [vmem:[%s9633_s5 + $0x7c] sm:$0xff] }
 0x278   :  { %v1638_v8 = vpop.f32.mrf.mxu0 }
 0x279   :  { %1536 = vmatmul.bf16.gmra.mxu2 %v9784_v35  ;;  %v7595_v36 = vadd.f32 %v1638_v8, %v1490_v45  ;;  %v7600_v5 = vpop.f32.mrf.mxu1  ;;  %v6088_v45 = vld [vmem:[%s9633_s5 + $0x8c] sm:$0xff]  ;;  %v1354_v35 = vadd.f32 %v7501_v31, %v7530_v28  ;;  %v1356_v31 = vadd.f32 %v7510_v19, %v7530_v28  ;;  %v9793_v19 = vld [vmem:[#allocation21_spill] sm:$0xff] }
 0x27a   :  { %9786 = vst [vmem:[#allocation2_spill] sm:$0xff] %v7600_v5  ;;  %v7602_v48 = vpop.f32.mrf.mxu3  ;;  %2232 = vmatpush.bf16.msra.mxu1 %v6088_v45  ;;  %v9790_v8 = vld [vmem:[#allocation35_spill] sm:$0xff] }
 0x27c   :  { %v1497_v20 = vpop.f32.mrf.mxu2 }
 0x27d   :  { %v1498_v30 = vadd.f32 %v1497_v20, %v1349_v16 }
 0x27e   :  { %2233 = vmatpush.bf16.msra.mxu1 %v6087_v51  ;;  %v6084_v51 = vld [vmem:[%s9633_s5 + $0x6c] sm:$0xff] }
 0x280   :  { %v1641_v40 = vpop.f32.mrf.mxu0 }
 0x281   :  { %v7604_v6 = vadd.f32 %v1641_v40, %v1493_v50  ;;  %v7616_v55 = vpop.f32.mrf.mxu1 }
 0x282   :  { %v7614_v22 = vpop.f32.mrf.mxu3  ;;  %9788 = vst [vmem:[#allocation41_spill] sm:$0xff] %v7616_v55  ;;  %2234 = vmatpush.bf16.msra.mxu1 %v6086_v37 }
 0x283   :  { %5157 = vmatmul.msk.bf16.gmra.mxu0 %vm785_vm1, %v9787_v4 }
 0x284   :  { %v1499_v21 = vpop.f32.mrf.mxu2  ;;  %2044 = vmatmul.bf16.gmra.mxu1 %v7505_v23 }
 0x285   :  { %v1500_v54 = vadd.f32 %v1499_v21, %v1351_v2  ;;  %v9792_v21 = vld [vmem:[#allocation12_spill] sm:$0xff] }
 0x287   :  { %1422 = vmatmul.bf16.gmra.mxu3 %v9790_v8 }
 0x288   :  { %v1643_v50 = vpop.f32.mrf.mxu0 }
 0x289   :  { %1541 = vmatmul.bf16.gmra.mxu2 %v9789_v38  ;;  %v7622_v43 = vadd.f32 %v1643_v50, %v1495_v26  ;;  %v6085_v26 = vld [vmem:[%s9633_s5 + $0x74] sm:$0xff]  ;;  %v7635_v2 = vpop.f32.mrf.mxu1 }
 0x28a   :  { %v7630_v40 = vpop.f32.mrf.mxu3  ;;  %9791 = vst [vmem:[#allocation7_spill] sm:$0xff] %v7635_v2  ;;  %2235 = vmatpush.bf16.msra.mxu1 %v6085_v26  ;;  %v9798_v2 = vld [vmem:[#allocation24_spill] sm:$0xff] }
 0x28c   :  { %v1502_v16 = vpop.f32.mrf.mxu2 }
 0x28d   :  { %v1503_v20 = vadd.f32 %v1502_v16, %v1354_v35  ;;  %v6079_v16 = vld [vmem:[%s9633_s5 + $0x40] sm:$0xff] }
 0x28e   :  { %2236 = vmatpush.bf16.msra.mxu1 %v6084_v51  ;;  %2072 = vmatpush.bf16.msrb.mxu3 %v6079_v16  ;;  %v9796_v16 = vld [vmem:[#allocation14_spill] sm:$0xff] }
 0x290   :  { %v1646_v4 = vpop.f32.mrf.mxu0 }
 0x291   :  { %v7637_v45 = vadd.f32 %v1646_v4, %v1498_v30  ;;  %v6083_v30 = vld [vmem:[%s9633_s5 + $0x64] sm:$0xff]  ;;  %v7658_v26 = vpop.f32.mrf.mxu1 }
 0x292   :  { %v7647_v8 = vpop.f32.mrf.mxu3  ;;  %2237 = vmatpush.bf16.msra.mxu1 %v6083_v30  ;;  %9794 = vst [vmem:[#allocation20_spill] sm:$0xff] %v7658_v26  ;;  %v9795_v4 = vld [vmem:[#allocation39_spill] sm:$0xff]  ;;  %v6081_v30 = vld [vmem:[%s9633_s5 + $0x54] sm:$0xff] }
 0x293   :  { %5158 = vmatmul.msk.bf16.gmra.mxu0 %vm785_vm1, %v9792_v21  ;;  %v6082_v21 = vld [vmem:[%s9633_s5 + $0x5c] sm:$0xff] }
 0x294   :  { %v1504_v50 = vpop.f32.mrf.mxu2  ;;  %2049 = vmatmul.bf16.gmra.mxu1 %v7520_v44 }
 0x295   :  { %v1505_v38 = vadd.f32 %v1504_v50, %v1356_v31  ;;  %v1359_v31 = vadd.f32 %v7516_v57, %v7530_v28  ;;  %v1361_v57 = vadd.f32 %v7525_v56, %v7530_v28  ;;  %v1364_v56 = vadd.f32 %v7538_v14, %v7530_v28 }
 0x296   :  { %2238 = vmatpush.bf16.msra.mxu1 %v6082_v21 }
 0x297   :  { %1427 = vmatmul.bf16.gmra.mxu3 %v9795_v4 }
 0x298   :  { %v1648_v35 = vpop.f32.mrf.mxu0 }
 0x299   :  { %1546 = vmatmul.bf16.gmra.mxu2 %v9793_v19  ;;  %v7653_v37 = vadd.f32 %v1648_v35, %v1500_v54  ;;  %v7677_v4 = vpop.f32.mrf.mxu1 }
 0x29a   :  { %v7666_v50 = vpop.f32.mrf.mxu3  ;;  %2239 = vmatpush.bf16.msra.mxu1 %v6081_v30  ;;  %9797 = vst [vmem:[#allocation43_spill] sm:$0xff] %v7677_v4  ;;  %v9799_v30 = vld [vmem:[#allocation44_spill] sm:$0xff] }
 0x29c   :  { %v1507_v51 = vpop.f32.mrf.mxu2 }
 0x29d   :  { %v1508_v54 = vadd.f32 %v1507_v51, %v1359_v31 }
 0x2a0   :  { %v1651_v35 = vpop.f32.mrf.mxu0 }
 0x2a1   :  { %v7671_v19 = vadd.f32 %v1651_v35, %v1503_v20  ;;  %v7690_v4 = vpop.f32.mrf.mxu1 }
 0x2a2   :  { %v7680_v51 = vpop.f32.mrf.mxu3  ;;  %9800 = vst [vmem:[#allocation3_spill] sm:$0xff] %v7690_v4 }
 0x2a3   :  { %5159 = vmatmul.msk.bf16.gmra.mxu0 %vm785_vm1, %v9796_v16 }
 0x2a4   :  { %v1509_v31 = vpop.f32.mrf.mxu2  ;;  %2054 = vmatmul.bf16.gmra.mxu1 %v7542_v9 }
 0x2a5   :  { %v1510_v21 = vadd.f32 %v1509_v31, %v1361_v57  ;;  %v1366_v31 = vadd.f32 %v7549_v59, %v7530_v28  ;;  %v1369_v59 = vadd.f32 %v7557_v12, %v7530_v28 }
 0x2a7   :  { %1432 = vmatmul.bf16.gmra.mxu3 %v9799_v30 }
 0x2a8   :  { %v1653_v26 = vpop.f32.mrf.mxu0 }
 0x2a9   :  { %1551 = vmatmul.bf16.gmra.mxu2 %v9798_v2  ;;  %v7683_v20 = vadd.f32 %v1653_v26, %v1505_v38  ;;  %v9801_v2 = vld [vmem:[#allocation16_spill] sm:$0xff]  ;;  %v7701_v30 = vpop.f32.mrf.mxu1 }
 0x2aa   :  { %v7688_v55 = vpop.f32.mrf.mxu3  ;;  %9802 = vst [vmem:[#allocation9_spill] sm:$0xff] %v7701_v30  ;;  %v1371_v30 = vadd.f32 %v7571_v58, %v7530_v28 }
 0x2ac   :  { %v1512_v35 = vpop.f32.mrf.mxu2 }
 0x2ad   :  { %v1513_v16 = vadd.f32 %v1512_v35, %v1364_v56  ;;  %v9803_v35 = vld [vmem:[#allocation27_spill] sm:$0xff] }
 0x2b0   :  { %v1656_v5 = vpop.f32.mrf.mxu0 }
 0x2b1   :  { %v7692_v57 = vadd.f32 %v1656_v5, %v1508_v54  ;;  %v9804_v5 = vld [vmem:[#allocation47_spill] sm:$0xff] }
 0x2b2   :  { %v7699_v14 = vpop.f32.mrf.mxu3 }
 0x2b3   :  { %5160 = vmatmul.msk.bf16.gmra.mxu0 %vm785_vm1, %v9801_v2 }
 0x2b4   :  { %v1514_v38 = vpop.f32.mrf.mxu2  ;;  %2059 = vmatmul.bf16.gmra.mxu1 %v7564_v0 }
 0x2b5   :  { %v1515_v26 = vadd.f32 %v1514_v38, %v1366_v31  ;;  %v7713_v38 = vpop.f32.mrf.mxu1 }
 0x2b6   :  { %9805 = vst [vmem:[#allocation23_spill] sm:$0xff] %v7713_v38 }
 0x2b7   :  { %1437 = vmatmul.bf16.gmra.mxu3 %v9804_v5 }
 0x2b8   :  { %v1658_v56 = vpop.f32.mrf.mxu0 }
 0x2b9   :  { %1556 = vmatmul.bf16.gmra.mxu2 %v9803_v35  ;;  %v7704_v4 = vadd.f32 %v1658_v56, %v1510_v21  ;;  %v9806_v35 = vld [vmem:[#allocation19_spill] sm:$0xff] }
 0x2ba   :  { %v7709_v41 = vpop.f32.mrf.mxu3 }
 0x2bc   :  { %v1517_v54 = vpop.f32.mrf.mxu2 }
 0x2bd   :  { %v1518_v2 = vadd.f32 %v1517_v54, %v1369_v59  ;;  %v9807_v59 = vld [vmem:[#allocation30_spill] sm:$0xff]  ;;  %v7728_v58 = vpop.f32.mrf.mxu1 }
 0x2be   :  { %9809 = vst [vmem:[#allocation4_spill] sm:$0xff] %v7728_v58 }
 0x2c0   :  { %v1661_v29 = vpop.f32.mrf.mxu0 }
 0x2c1   :  { %v7711_v31 = vadd.f32 %v1661_v29, %v1513_v16  ;;  %v9808_v29 = vld [vmem:[#allocation50_spill] sm:$0xff]  ;;  %v1374_v16 = vadd.f32 %v7581_v15, %v7530_v28 }
 0x2c2   :  { %v7720_v12 = vpop.f32.mrf.mxu3 }
 0x2c3   :  { %5161 = vmatmul.msk.bf16.gmra.mxu0 %vm785_vm1, %v9806_v35 }
 0x2c4   :  { %v1519_v21 = vpop.f32.mrf.mxu2  ;;  %2240 = vmatmul.bf16.vlgmr.msra.gmra.mxu1 %v7267_v24 }
 0x2c5   :  { %v1520_v56 = vadd.f32 %v1519_v21, %v1371_v30  ;;  %v1376_v21 = vadd.f32 %v7592_v11, %v7530_v28  ;;  %v1379_v11 = vadd.f32 %v7602_v48, %v7530_v28 }
 0x2c7   :  { %1442 = vmatmul.bf16.gmra.mxu3 %v9808_v29  ;;  %v7741_v29 = vpop.f32.mrf.mxu1 }
 0x2c8   :  { %v1663_v5 = vpop.f32.mrf.mxu0  ;;  %9811 = vst [vmem:[#allocation11_spill] sm:$0xff] %v7741_v29  ;;  %v1381_v29 = vadd.f32 %v7614_v22, %v7530_v28  ;;  %v9816_v22 = vld [vmem:[#allocation36_spill] sm:$0xff] }
 0x2c9   :  { %1561 = vmatmul.bf16.gmra.mxu2 %v9807_v59  ;;  %v7723_v54 = vadd.f32 %v1663_v5, %v1515_v26  ;;  %v9810_v59 = vld [vmem:[#allocation22_spill] sm:$0xff] }
 0x2ca   :  { %v7730_v33 = vpop.f32.mrf.mxu3 }
 0x2cc   :  { %v1522_v38 = vpop.f32.mrf.mxu2 }
 0x2cd   :  { %v1523_v35 = vadd.f32 %v1522_v38, %v1374_v16  ;;  %v9812_v16 = vld [vmem:[#allocation33_spill] sm:$0xff] }
 0x2d0   :  { %v1666_v24 = vpop.f32.mrf.mxu0 }
 0x2d1   :  { %v7732_v30 = vadd.f32 %v1666_v24, %v1518_v2 }
 0x2d2   :  { %v7739_v15 = vpop.f32.mrf.mxu3 }
 0x2d3   :  { %5162 = vmatmul.msk.bf16.gmra.mxu0 %vm785_vm1, %v9810_v59 }
 0x2d4   :  { %v1524_v26 = vpop.f32.mrf.mxu2  ;;  %2245 = vmatmul.bf16.gmra.mxu1 %v7302_v10  ;;  %v7751_v10 = vpop.f32.mrf.mxu1 }
 0x2d5   :  { %v1525_v5 = vadd.f32 %v1524_v26, %v1376_v21  ;;  %9813 = vst [vmem:[#allocation26_spill] sm:$0xff] %v7751_v10 }
 0x2d7   :  { %1447 = vmatmul.bf16.gmra.mxu3 %v7262_v53 }
 0x2d8   :  { %v1668_v38 = vpop.f32.mrf.mxu0 }
 0x2d9   :  { %1566 = vmatmul.bf16.gmra.mxu2 %v9812_v16  ;;  %v7744_v58 = vadd.f32 %v1668_v38, %v1520_v56  ;;  %v9815_v16 = vld [vmem:[#allocation25_spill] sm:$0xff]  ;;  %v2456_v38 = vld [vmem:[%s9634_s3 + $0x50] sm:$0x33] }
 0x2da   :  { %v7749_v59 = vpop.f32.mrf.mxu3 }
 0x2dc   :  { %v1527_v2 = vpop.f32.mrf.mxu2 }
 0x2dd   :  { %v1528_v24 = vadd.f32 %v1527_v2, %v1379_v11  ;;  %v2544_v11 = vunpack.c.l.b16 %v2456_v38  ;;  %v2545_v2 = vunpack.c.h.b16 %v2456_v38 }
 0x2df   :  { %v2557_v10 = vpack.c.b16 %v2545_v2, %v2545_v2 }
 0x2e0   :  { %v1671_v21 = vpop.f32.mrf.mxu0 }
 0x2e1   :  { %v7753_v26 = vadd.f32 %v1671_v21, %v1523_v35  ;;  %v2556_v21 = vpack.c.b16 %v2544_v11, %v2544_v11 }
 0x2e2   :  { %v7760_v48 = vpop.f32.mrf.mxu3 }
 0x2e3   :  { %9814 = vst [vmem:[#allocation6_spill] sm:$0xff] %v7753_v26  ;;  %5163 = vmatmul.msk.bf16.gmra.mxu0 %vm785_vm1, %v9815_v16  ;;  %v7768_v16 = vpop.f32.mrf.mxu1 }
 0x2e4   :  { %v1529_v56 = vpop.f32.mrf.mxu2  ;;  %2250 = vmatmul.bf16.gmra.mxu1 %v7346_v52  ;;  %9817 = vst [vmem:[#allocation13_spill] sm:$0xff] %v7768_v16  ;;  %v2601_v52 = vsel %vm2599_vm3, %v2556_v21, 0  ;;  %v9818_v21 = vld [vmem:[#allocation28_spill] sm:$0xff] }
 0x2e5   :  { %v1530_v53 = vadd.f32 %v1529_v56, %v1381_v29  ;;  %v2604_v29 = vsel %vm2599_vm3, %v2557_v10, 0  ;;  %v1384_v56 = vadd.f32 %v7630_v40, %v7530_v28  ;;  %2608 = vmatpush.bf16.msra.mxu2 %v2601_v52 }
 0x2e6   :  { %2667 = vmatpush.bf16.msra.mxu0 %v2604_v29 }
 0x2e7   :  { %1452 = vmatmul.bf16.gmra.mxu3 %v7297_v62 }
 0x2e8   :  { %v1673_v35 = vpop.f32.mrf.mxu0 }
 0x2e9   :  { %1571 = vmatmul.bf16.gmra.mxu2 %v9816_v22  ;;  %v7766_v26 = vadd.f32 %v1673_v35, %v1525_v5  ;;  %v1386_v35 = vadd.f32 %v7647_v8, %v7530_v28  ;;  %v1389_v8 = vadd.f32 %v7666_v50, %v7530_v28 }
 0x2ea   :  { %v7775_v2 = vpop.f32.mrf.mxu3 }
 0x2eb   :  { %v7783_v10 = vpop.f32.mrf.mxu1 }
 0x2ec   :  { %v1532_v38 = vpop.f32.mrf.mxu2  ;;  %9819 = vst [vmem:[#allocation29_spill] sm:$0xff] %v7783_v10 }
 0x2ed   :  { %v1533_v11 = vadd.f32 %v1532_v38, %v1384_v56  ;;  %v9820_v56 = vld [vmem:[#allocation40_spill] sm:$0xff] }
 0x2f0   :  { %v1676_v22 = vpop.f32.mrf.mxu0 }
 0x2f1   :  { %v7777_v5 = vadd.f32 %v1676_v22, %v1528_v24 }
 0x2f2   :  { %v7786_v52 = vpop.f32.mrf.mxu3 }
 0x2f3   :  { %5164 = vmatmul.msk.bf16.gmra.mxu0 %vm785_vm1, %v9818_v21  ;;  %v7796_v10 = vpop.f32.mrf.mxu1 }
 0x2f4   :  { %v1534_v62 = vpop.f32.mrf.mxu2  ;;  %2255 = vmatmul.bf16.gmra.mxu1 %v7393_v25  ;;  %9821 = vst [vmem:[#allocation8_spill] sm:$0xff] %v7796_v10 }
 0x2f5   :  { %v1535_v40 = vadd.f32 %v1534_v62, %v1386_v35  ;;  %v1391_v62 = vadd.f32 %v7680_v51, %v7530_v28  ;;  %v1394_v51 = vadd.f32 %v7688_v55, %v7530_v28 }
 0x2f7   :  { %1457 = vmatmul.bf16.gmra.mxu3 %v7338_v61 }
 0x2f8   :  { %v1678_v29 = vpop.f32.mrf.mxu0 }
 0x2f9   :  { %1576 = vmatmul.bf16.gmra.mxu2 %v9820_v56  ;;  %v7789_v38 = vadd.f32 %v1678_v29, %v1530_v53  ;;  %v9822_v56 = vld [vmem:[#allocation31_spill] sm:$0xff] }
 0x2fa   :  { %v7794_v21 = vpop.f32.mrf.mxu3 }
 0x2fb   :  { %v7807_v29 = vpop.f32.mrf.mxu1 }
 0x2fc   :  { %v1537_v24 = vpop.f32.mrf.mxu2  ;;  %9823 = vst [vmem:[#allocation15_spill] sm:$0xff] %v7807_v29  ;;  %v1396_v29 = vadd.f32 %v7699_v14, %v7530_v28 }
 0x2fd   :  { %v1538_v22 = vadd.f32 %v1537_v24, %v1389_v8  ;;  %v9824_v24 = vld [vmem:[#allocation45_spill] sm:$0xff] }
 0x300   :  { %v1681_v25 = vpop.f32.mrf.mxu0 }
 0x301   :  { %v7798_v35 = vadd.f32 %v1681_v25, %v1533_v11 }
 0x302   :  { %v7805_v50 = vpop.f32.mrf.mxu3 }
 0x303   :  { %5165 = vmatmul.msk.bf16.gmra.mxu0 %vm785_vm1, %v9822_v56 }
 0x304   :  { %v1539_v53 = vpop.f32.mrf.mxu2  ;;  %2260 = vmatmul.bf16.gmra.mxu1 %v7419_v39 }
 0x305   :  { %v1540_v61 = vadd.f32 %v1539_v53, %v1391_v62  ;;  %v7819_v53 = vpop.f32.mrf.mxu1 }
 0x306   :  { %9825 = vst [vmem:[#allocation32_spill] sm:$0xff] %v7819_v53 }
 0x307   :  { %1462 = vmatmul.bf16.gmra.mxu3 %v7385_v27 }
 0x308   :  { %v1683_v8 = vpop.f32.mrf.mxu0 }
 0x309   :  { %1581 = vmatmul.bf16.gmra.mxu2 %v9824_v24  ;;  %v7810_v10 = vadd.f32 %v1683_v8, %v1535_v40  ;;  %v9826_v24 = vld [vmem:[#allocation34_spill] sm:$0xff] }
 0x30a   :  { %v7815_v56 = vpop.f32.mrf.mxu3 }
 0x30c   :  { %v1542_v11 = vpop.f32.mrf.mxu2 }
 0x30d   :  { %v1543_v25 = vadd.f32 %v1542_v11, %v1394_v51  ;;  %v9827_v51 = vld [vmem:[#allocation48_spill] sm:$0xff]  ;;  %v7834_v14 = vpop.f32.mrf.mxu1 }
 0x30e   :  { %9829 = vst [vmem:[#allocation18_spill] sm:$0xff] %v7834_v14 }
 0x310   :  { %v1686_v39 = vpop.f32.mrf.mxu0 }
 0x311   :  { %v7817_v62 = vadd.f32 %v1686_v39, %v1538_v22  ;;  %v1399_v22 = vadd.f32 %v7709_v41, %v7530_v28 }
 0x312   :  { %v7826_v55 = vpop.f32.mrf.mxu3 }
 0x313   :  { %5166 = vmatmul.msk.bf16.gmra.mxu0 %vm785_vm1, %v9826_v24 }
 0x314   :  { %v1544_v40 = vpop.f32.mrf.mxu2  ;;  %2265 = vmatmul.bf16.gmra.mxu1 %v7429_v1 }
 0x315   :  { %v1545_v27 = vadd.f32 %v1544_v40, %v1396_v29  ;;  %v1401_v29 = vadd.f32 %v7720_v12, %v7530_v28  ;;  %v9831_v40 = vld [vmem:[#allocation37_spill] sm:$0xff]  ;;  %v7845_v41 = vpop.f32.mrf.mxu1  ;;  %v5249_v12 = vld [vmem:[%s9633_s5 + $0xa4] sm:$0xf] }
 0x316   :  { %9832 = vst [vmem:[#allocation12_spill] sm:$0xff] %v7845_v41  ;;  %v2207_v14 = vunpack.c.l.b16 %v5249_v12 }
 0x317   :  { %1467 = vmatmul.bf16.gmra.mxu3 %v7414_v32 }
 0x318   :  { %v1688_v8 = vpop.f32.mrf.mxu0 }
 0x319   :  { %1586 = vmatmul.bf16.gmra.mxu2 %v9827_v51  ;;  %v7829_v11 = vadd.f32 %v1688_v8, %v1540_v61  ;;  %v9833_v51 = vld [vmem:[#allocation51_spill] sm:$0xff] }
 0x31a   :  { %v7836_v16 = vpop.f32.mrf.mxu3 }
 0x31b   :  { %9828 = vst [vmem:[#allocation10_spill] sm:$0xff] %v7829_v11 }
 0x31c   :  { %v1547_v39 = vpop.f32.mrf.mxu2 }
 0x31d   :  { %v1548_v24 = vadd.f32 %v1547_v39, %v1399_v22 }
 0x320   :  { %v1691_v53 = vpop.f32.mrf.mxu0 }
 0x321   :  { %v7838_v1 = vadd.f32 %v1691_v53, %v1543_v25  ;;  %v7855_v53 = vpop.f32.mrf.mxu1 }
 0x322   :  { %v7850_v39 = vpop.f32.mrf.mxu3  ;;  %9835 = vst [vmem:[#allocation39_spill] sm:$0xff] %v7855_v53 }
 0x323   :  { %9830 = vst [vmem:[#allocation35_spill] sm:$0xff] %v7838_v1  ;;  %5167 = vmatmul.msk.bf16.gmra.mxu0 %vm785_vm1, %v9831_v40 }
 0x324   :  { %v1549_v61 = vpop.f32.mrf.mxu2  ;;  %2270 = vmatmul.bf16.gmra.mxu1 %v7442_v13 }
 0x325   :  { %v1550_v32 = vadd.f32 %v1549_v61, %v1401_v29  ;;  %v2218_v29 = vpack.c.b16 %v2207_v14, %v2207_v14  ;;  %v9837_v61 = vld [vmem:[#allocation42_spill] sm:$0xff] }
 0x327   :  { %v2230_v14 = vsel %vm1982_vm2, %v2218_v29, 0  ;;  %v1404_v29 = vadd.f32 %v7730_v33, %v7530_v28 }
 0x328   :  { %v1693_v8 = vpop.f32.mrf.mxu0  ;;  %2316 = vmatpush.bf16.msra.mxu3 %v2230_v14  ;;  %v9838_v14 = vld [vmem:[#allocation46_spill] sm:$0xff] }
 0x329   :  { %1591 = vmatmul.bf16.gmra.mxu2 %v9833_v51  ;;  %v7848_v22 = vadd.f32 %v1693_v8, %v1545_v27  ;;  %v5338_v27 = vld [vmem:[%s9634_s3 + $0x40] sm:$0xf]  ;;  %v6100_v8 = vld [vmem:[%s9634_s3 + $0x44] sm:$0xf0]  ;;  %v6099_v51 = vld [vmem:[%s9634_s3 + $0x44] sm:$0xf] }
 0x32a   :  { %v5339_v12 = vor.u32 %v6100_v8, %v5338_v27 }
 0x32b   :  { %9834 = vst [vmem:[#allocation21_spill] sm:$0xff] %v7848_v22  ;;  %v7880_v22 = vpop.f32.mrf.mxu1 }
 0x32c   :  { %v1552_v25 = vpop.f32.mrf.mxu2  ;;  %2609 = vmatpush.bf16.msra.mxu2 %v5339_v12 }
 0x32d   :  { %v1553_v8 = vadd.f32 %v1552_v25, %v1404_v29  ;;  %v1409_v25 = vadd.f32 %v7749_v59, %v7530_v28  ;;  %v1411_v59 = vadd.f32 %v7760_v48, %v7530_v28 }
 0x330   :  { %v1696_v40 = vpop.f32.mrf.mxu0 }
 0x331   :  { %v7857_v13 = vadd.f32 %v1696_v40, %v1548_v24  ;;  %v7871_v24 = vpop.f32.mrf.mxu3  ;;  %v5340_v40 = vld [vmem:[%s9634_s3 + $0x48] sm:$0xf0] }
 0x333   :  { %9836 = vst [vmem:[#allocation14_spill] sm:$0xff] %v7857_v13  ;;  %5168 = vmatmul.msk.bf16.gmra.mxu0 %vm785_vm1, %v9837_v61  ;;  %v5343_v61 = vor.u32 %v6099_v51, %v5340_v40  ;;  %v7889_v12 = vpop.f32.mrf.mxu1 }
 0x334   :  { %v1554_v53 = vpop.f32.mrf.mxu2  ;;  %2275 = vmatmul.bf16.gmra.mxu1 %v7457_v63 }
 0x335   :  { %2668 = vmatpush.bf16.msra.mxu0 %v5343_v61 }
 0x338   :  { %v1698_v41 = vpop.f32.mrf.mxu0 }
 0x339   :  { %1596 = vmatmul.bf16.gmra.mxu2 %v7264_v42  ;;  %v7878_v13 = vadd.f32 %v1698_v41, %v1550_v32  ;;  %v7884_v27 = vpop.f32.mrf.mxu3  ;;  %v1406_v32 = vadd.f32 %v7739_v15, %v7530_v28 }
 0x33b   :  { %v1555_v41 = vadd.f32 %v1554_v53, %v1406_v32 }
 0x33c   :  { %v1557_v63 = vpop.f32.mrf.mxu2 }
 0x33d   :  { %v1558_v29 = vadd.f32 %v1557_v63, %v1409_v25 }
 0x340   :  { %v1701_v1 = vpop.f32.mrf.mxu0 }
 0x341   :  { %v1702_v11 = vadd.f32 %v1701_v1, %v1553_v8  ;;  %v7894_v40 = vpop.f32.mrf.mxu3 }
 0x343   :  { %v1772_v51 = vmax.f32 %v7560_v18, %v1702_v11  ;;  %5169 = vmatmul.msk.bf16.gmra.mxu0 %vm785_vm1, %v9838_v14 }
 0x344   :  { %v1559_v42 = vpop.f32.mrf.mxu2  ;;  %2280 = vmatmul.bf16.gmra.mxu1 %v7475_v3  ;;  %v7902_v3 = vpop.f32.mrf.mxu1 }
 0x348   :  { %v1703_v33 = vpop.f32.mrf.mxu0 }
 0x349   :  { %1601 = vmatmul.bf16.gmra.mxu2 %v7299_v17  ;;  %v1704_v1 = vadd.f32 %v1703_v33, %v1555_v41  ;;  %v7906_v8 = vpop.f32.mrf.mxu3 }
 0x34b   :  { %v1774_v18 = vmax.f32 %v7574_v47, %v1704_v1  ;;  %v9839_v47 = vld [vmem:[#allocation49_spill] sm:$0xff] }
 0x34c   :  { %v1562_v11 = vpop.f32.mrf.mxu2  ;;  %v7914_v63 = vpop.f32.mrf.mxu1 }
 0x34d   :  { %v7900_v61 = vpack.c.bf16 %v1774_v18, %v1772_v51  ;;  %v1560_v51 = vadd.f32 %v1559_v42, %v1411_v59  ;;  %v1414_v18 = vadd.f32 %v7775_v2, %v7530_v28  ;;  %v1416_v2 = vadd.f32 %v7786_v52, %v7530_v28 }
 0x34f   :  { %5215 = vmatmul.msk.bf16.vlgmr.msrb.gmra.mxu3 %vm1939_vm4, %v7900_v61 }
 0x350   :  { %v1706_v15 = vpop.f32.mrf.mxu0 }
 0x351   :  { %v1707_v53 = vadd.f32 %v1706_v15, %v1558_v29  ;;  %v9840_v15 = vld [vmem:[#allocation52_spill] sm:$0xff] }
 0x353   :  { %v1776_v17 = vmax.f32 %v7583_v46, %v1707_v53  ;;  %5170 = vmatmul.msk.bf16.gmra.mxu0 %vm785_vm1, %v9839_v47  ;;  %v7918_v46 = vpop.f32.mrf.mxu3 }
 0x354   :  { %v1564_v14 = vpop.f32.mrf.mxu2  ;;  %2285 = vmatmul.bf16.gmra.mxu1 %v7490_v60  ;;  %v1563_v60 = vadd.f32 %v1562_v11, %v1414_v18  ;;  %v7926_v29 = vpop.f32.mrf.mxu1  ;;  %v9842_v18 = vld [vmem:[#allocation53_spill] sm:$0xff] }
 0x355   :  { %v1565_v11 = vadd.f32 %v1564_v14, %v1416_v2  ;;  %v1424_v2 = vadd.f32 %v7815_v56, %v7530_v28  ;;  %v5332_v56 = vld [vmem:[%s9634_s3 + $0x38] sm:$0xf0] }
 0x358   :  { %v1708_v32 = vpop.f32.mrf.mxu0 }
 0x359   :  { %1606 = vmatmul.bf16.gmra.mxu2 %v7343_v34  ;;  %v1709_v41 = vadd.f32 %v1708_v32, %v1560_v51  ;;  %v1419_v32 = vadd.f32 %v7794_v21, %v7530_v28  ;;  %v1421_v21 = vadd.f32 %v7805_v50, %v7530_v28  ;;  %v5330_v50 = vld [vmem:[%s9634_s3 + $0x30] sm:$0xf] }
 0x35b   :  { %v1778_v33 = vmax.f32 %v7595_v36, %v1709_v41  ;;  %v7934_v53 = vpop.f32.mrf.mxu3 }
 0x35c   :  { %v1567_v1 = vpop.f32.mrf.mxu2  ;;  %v7938_v51 = vpop.f32.mrf.mxu1 }
 0x35d   :  { %v7922_v25 = vpack.c.bf16 %v1778_v33, %v1776_v17  ;;  %9841 = vst [vmem:[#allocation24_spill] sm:$0xff] %v7938_v51  ;;  %v6104_v51 = vld [vmem:[%s9634_s3 + $0x6c] sm:$0xf0] }
 0x35f   :  { %5216 = vmatmul.msk.bf16.gmra.mxu3 %vm1939_vm4, %v7922_v25 }
 0x360   :  { %v1711_v48 = vpop.f32.mrf.mxu0 }
 0x361   :  { %v1712_v42 = vadd.f32 %v1711_v48, %v1563_v60 }
 0x363   :  { %v1780_v34 = vmax.f32 %v7604_v6, %v1712_v42  ;;  %5171 = vmatmul.msk.bf16.gmra.mxu0 %vm785_vm1, %v9840_v15  ;;  %v7946_v14 = vpop.f32.mrf.mxu3 }
 0x364   :  { %v1569_v36 = vpop.f32.mrf.mxu2  ;;  %2290 = vmatmul.bf16.gmra.mxu1 %v7505_v23  ;;  %v1568_v23 = vadd.f32 %v1567_v1, %v1419_v32  ;;  %v7954_v60 = vpop.f32.mrf.mxu1 }
 0x365   :  { %v1570_v1 = vadd.f32 %v1569_v36, %v1421_v21 }
 0x368   :  { %v1713_v17 = vpop.f32.mrf.mxu0 }
 0x369   :  { %1611 = vmatmul.bf16.gmra.mxu2 %v7390_v7  ;;  %v1714_v47 = vadd.f32 %v1713_v17, %v1565_v11 }
 0x36b   :  { %v1782_v59 = vmax.f32 %v7622_v43, %v1714_v47 }
 0x36c   :  { %v1572_v6 = vpop.f32.mrf.mxu2 }
 0x36d   :  { %v7942_v41 = vpack.c.bf16 %v1782_v59, %v1780_v34  ;;  %v7957_v34 = vpop.f32.mrf.mxu3  ;;  %v1573_v17 = vadd.f32 %v1572_v6, %v1424_v2  ;;  %v7981_v59 = vpop.f32.mrf.mxu1 }
 0x36f   :  { %5217 = vmatmul.msk.bf16.gmra.mxu3 %vm1939_vm4, %v7942_v41 }
 0x370   :  { %v1716_v52 = vpop.f32.mrf.mxu0 }
 0x371   :  { %v1717_v33 = vadd.f32 %v1716_v52, %v1568_v23 }
 0x373   :  { %v1784_v7 = vmax.f32 %v7637_v45, %v1717_v33  ;;  %5172 = vmatmul.msk.bf16.gmra.mxu0 %vm785_vm1, %v9842_v18  ;;  %v9843_v33 = vld [vmem:[#allocation54_spill] sm:$0xff]  ;;  %v1426_v18 = vadd.f32 %v7826_v55, %v7530_v28 }
 0x374   :  { %v1574_v43 = vpop.f32.mrf.mxu2  ;;  %2295 = vmatmul.bf16.gmra.mxu1 %v7520_v44  ;;  %v6090_v44 = vld [vmem:[%s9633_s5 + $0x9c] sm:$0xff] }
 0x375   :  { %2317 = vmatpush.bf16.msra.mxu3 %v6090_v44  ;;  %v7987_v6 = vpop.f32.mrf.mxu3  ;;  %v1575_v21 = vadd.f32 %v1574_v43, %v1426_v18 }
 0x378   :  { %v1718_v48 = vpop.f32.mrf.mxu0 }
 0x379   :  { %1616 = vmatmul.bf16.gmra.mxu2 %v7416_v49  ;;  %v1719_v42 = vadd.f32 %v1718_v48, %v1570_v1  ;;  %v6098_v49 = vld [vmem:[%s9634_s3 + $0x34] sm:$0xf0] }
 0x37a   :  { %v5331_v36 = vor.u32 %v6098_v49, %v5330_v50 }
 0x37b   :  { %v1786_v45 = vmax.f32 %v7653_v37, %v1719_v42  ;;  %v6097_v37 = vld [vmem:[%s9634_s3 + $0x34] sm:$0xf]  ;;  %v7991_v42 = vpop.f32.mrf.mxu1 }
 0x37c   :  { %v1577_v15 = vpop.f32.mrf.mxu2  ;;  %v5335_v47 = vor.u32 %v6097_v37, %v5332_v56  ;;  %2610 = vmatpush.bf16.msra.mxu2 %v5331_v36  ;;  %v9844_v36 = vld [vmem:[#allocation55_spill] sm:$0xff] }
 0x37d   :  { %v7962_v11 = vpack.c.bf16 %v1786_v45, %v1784_v7  ;;  %v7998_v50 = vpop.f32.mrf.mxu3 }
 0x37e   :  { %2669 = vmatpush.bf16.msra.mxu0 %v5335_v47 }
 0x37f   :  { %5218 = vmatmul.msk.bf16.gmra.mxu3 %vm1939_vm4, %v7962_v11 }
 0x380   :  { %v1721_v32 = vpop.f32.mrf.mxu0 }
 0x381   :  { %v1722_v23 = vadd.f32 %v1721_v32, %v1573_v17 }
 0x383   :  { %v1788_v52 = vmax.f32 %v7671_v19, %v1722_v23  ;;  %5173 = vmatmul.msk.bf16.gmra.mxu0 %vm785_vm1, %v9843_v33  ;;  %v1429_v19 = vadd.f32 %v7836_v16, %v7530_v28  ;;  %v1431_v16 = vadd.f32 %v7850_v39, %v7530_v28 }
 0x384   :  { %v1579_v7 = vpop.f32.mrf.mxu2  ;;  %2300 = vmatmul.bf16.gmra.mxu1 %v7542_v9 }
 0x385   :  { %v1578_v9 = vadd.f32 %v1577_v15, %v1429_v19  ;;  %v1580_v56 = vadd.f32 %v1579_v7, %v1431_v16  ;;  %v8010_v17 = vpop.f32.mrf.mxu3 }
 0x388   :  { %v1723_v1 = vpop.f32.mrf.mxu0 }
 0x389   :  { %v1724_v48 = vadd.f32 %v1723_v1, %v1575_v21 }
 0x38b   :  { %v1790_v45 = vmax.f32 %v7683_v20, %v1724_v48  ;;  %v8005_v20 = vpop.f32.mrf.mxu1 }
 0x38c   :  { %v1582_v2 = vpop.f32.mrf.mxu2 }
 0x38d   :  { %v7996_v44 = vpack.c.bf16 %v1790_v45, %v1788_v52  ;;  %v8019_v39 = vpop.f32.mrf.mxu3 }
 0x38f   :  { %5219 = vmatmul.msk.bf16.gmra.mxu3 %vm1939_vm4, %v7996_v44 }
 0x390   :  { %v1726_v55 = vpop.f32.mrf.mxu0 }
 0x391   :  { %v1727_v43 = vadd.f32 %v1726_v55, %v1578_v9  ;;  %v1439_v9 = vadd.f32 %v7894_v40, %v7530_v28 }
 0x393   :  { %v1792_v49 = vmax.f32 %v7692_v57, %v1727_v43  ;;  %5174 = vmatmul.msk.bf16.gmra.mxu0 %vm785_vm1, %v9844_v36  ;;  %v1434_v57 = vadd.f32 %v7871_v24, %v7530_v28 }
 0x394   :  { %v1584_v37 = vpop.f32.mrf.mxu2  ;;  %2305 = vmatmul.bf16.gmra.mxu1 %v7564_v0 }
 0x395   :  { %v1583_v33 = vadd.f32 %v1582_v2, %v1434_v57  ;;  %v8025_v19 = vpop.f32.mrf.mxu3 }
 0x398   :  { %v1728_v15 = vpop.f32.mrf.mxu0 }
 0x399   :  { %v1729_v47 = vadd.f32 %v1728_v15, %v1580_v56 }
 0x39b   :  { %v1794_v32 = vmax.f32 %v7704_v4, %v1729_v47  ;;  %v1436_v4 = vadd.f32 %v7884_v27, %v7530_v28 }
 0x39c   :  { %v1587_v23 = vpop.f32.mrf.mxu2 }
 0x39d   :  { %v8015_v52 = vpack.c.bf16 %v1794_v32, %v1792_v49  ;;  %v1585_v1 = vadd.f32 %v1584_v37, %v1436_v4  ;;  %v1588_v43 = vadd.f32 %v1587_v23, %v1439_v9  ;;  %v8036_v37 = vpop.f32.mrf.mxu3  ;;  %v1444_v32 = vadd.f32 %v7918_v46, %v7530_v28  ;;  %v6089_v46 = vld [vmem:[%s9633_s5 + $0x94] sm:$0xff]  ;;  %v6096_v4 = vld [vmem:[%s9634_s3 + $0x24] sm:$0xf0] }
 0x39e   :  { %2318 = vmatpush.bf16.msra.mxu3 %v6089_v46 }
 0x39f   :  { %5220 = vmatmul.msk.bf16.gmra.mxu3 %vm1939_vm4, %v8015_v52 }
 0x3a0   :  { %v1731_v0 = vpop.f32.mrf.mxu0 }
 0x3a1   :  { %v1732_v18 = vadd.f32 %v1731_v0, %v1583_v33  ;;  %v9845_v0 = vld [vmem:[#allocation6_spill] sm:$0xff] }
 0x3a3   :  { %v1796_v7 = vmax.f32 %v7711_v31, %v1732_v18 }
 0x3a4   :  { %v1589_v21 = vpop.f32.mrf.mxu2 }
 0x3a8   :  { %v1733_v48 = vpop.f32.mrf.mxu0 }
 0x3a9   :  { %v1734_v45 = vadd.f32 %v1733_v48, %v1585_v1  ;;  %v6095_v48 = vld [vmem:[%s9634_s3 + $0x24] sm:$0xf] }
 0x3ab   :  { %v1798_v24 = vmax.f32 %v7723_v54, %v1734_v45  ;;  %v1441_v54 = vadd.f32 %v7906_v8, %v7530_v28 }
 0x3ac   :  { %v1592_v2 = vpop.f32.mrf.mxu2 }
 0x3ad   :  { %v8029_v55 = vpack.c.bf16 %v1798_v24, %v1796_v7  ;;  %v1590_v16 = vadd.f32 %v1589_v21, %v1441_v54  ;;  %v1593_v57 = vadd.f32 %v1592_v2, %v1444_v32  ;;  %v5322_v21 = vld [vmem:[%s9634_s3 + $0x20] sm:$0xf]  ;;  %v1451_v32 = vadd.f32 %v7957_v34, %v7530_v28 }
 0x3ae   :  { %v5323_v1 = vor.u32 %v6096_v4, %v5322_v21  ;;  %v1456_v4 = vadd.f32 %v7998_v50, %v7530_v28 }
 0x3af   :  { %5221 = vmatmul.msk.bf16.gmra.mxu3 %vm1939_vm4, %v8029_v55 }
 0x3b0   :  { %v1736_v31 = vpop.f32.mrf.mxu0  ;;  %2611 = vmatpush.bf16.msra.mxu2 %v5323_v1 }
 0x3b1   :  { %v1737_v49 = vadd.f32 %v1736_v31, %v1588_v43 }
 0x3b3   :  { %v1800_v27 = vmax.f32 %v7732_v30, %v1737_v49  ;;  %v8045_v30 = vpop.f32.mrf.mxu3  ;;  %v1449_v49 = vadd.f32 %v7946_v14, %v7530_v28 }
 0x3b4   :  { %v1594_v36 = vpop.f32.mrf.mxu2 }
 0x3b8   :  { %v1738_v56 = vpop.f32.mrf.mxu0 }
 0x3b9   :  { %v1739_v15 = vadd.f32 %v1738_v56, %v1590_v16 }
 0x3bb   :  { %v1802_v40 = vmax.f32 %v7744_v58, %v1739_v15  ;;  %v1446_v58 = vadd.f32 %v7934_v53, %v7530_v28  ;;  %v5324_v53 = vld [vmem:[%s9634_s3 + $0x28] sm:$0xf0]  ;;  %v8065_v43 = vpop.f32.mrf.mxu3 }
 0x3bc   :  { %v1597_v47 = vpop.f32.mrf.mxu2  ;;  %v5327_v24 = vor.u32 %v6095_v48, %v5324_v53 }
 0x3bd   :  { %v8041_v23 = vpack.c.bf16 %v1802_v40, %v1800_v27  ;;  %v1595_v45 = vadd.f32 %v1594_v36, %v1446_v58  ;;  %v1598_v16 = vadd.f32 %v1597_v47, %v1449_v49 }
 0x3be   :  { %2670 = vmatpush.bf16.msra.mxu0 %v5327_v24  ;;  %v1459_v24 = vadd.f32 %v8010_v17, %v7530_v28 }
 0x3bf   :  { %5222 = vmatmul.msk.bf16.gmra.mxu3 %vm1939_vm4, %v8041_v23 }
 0x3c0   :  { %v1741_v8 = vpop.f32.mrf.mxu0 }
 0x3c1   :  { %v1742_v33 = vadd.f32 %v1741_v8, %v1593_v57 }
 0x3c3   :  { %v1804_v18 = vmax.f32 %v9845_v0, %v1742_v33  ;;  %v1454_v0 = vadd.f32 %v7987_v6, %v7530_v28 }
 0x3c4   :  { %v1599_v7 = vpop.f32.mrf.mxu2 }
 0x3c8   :  { %v1743_v2 = vpop.f32.mrf.mxu0 }
 0x3c9   :  { %v1744_v9 = vadd.f32 %v1743_v2, %v1595_v45 }
 0x3cb   :  { %v1806_v31 = vmax.f32 %v7766_v26, %v1744_v9  ;;  %v1600_v26 = vadd.f32 %v1599_v7, %v1451_v32 }
 0x3cc   :  { %v1602_v54 = vpop.f32.mrf.mxu2 }
 0x3cd   :  { %v8070_v27 = vpack.c.bf16 %v1806_v31, %v1804_v18  ;;  %v1603_v58 = vadd.f32 %v1602_v54, %v1454_v0  ;;  %v1461_v54 = vadd.f32 %v8019_v39, %v7530_v28  ;;  %v9847_v0 = vld [vmem:[#allocation35_spill] sm:$0xff] }
 0x3cf   :  { %5223 = vmatmul.msk.bf16.gmra.mxu3 %vm1939_vm4, %v8070_v27 }
 0x3d0   :  { %v1746_v36 = vpop.f32.mrf.mxu0 }
 0x3d1   :  { %v1747_v56 = vadd.f32 %v1746_v36, %v1598_v16 }
 0x3d2   :  { %v8074_v15 = vpop.f32.mrf.mxu3 }
 0x3d3   :  { %v1808_v40 = vmax.f32 %v7777_v5, %v1747_v56 }
 0x3d4   :  { %v1604_v57 = vpop.f32.mrf.mxu2 }
 0x3d8   :  { %v1748_v8 = vpop.f32.mrf.mxu0 }
 0x3d9   :  { %v1749_v14 = vadd.f32 %v1748_v8, %v1600_v26  ;;  %v1464_v26 = vadd.f32 %v8025_v19, %v7530_v28 }
 0x3da   :  { %v8079_v33 = vpop.f32.mrf.mxu3 }
 0x3db   :  { %v1810_v47 = vmax.f32 %v7789_v38, %v1749_v14  ;;  %v1605_v38 = vadd.f32 %v1604_v57, %v1456_v4 }
 0x3dc   :  { %v1607_v34 = vpop.f32.mrf.mxu2 }
 0x3dd   :  { %v8084_v18 = vpack.c.bf16 %v1810_v47, %v1808_v40  ;;  %v1608_v9 = vadd.f32 %v1607_v34, %v1459_v24  ;;  %v9846_v40 = vld [vmem:[#allocation10_spill] sm:$0xff]  ;;  %v6094_v24 = vld [vmem:[%s9634_s3 + $0x14] sm:$0xf0] }
 0x3df   :  { %5224 = vmatmul.msk.bf16.gmra.mxu3 %vm1939_vm4, %v8084_v18 }
 0x3e0   :  { %v1751_v5 = vpop.f32.mrf.mxu0 }
 0x3e1   :  { %v1752_v46 = vadd.f32 %v1751_v5, %v1603_v58  ;;  %v1466_v5 = vadd.f32 %v8036_v37, %v7530_v28  ;;  %v5314_v37 = vld [vmem:[%s9634_s3 + $0x10] sm:$0xf] }
 0x3e2   :  { %v8088_v7 = vpop.f32.mrf.mxu3 }
 0x3e3   :  { %v1812_v21 = vmax.f32 %v7798_v35, %v1752_v46 }
 0x3e4   :  { %v1609_v45 = vpop.f32.mrf.mxu2 }
 0x3e5   :  { %v1610_v16 = vadd.f32 %v1609_v45, %v1461_v54 }
 0x3e8   :  { %v1753_v1 = vpop.f32.mrf.mxu0 }
 0x3e9   :  { %v1754_v48 = vadd.f32 %v1753_v1, %v1605_v38  ;;  %v9848_v38 = vld [vmem:[#allocation21_spill] sm:$0xff] }
 0x3ea   :  { %v8093_v6 = vpop.f32.mrf.mxu3 }
 0x3eb   :  { %v1814_v53 = vmax.f32 %v7810_v10, %v1754_v48  ;;  %v1469_v48 = vadd.f32 %v8045_v30, %v7530_v28  ;;  %v5315_v30 = vor.u32 %v6094_v24, %v5314_v37 }
 0x3ec   :  { %v1612_v10 = vpop.f32.mrf.mxu2 }
 0x3ed   :  { %v8098_v2 = vpack.c.bf16 %v1814_v53, %v1812_v21  ;;  %v1613_v8 = vadd.f32 %v1612_v10, %v1464_v26  ;;  %2612 = vmatpush.bf16.msra.mxu2 %v5315_v30 }
 0x3ef   :  { %5225 = vmatmul.msk.bf16.gmra.mxu3 %vm1939_vm4, %v8098_v2 }
 0x3f0   :  { %v1756_v35 = vpop.f32.mrf.mxu0 }
 0x3f1   :  { %v1757_v31 = vadd.f32 %v1756_v35, %v1608_v9  ;;  %v6093_v9 = vld [vmem:[%s9634_s3 + $0x14] sm:$0xf] }
 0x3f2   :  { %v8102_v50 = vpop.f32.mrf.mxu3 }
 0x3f3   :  { %v1816_v49 = vmax.f32 %v7817_v62, %v1757_v31  ;;  %v5316_v31 = vld [vmem:[%s9634_s3 + $0x18] sm:$0xf0] }
 0x3f4   :  { %v1614_v62 = vpop.f32.mrf.mxu2  ;;  %v5319_v54 = vor.u32 %v6093_v9, %v5316_v31 }
 0x3f5   :  { %v1615_v46 = vadd.f32 %v1614_v62, %v1466_v5 }
 0x3f6   :  { %2671 = vmatpush.bf16.msra.mxu0 %v5319_v54 }
 0x3f8   :  { %v1758_v36 = vpop.f32.mrf.mxu0 }
 0x3f9   :  { %v1759_v56 = vadd.f32 %v1758_v36, %v1610_v16  ;;  %v9849_v16 = vld [vmem:[#allocation14_spill] sm:$0xff] }
 0x3fa   :  { %v8107_v17 = vpop.f32.mrf.mxu3 }
 0x3fb   :  { %v1818_v32 = vmax.f32 %v9846_v40, %v1759_v56  ;;  %v1471_v40 = vadd.f32 %v8065_v43, %v7530_v28 }
 0x3fc   :  { %v1617_v19 = vpop.f32.mrf.mxu2 }
 0x3fd   :  { %v8112_v57 = vpack.c.bf16 %v1818_v32, %v1816_v49  ;;  %v1618_v45 = vadd.f32 %v1617_v19, %v1469_v48 }
 0x3ff   :  { %5226 = vmatmul.msk.bf16.gmra.mxu3 %vm1939_vm4, %v8112_v57 }
 0x400   :  { %v1761_v14 = vpop.f32.mrf.mxu0 }
 0x401   :  { %v1762_v39 = vadd.f32 %v1761_v14, %v1613_v8 }
 0x402   :  { %v8116_v47 = vpop.f32.mrf.mxu3 }
 0x403   :  { %v1820_v58 = vmax.f32 %v9847_v0, %v1762_v39 }
 0x404   :  { %v1619_v56 = vpop.f32.mrf.mxu2 }
 0x405   :  { %v1620_v32 = vadd.f32 %v1619_v56, %v1471_v40 }
 0x408   :  { %v1763_v34 = vpop.f32.mrf.mxu0 }
 0x409   :  { %v1764_v21 = vadd.f32 %v1763_v34, %v1615_v46 }
 0x40a   :  { %v8121_v4 = vpop.f32.mrf.mxu3 }
 0x40b   :  { %v1822_v1 = vmax.f32 %v9848_v38, %v1764_v21  ;;  %v6092_v21 = vld [vmem:[%s9634_s3 + $0x4] sm:$0xf0] }
 0x40c   :  { %v5374_v38 = vld [vmem:[%s9634_s3 + $0xa8] sm:$0x33] }
 0x40d   :  { %v8126_v53 = vpack.c.bf16 %v1822_v1, %v1820_v58  ;;  %v2773_v48 = vunpack.c.h.b16 %v5374_v38  ;;  %v2772_v9 = vunpack.c.l.b16 %v5374_v38 }
 0x40f   :  { %5227 = vmatmul.msk.bf16.gmra.mxu3 %vm1939_vm4, %v8126_v53  ;;  %v2784_v30 = vpack.c.b16 %v2772_v9, %v2772_v9  ;;  %v5445_v9 = vld [vmem:[%s9634_s3 + $0x100] sm:$0x33] }
 0x410   :  { %v1766_v35 = vpop.f32.mrf.mxu0 }
 0x411   :  { %v1767_v49 = vadd.f32 %v1766_v35, %v1618_v45  ;;  %v2785_v45 = vpack.c.b16 %v2773_v48, %v2773_v48  ;;  %v8196_v35 = vpop.f32.mrf.mxu1  ;;  %v2800_v31 = vsel %vm2599_vm3, %v2784_v30, 0  ;;  %v5401_v48 = vld [vmem:[%s9634_s3 + $0x88] sm:$0xf]  ;;  %v6107_v30 = vld [vmem:[%s9634_s3 + $0x8c] sm:$0xf] }
 0x412   :  { %v8142_v10 = vpop.f32.mrf.mxu3  ;;  %2807 = vmatpush.bf16.msrb.mxu1 %v2800_v31  ;;  %v5403_v31 = vld [vmem:[%s9634_s3 + $0x90] sm:$0xf0] }
 0x413   :  { %v1824_v36 = vmax.f32 %v9849_v16, %v1767_v49  ;;  %v2803_v37 = vsel %vm2599_vm3, %v2785_v45, 0 }
 0x414   :  { %2866 = vmatpush.bf16.msrb.mxu3 %v2803_v37  ;;  %v5393_v37 = vld [vmem:[%s9634_s3 + $0x78] sm:$0xf] }
 0x418   :  { %v1768_v26 = vpop.f32.mrf.mxu0 }
 0x419   :  { %v1769_v8 = vadd.f32 %v1768_v26, %v1620_v32  ;;  %v8201_v54 = vpop.f32.mrf.mxu1  ;;  %v6109_v32 = vld [vmem:[%s9634_s3 + $0x9c] sm:$0xf] }
 0x41a   :  { %v8147_v62 = vpop.f32.mrf.mxu3 }
 0x41b   :  { %v1826_v14 = vmax.f32 %v7878_v13, %v1769_v8 }
 0x41d   :  { %v8150_v39 = vpack.c.bf16 %v1826_v14, %v1824_v36  ;;  %v6110_v14 = vld [vmem:[%s9634_s3 + $0x9c] sm:$0xf0] }
 0x41f   :  { %5228 = vmatmul.msk.bf16.gmra.mxu3 %vm1939_vm4, %v8150_v39 }
 0x421   :  { %v8207_v16 = vpop.f32.mrf.mxu1 }
 0x422   :  { %v8154_v0 = vpop.f32.mrf.mxu3 }
 0x429   :  { %v8215_v40 = vpop.f32.mrf.mxu1 }
 0x42a   :  { %v8156_v58 = vpop.f32.mrf.mxu3 }
 0x42f   :  { %5290 = vmatmul.msk.bf16.vlgmr.msra.gmra.mxu3 %vm1939_vm4, %v7900_v61  ;;  %v5306_v61 = vld [vmem:[%s9634_s3] sm:$0xf] }
 0x430   :  { %v5307_v19 = vor.u32 %v6092_v21, %v5306_v61 }
 0x431   :  { %v8231_v21 = vpop.f32.mrf.mxu1 }
 0x432   :  { %v8160_v28 = vpop.f32.mrf.mxu3  ;;  %2613 = vmatpush.bf16.msra.mxu2 %v5307_v19 }
 0x439   :  { %v8237_v19 = vpop.f32.mrf.mxu1 }
 0x43a   :  { %v8162_v43 = vpop.f32.mrf.mxu3 }
 0x43f   :  { %5291 = vmatmul.msk.bf16.gmra.mxu3 %vm1939_vm4, %v7922_v25  ;;  %v6091_v25 = vld [vmem:[%s9634_s3 + $0x4] sm:$0xf] }
 0x441   :  { %v8243_v38 = vpop.f32.mrf.mxu1 }
 0x442   :  { %v8166_v13 = vpop.f32.mrf.mxu3 }
 0x44a   :  { %v8168_v5 = vpop.f32.mrf.mxu3 }
 0x44f   :  { %5292 = vmatmul.msk.bf16.gmra.mxu3 %vm1939_vm4, %v7942_v41  ;;  %v5308_v41 = vld [vmem:[%s9634_s3 + $0x8] sm:$0xf0] }
 0x450   :  { %v5311_v1 = vor.u32 %v6091_v25, %v5308_v41 }
 0x452   :  { %v8172_v46 = vpop.f32.mrf.mxu3  ;;  %2672 = vmatpush.bf16.msra.mxu0 %v5311_v1 }
 0x45a   :  { %v8174_v34 = vpop.f32.mrf.mxu3 }
 0x45f   :  { %5293 = vmatmul.msk.bf16.gmra.mxu3 %vm1939_vm4, %v7962_v11 }
 0x462   :  { %v8194_v24 = vpop.f32.mrf.mxu3 }
 0x46a   :  { %v8199_v49 = vpop.f32.mrf.mxu3 }
 0x46f   :  { %5294 = vmatmul.msk.bf16.gmra.mxu3 %vm1939_vm4, %v7996_v44  ;;  %v5411_v44 = vld [vmem:[%s9634_s3 + $0xa0] sm:$0xf0] }
 0x470   :  { %v5414_v26 = vor.u32 %v6109_v32, %v5411_v44 }
 0x472   :  { %v8205_v11 = vpop.f32.mrf.mxu3  ;;  %2867 = vmatpush.bf16.msrb.mxu3 %v5414_v26  ;;  %v3011_v26 = vunpack.c.l.b16 %v5445_v9 }
 0x47a   :  { %v8209_v36 = vpop.f32.mrf.mxu3 }
 0x47f   :  { %5295 = vmatmul.msk.bf16.gmra.mxu3 %vm1939_vm4, %v8015_v52  ;;  %v5409_v52 = vld [vmem:[%s9634_s3 + $0x98] sm:$0xf] }
 0x480   :  { %v5410_v61 = vor.u32 %v6110_v14, %v5409_v52  ;;  %v3012_v52 = vunpack.c.h.b16 %v5445_v9  ;;  %v5406_v14 = vor.u32 %v6107_v30, %v5403_v31  ;;  %v5377_v30 = vld [vmem:[%s9634_s3 + $0x58] sm:$0xf]  ;;  %v6102_v31 = vld [vmem:[%s9634_s3 + $0x5c] sm:$0xf0] }
 0x482   :  { %v8213_v56 = vpop.f32.mrf.mxu3  ;;  %2808 = vmatpush.bf16.msrb.mxu1 %v5410_v61  ;;  %v8270_v61 = vpop.f32.mrf.mxu1  ;;  %2868 = vmatpush.bf16.msrb.mxu3 %v5406_v14  ;;  %v9852_v14 = vld [vmem:[#allocation5_spill] sm:$0xff] }
 0x48a   :  { %v8223_v8 = vpop.f32.mrf.mxu3 }
 0x48f   :  { %5296 = vmatmul.msk.bf16.gmra.mxu3 %vm1939_vm4, %v8029_v55  ;;  %v6108_v55 = vld [vmem:[%s9634_s3 + $0x8c] sm:$0xf0] }
 0x490   :  { %v5402_v45 = vor.u32 %v6108_v55, %v5401_v48  ;;  %v3023_v48 = vpack.c.b16 %v3011_v26, %v3011_v26  ;;  %v3024_v55 = vpack.c.b16 %v3012_v52, %v3012_v52  ;;  %v8288_v26 = vpop.f32.mrf.mxu1 }
 0x492   :  { %v8235_v25 = vpop.f32.mrf.mxu3  ;;  %2809 = vmatpush.bf16.msrb.mxu1 %v5402_v45  ;;  %v5385_v45 = vld [vmem:[%s9634_s3 + $0x68] sm:$0xf]  ;;  %v3042_v9 = vsel %vm2599_vm3, %v3024_v55, 0 }
 0x493   :  { %3105 = vmatpush.bf16.msrb.mxu0 %v3042_v9 }
 0x49a   :  { %v8239_v41 = vpop.f32.mrf.mxu3 }
 0x49f   :  { %5297 = vmatmul.msk.bf16.gmra.mxu3 %vm1939_vm4, %v8041_v23  ;;  %v6106_v23 = vld [vmem:[%s9634_s3 + $0x7c] sm:$0xf0] }
 0x4a0   :  { %v5394_v32 = vor.u32 %v6106_v23, %v5393_v37  ;;  %v5386_v37 = vor.u32 %v6104_v51, %v5385_v45  ;;  %v3039_v23 = vsel %vm2599_vm3, %v3023_v48, 0  ;;  %v9853_v45 = vld [vmem:[#allocation17_spill] sm:$0xff] }
 0x4a1   :  { %3046 = vmatpush.bf16.msrb.mxu2 %v3039_v23 }
 0x4a2   :  { %v8245_v1 = vpop.f32.mrf.mxu3  ;;  %2810 = vmatpush.bf16.msrb.mxu1 %v5394_v32  ;;  %v5378_v32 = vor.u32 %v6102_v31, %v5377_v30 }
 0x4a3   :  { %9850 = vst [vmem:[#allocation44_spill] sm:$0xff] %v8245_v1  ;;  %v8296_v1 = vpop.f32.mrf.mxu1 }
 0x4a6   :  { %2811 = vmatpush.bf16.msrb.mxu1 %v5386_v37  ;;  %v2077_v37 = vadd.f32 %v8079_v33, %v9853_v45  ;;  %v6119_v33 = vld [vmem:[%s9634_s3 + $0xf4] sm:$0xf] }
 0x4aa   :  { %v8268_v44 = vpop.f32.mrf.mxu3  ;;  %2812 = vmatpush.bf16.msrb.mxu1 %v5378_v32 }
 0x4ab   :  { %9851 = vst [vmem:[#allocation16_spill] sm:$0xff] %v8268_v44 }
 0x4af   :  { %5298 = vmatmul.msk.bf16.gmra.mxu3 %vm1939_vm4, %v8070_v27  ;;  %v2075_v27 = vadd.f32 %v8074_v15, %v9852_v14 }
 0x4b2   :  { %v2320_v51 = vpop.f32.mrf.mxu3 }
 0x4b3   :  { %v2321_v52 = vadd.f32 %v2320_v51, %v7954_v60  ;;  %v5480_v51 = vld [vmem:[%s9634_s3 + $0xf0] sm:$0xf] }
 0x4b5   :  { %v2390_v48 = vmax.f32 %v2075_v27, %v2321_v52  ;;  %v9854_v27 = vld [vmem:[#allocation38_spill] sm:$0xff] }
 0x4b7   :  { %v2418_v9 = vpack.c.bf16 %v2390_v48, %v2390_v48  ;;  %v2080_v48 = vadd.f32 %v8088_v7, %v9854_v27  ;;  %v9857_v27 = vld [vmem:[#allocation7_spill] sm:$0xff] }
 0x4b9   :  { %v2483_v31 = vunpack.c.l.b16 %v2418_v9 }
 0x4ba   :  { %v2322_v55 = vpop.f32.mrf.mxu3 }
 0x4bb   :  { %v2323_v23 = vadd.f32 %v2322_v55, %v7981_v59  ;;  %v6120_v59 = vld [vmem:[%s9634_s3 + $0xf4] sm:$0xf0]  ;;  %v8317_v55 = vpop.f32.mrf.mxu1 }
 0x4bd   :  { %v2391_v44 = vmax.f32 %v2077_v37, %v2323_v23  ;;  %v9855_v23 = vld [vmem:[#allocation2_spill] sm:$0xff] }
 0x4be   :  { %v2082_v9 = vadd.f32 %v8093_v6, %v9855_v23 }
 0x4bf   :  { %v2419_v30 = vpack.c.bf16 %v2391_v44, %v2391_v44  ;;  %5299 = vmatmul.msk.bf16.gmra.mxu3 %vm1939_vm4, %v8084_v18  ;;  %v5481_v44 = vor.u32 %v6120_v59, %v5480_v51  ;;  %v5482_v18 = vld [vmem:[%s9634_s3 + $0xf8] sm:$0xf0] }
 0x4c0   :  { %v5485_v14 = vor.u32 %v6119_v33, %v5482_v18  ;;  %v6105_v33 = vld [vmem:[%s9634_s3 + $0x7c] sm:$0xf] }
 0x4c1   :  { %v2484_v60 = vunpack.c.l.b16 %v2419_v30  ;;  %3047 = vmatpush.bf16.msrb.mxu2 %v5481_v44 }
 0x4c2   :  { %v2325_v32 = vpop.f32.mrf.mxu3  ;;  %3106 = vmatpush.bf16.msrb.mxu0 %v5485_v14 }
 0x4c3   :  { %v2503_v15 = vpack.c.b16 %v2484_v60, %v2483_v31  ;;  %v2326_v52 = vadd.f32 %v2325_v32, %v7991_v42  ;;  %v8324_v7 = vpop.f32.mrf.mxu1 }
 0x4c5   :  { %5344 = vmatmul.msk.bf16.vlgmr.msra.gmra.mxu2 %vm2568_vm5, %v2503_v15  ;;  %5354 = vmatmul.msk.bf16.vlgmr.msra.gmra.mxu0 %vm2568_vm5, %v2503_v15  ;;  %v2392_v45 = vmax.f32 %v2080_v48, %v2326_v52  ;;  %v2087_v48 = vadd.f32 %v8107_v17, %v9857_v27  ;;  %v6118_v17 = vld [vmem:[%s9634_s3 + $0xe4] sm:$0xf0]  ;;  %v5379_v27 = vld [vmem:[%s9634_s3 + $0x60] sm:$0xf0] }
 0x4c7   :  { %v2420_v42 = vpack.c.bf16 %v2392_v45, %v2392_v45 }
 0x4c9   :  { %v2485_v32 = vunpack.c.l.b16 %v2420_v42 }
 0x4ca   :  { %v2327_v37 = vpop.f32.mrf.mxu3 }
 0x4cb   :  { %v2328_v30 = vadd.f32 %v2327_v37, %v8005_v20  ;;  %v5395_v20 = vld [vmem:[%s9634_s3 + $0x80] sm:$0xf0]  ;;  %v8346_v45 = vpop.f32.mrf.mxu1 }
 0x4cc   :  { %v5398_v6 = vor.u32 %v6105_v33, %v5395_v20  ;;  %v6103_v33 = vld [vmem:[%s9634_s3 + $0x6c] sm:$0xf]  ;;  %v5387_v20 = vld [vmem:[%s9634_s3 + $0x70] sm:$0xf0] }
 0x4cd   :  { %v2393_v31 = vmax.f32 %v2082_v9, %v2328_v30 }
 0x4ce   :  { %2869 = vmatpush.bf16.msrb.mxu3 %v5398_v6  ;;  %v9858_v6 = vld [vmem:[#allocation20_spill] sm:$0xff] }
 0x4cf   :  { %v2421_v60 = vpack.c.bf16 %v2393_v31, %v2393_v31  ;;  %5300 = vmatmul.msk.bf16.gmra.mxu3 %vm1939_vm4, %v8098_v2  ;;  %v9856_v2 = vld [vmem:[#allocation41_spill] sm:$0xff] }
 0x4d0   :  { %v2085_v18 = vadd.f32 %v8102_v50, %v9856_v2  ;;  %v5472_v50 = vld [vmem:[%s9634_s3 + $0xe0] sm:$0xf]  ;;  %v5390_v2 = vor.u32 %v6103_v33, %v5387_v20  ;;  %v5466_v20 = vld [vmem:[%s9634_s3 + $0xd8] sm:$0xf0] }
 0x4d1   :  { %v2486_v15 = vunpack.c.l.b16 %v2421_v60 }
 0x4d2   :  { %v2330_v51 = vpop.f32.mrf.mxu3  ;;  %2870 = vmatpush.bf16.msrb.mxu3 %v5390_v2 }
 0x4d3   :  { %v8326_v59 = vpack.c.b16 %v2486_v15, %v2485_v32  ;;  %v2331_v44 = vadd.f32 %v2330_v51, %v8196_v35  ;;  %v5473_v32 = vor.u32 %v6118_v17, %v5472_v50 }
 0x4d5   :  { %5345 = vmatmul.msk.bf16.gmra.mxu2 %vm2568_vm5, %v8326_v59  ;;  %5355 = vmatmul.msk.bf16.gmra.mxu0 %vm2568_vm5, %v8326_v59  ;;  %v2394_v52 = vmax.f32 %v2085_v18, %v2331_v44  ;;  %v2090_v44 = vadd.f32 %v8116_v47, %v9858_v6  ;;  %v9861_v6 = vld [vmem:[#allocation9_spill] sm:$0xff] }
 0x4d6   :  { %5415 = vmatmul.msk.bf16.vlgmr.msrb.gmra.mxu1 %vm2568_vm5, %v8326_v59  ;;  %3048 = vmatpush.bf16.msrb.mxu2 %v5473_v32 }
 0x4d7   :  { %v2422_v37 = vpack.c.bf16 %v2394_v52, %v2394_v52 }
 0x4d9   :  { %v2487_v30 = vunpack.c.l.b16 %v2422_v37 }
 0x4da   :  { %v2332_v14 = vpop.f32.mrf.mxu3 }
 0x4db   :  { %v2333_v35 = vadd.f32 %v2332_v14, %v8201_v54  ;;  %v6117_v54 = vld [vmem:[%s9634_s3 + $0xe4] sm:$0xf]  ;;  %v6101_v14 = vld [vmem:[%s9634_s3 + $0x5c] sm:$0xf] }
 0x4dd   :  { %v2395_v23 = vmax.f32 %v2087_v48, %v2333_v35  ;;  %v9859_v48 = vld [vmem:[#allocation43_spill] sm:$0xff] }
 0x4de   :  { %v2092_v35 = vadd.f32 %v8121_v4, %v9859_v48  ;;  %v9860_v4 = vld [vmem:[#allocation3_spill] sm:$0xff] }
 0x4df   :  { %v2423_v9 = vpack.c.bf16 %v2395_v23, %v2395_v23  ;;  %5301 = vmatmul.msk.bf16.gmra.mxu3 %vm1939_vm4, %v8112_v57  ;;  %v5474_v57 = vld [vmem:[%s9634_s3 + $0xe8] sm:$0xf0]  ;;  %v5382_v23 = vor.u32 %v6101_v14, %v5379_v27 }
 0x4e0   :  { %v5477_v51 = vor.u32 %v6117_v54, %v5474_v57  ;;  %v5464_v57 = vld [vmem:[%s9634_s3 + $0xd0] sm:$0xf] }
 0x4e1   :  { %v2488_v42 = vunpack.c.l.b16 %v2423_v9  ;;  %2871 = vmatpush.bf16.msrb.mxu3 %v5382_v23 }
 0x4e2   :  { %v2335_v31 = vpop.f32.mrf.mxu3  ;;  %3107 = vmatpush.bf16.msrb.mxu0 %v5477_v51 }
 0x4e3   :  { %v8350_v60 = vpack.c.b16 %v2488_v42, %v2487_v30  ;;  %v2336_v15 = vadd.f32 %v2335_v31, %v8207_v16  ;;  %v8377_v16 = vpop.f32.mrf.mxu1 }
 0x4e5   :  { %5346 = vmatmul.msk.bf16.gmra.mxu2 %vm2568_vm5, %v8350_v60  ;;  %5356 = vmatmul.msk.bf16.gmra.mxu0 %vm2568_vm5, %v8350_v60  ;;  %v2396_v18 = vmax.f32 %v2090_v44, %v2336_v15  ;;  %v6115_v15 = vld [vmem:[%s9634_s3 + $0xd4] sm:$0xf]  ;;  %v2097_v44 = vadd.f32 %v8147_v62, %v9861_v6  ;;  %v9864_v6 = vld [vmem:[#allocation11_spill] sm:$0xff] }
 0x4e6   :  { %5416 = vmatmul.msk.bf16.gmra.mxu1 %vm2568_vm5, %v8350_v60 }
 0x4e7   :  { %v2424_v47 = vpack.c.bf16 %v2396_v18, %v2396_v18  ;;  %v5469_v18 = vor.u32 %v6115_v15, %v5466_v20 }
 0x4e9   :  { %v2489_v31 = vunpack.c.l.b16 %v2424_v47  ;;  %3108 = vmatpush.bf16.msrb.mxu0 %v5469_v18 }
 0x4ea   :  { %v2337_v52 = vpop.f32.mrf.mxu3 }
 0x4eb   :  { %v2338_v37 = vadd.f32 %v2337_v52, %v8215_v40  ;;  %v8392_v42 = vpop.f32.mrf.mxu1 }
 0x4ed   :  { %v2397_v9 = vmax.f32 %v2092_v35, %v2338_v37 }
 0x4ef   :  { %v2425_v30 = vpack.c.bf16 %v2397_v9, %v2397_v9  ;;  %5302 = vmatmul.msk.bf16.gmra.mxu3 %vm1939_vm4, %v8126_v53  ;;  %v2095_v53 = vadd.f32 %v8142_v10, %v9860_v4 }
 0x4f1   :  { %v2490_v50 = vunpack.c.l.b16 %v2425_v30 }
 0x4f2   :  { %v2340_v17 = vpop.f32.mrf.mxu3 }
 0x4f3   :  { %v8394_v54 = vpack.c.b16 %v2490_v50, %v2489_v31  ;;  %v2341_v32 = vadd.f32 %v2340_v17, %v8231_v21  ;;  %v6116_v21 = vld [vmem:[%s9634_s3 + $0xd4] sm:$0xf0]  ;;  %v8417_v10 = vpop.f32.mrf.mxu1  ;;  %v9863_v31 = vld [vmem:[#allocation4_spill] sm:$0xff] }
 0x4f4   :  { %v5465_v33 = vor.u32 %v6116_v21, %v5464_v57  ;;  %v2102_v50 = vadd.f32 %v8156_v58, %v9863_v31  ;;  %v6114_v58 = vld [vmem:[%s9634_s3 + $0xc4] sm:$0xf0] }
 0x4f5   :  { %5347 = vmatmul.msk.bf16.gmra.mxu2 %vm2568_vm5, %v8394_v54  ;;  %5357 = vmatmul.msk.bf16.gmra.mxu0 %vm2568_vm5, %v8394_v54  ;;  %v2398_v40 = vmax.f32 %v2095_v53, %v2341_v32 }
 0x4f6   :  { %5417 = vmatmul.msk.bf16.gmra.mxu1 %vm2568_vm5, %v8394_v54  ;;  %3049 = vmatpush.bf16.msrb.mxu2 %v5465_v33 }
 0x4f7   :  { %v2426_v52 = vpack.c.bf16 %v2398_v40, %v2398_v40 }
 0x4f9   :  { %v2491_v48 = vunpack.c.l.b16 %v2426_v52 }
 0x4fa   :  { %v2342_v51 = vpop.f32.mrf.mxu3 }
 0x4fb   :  { %v2343_v2 = vadd.f32 %v2342_v51, %v8237_v19  ;;  %v8426_v47 = vpop.f32.mrf.mxu1  ;;  %v9862_v19 = vld [vmem:[#allocation23_spill] sm:$0xff] }
 0x4fd   :  { %v2399_v14 = vmax.f32 %v2097_v44, %v2343_v2  ;;  %v2105_v44 = vadd.f32 %v8160_v28, %v9864_v6 }
 0x4ff   :  { %v2427_v27 = vpack.c.bf16 %v2399_v14, %v2399_v14  ;;  %5303 = vmatmul.msk.bf16.gmra.mxu3 %vm1939_vm4, %v8150_v39  ;;  %v2100_v39 = vadd.f32 %v8154_v0, %v9862_v19  ;;  %v5456_v0 = vld [vmem:[%s9634_s3 + $0xc0] sm:$0xf] }
 0x500   :  { %v5457_v51 = vor.u32 %v6114_v58, %v5456_v0 }
 0x501   :  { %v2492_v35 = vunpack.c.l.b16 %v2427_v27 }
 0x502   :  { %v2345_v37 = vpop.f32.mrf.mxu3  ;;  %3050 = vmatpush.bf16.msrb.mxu2 %v5457_v51 }
 0x503   :  { %v8424_v23 = vpack.c.b16 %v2492_v35, %v2491_v48  ;;  %v2346_v62 = vadd.f32 %v2345_v37, %v8243_v38  ;;  %v8440_v4 = vpop.f32.mrf.mxu1 }
 0x505   :  { %5348 = vmatmul.msk.bf16.gmra.mxu2 %vm2568_vm5, %v8424_v23  ;;  %5358 = vmatmul.msk.bf16.gmra.mxu0 %vm2568_vm5, %v8424_v23  ;;  %v2400_v9 = vmax.f32 %v2100_v39, %v2346_v62 }
 0x506   :  { %5418 = vmatmul.msk.bf16.gmra.mxu1 %vm2568_vm5, %v8424_v23 }
 0x507   :  { %v2428_v38 = vpack.c.bf16 %v2400_v9, %v2400_v9 }
 0x509   :  { %v2493_v40 = vunpack.c.l.b16 %v2428_v38 }
 0x50a   :  { %v2347_v30 = vpop.f32.mrf.mxu3 }
 0x50b   :  { %v2348_v17 = vadd.f32 %v2347_v30, %v8270_v61  ;;  %v6113_v61 = vld [vmem:[%s9634_s3 + $0xc4] sm:$0xf]  ;;  %v8467_v2 = vpop.f32.mrf.mxu1 }
 0x50d   :  { %v2401_v32 = vmax.f32 %v2102_v50, %v2348_v17  ;;  %v9867_v17 = vld [vmem:[#allocation29_spill] sm:$0xff] }
 0x50e   :  { %v2112_v38 = vadd.f32 %v8168_v5, %v9867_v17  ;;  %v6112_v5 = vld [vmem:[%s9634_s3 + $0xb4] sm:$0xf0] }
 0x50f   :  { %v2429_v53 = vpack.c.bf16 %v2401_v32, %v2401_v32  ;;  %5425 = vmatmul.msk.bf16.vlgmr.msrb.gmra.mxu3 %vm2568_vm5, %v8326_v59  ;;  %v5458_v59 = vld [vmem:[%s9634_s3 + $0xc8] sm:$0xf0] }
 0x510   :  { %v5461_v20 = vor.u32 %v6113_v61, %v5458_v59  ;;  %v5450_v59 = vld [vmem:[%s9634_s3 + $0xb8] sm:$0xf0] }
 0x511   :  { %v2494_v57 = vunpack.c.l.b16 %v2429_v53 }
 0x512   :  { %v2350_v21 = vpop.f32.mrf.mxu3  ;;  %3109 = vmatpush.bf16.msrb.mxu0 %v5461_v20 }
 0x513   :  { %v8444_v15 = vpack.c.b16 %v2494_v57, %v2493_v40  ;;  %v2351_v33 = vadd.f32 %v2350_v21, %v8288_v26  ;;  %v9865_v26 = vld [vmem:[#allocation26_spill] sm:$0xff]  ;;  %v8474_v28 = vpop.f32.mrf.mxu1 }
 0x514   :  { %v2107_v14 = vadd.f32 %v8162_v43, %v9865_v26  ;;  %v9866_v43 = vld [vmem:[#allocation13_spill] sm:$0xff] }
 0x515   :  { %5349 = vmatmul.msk.bf16.gmra.mxu2 %vm2568_vm5, %v8444_v15  ;;  %5359 = vmatmul.msk.bf16.gmra.mxu0 %vm2568_vm5, %v8444_v15  ;;  %v2402_v18 = vmax.f32 %v2105_v44, %v2351_v33  ;;  %v9868_v44 = vld [vmem:[#allocation8_spill] sm:$0xff] }
 0x516   :  { %5419 = vmatmul.msk.bf16.gmra.mxu1 %vm2568_vm5, %v8444_v15 }
 0x517   :  { %v2430_v48 = vpack.c.bf16 %v2402_v18, %v2402_v18  ;;  %v2115_v18 = vadd.f32 %v8172_v46, %v9868_v44  ;;  %v5551_v46 = vld [vmem:[%s9634_s3 + $0x148] sm:$0xf] }
 0x519   :  { %v2495_v62 = vunpack.c.l.b16 %v2430_v48 }
 0x51a   :  { %v2352_v52 = vpop.f32.mrf.mxu3 }
 0x51b   :  { %v2353_v27 = vadd.f32 %v2352_v52, %v8296_v1  ;;  %v2110_v1 = vadd.f32 %v8166_v13, %v9866_v43  ;;  %v5448_v13 = vld [vmem:[%s9634_s3 + $0xb0] sm:$0xf] }
 0x51c   :  { %v5449_v51 = vor.u32 %v6112_v5, %v5448_v13 }
 0x51d   :  { %v2403_v35 = vmax.f32 %v2107_v14, %v2353_v27  ;;  %v9869_v27 = vld [vmem:[#allocation15_spill] sm:$0xff] }
 0x51e   :  { %3051 = vmatpush.bf16.msrb.mxu2 %v5449_v51  ;;  %v2117_v48 = vadd.f32 %v8174_v34, %v9869_v27  ;;  %v6130_v34 = vld [vmem:[%s9634_s3 + $0x14c] sm:$0xf0] }
 0x51f   :  { %v2431_v37 = vpack.c.bf16 %v2403_v35, %v2403_v35  ;;  %5426 = vmatmul.msk.bf16.gmra.mxu3 %vm2568_vm5, %v8350_v60  ;;  %v6126_v51 = vld [vmem:[%s9634_s3 + $0x12c] sm:$0xf0] }
 0x521   :  { %v2496_v19 = vunpack.c.l.b16 %v2431_v37 }
 0x522   :  { %v2355_v39 = vpop.f32.mrf.mxu3 }
 0x523   :  { %v8476_v9 = vpack.c.b16 %v2496_v19, %v2495_v62  ;;  %v2356_v30 = vadd.f32 %v2355_v39, %v8317_v55  ;;  %v8490_v55 = vpop.f32.mrf.mxu1 }
 0x525   :  { %5350 = vmatmul.msk.bf16.gmra.mxu2 %vm2568_vm5, %v8476_v9  ;;  %5360 = vmatmul.msk.bf16.gmra.mxu0 %vm2568_vm5, %v8476_v9  ;;  %v2404_v31 = vmax.f32 %v2110_v1, %v2356_v30 }
 0x526   :  { %5420 = vmatmul.msk.bf16.gmra.mxu1 %vm2568_vm5, %v8476_v9 }
 0x527   :  { %v2432_v53 = vpack.c.bf16 %v2404_v31, %v2404_v31  ;;  %v5552_v31 = vor.u32 %v6130_v34, %v5551_v46 }
 0x529   :  { %v2497_v21 = vunpack.c.l.b16 %v2432_v53  ;;  %v5543_v53 = vld [vmem:[%s9634_s3 + $0x138] sm:$0xf] }
 0x52a   :  { %v2357_v50 = vpop.f32.mrf.mxu3 }
 0x52b   :  { %v2358_v32 = vadd.f32 %v2357_v50, %v8324_v7  ;;  %v6111_v7 = vld [vmem:[%s9634_s3 + $0xb4] sm:$0xf]  ;;  %v8515_v6 = vpop.f32.mrf.mxu1 }
 0x52c   :  { %v5453_v20 = vor.u32 %v6111_v7, %v5450_v59 }
 0x52d   :  { %v2405_v40 = vmax.f32 %v2112_v38, %v2358_v32 }
 0x52e   :  { %3110 = vmatpush.bf16.msrb.mxu0 %v5453_v20 }
 0x52f   :  { %v2433_v57 = vpack.c.bf16 %v2405_v40, %v2405_v40  ;;  %5427 = vmatmul.msk.bf16.gmra.mxu3 %vm2568_vm5, %v8394_v54  ;;  %v6128_v40 = vld [vmem:[%s9634_s3 + $0x13c] sm:$0xf0] }
 0x531   :  { %v2498_v0 = vunpack.c.l.b16 %v2433_v57 }
 0x532   :  { %v2360_v58 = vpop.f32.mrf.mxu3 }
 0x533   :  { %v8494_v61 = vpack.c.b16 %v2498_v0, %v2497_v21  ;;  %v2361_v33 = vadd.f32 %v2360_v58, %v8346_v45  ;;  %v5516_v45 = vld [vmem:[%s9634_s3 + $0x158] sm:$0x33]  ;;  %v8534_v43 = vpop.f32.mrf.mxu1  ;;  %v5544_v0 = vor.u32 %v6128_v40, %v5543_v53  ;;  %v9870_v58 = vld [vmem:[#allocation32_spill] sm:$0xff] }
 0x534   :  { %v3250_v14 = vunpack.c.l.b16 %v5516_v45  ;;  %v3251_v32 = vunpack.c.h.b16 %v5516_v45  ;;  %v2120_v13 = vadd.f32 %v8194_v24, %v9870_v58 }
 0x535   :  { %5351 = vmatmul.msk.bf16.gmra.mxu2 %vm2568_vm5, %v8494_v61  ;;  %5361 = vmatmul.msk.bf16.gmra.mxu0 %vm2568_vm5, %v8494_v61  ;;  %v2406_v52 = vmax.f32 %v2115_v18, %v2361_v33  ;;  %v5587_v33 = vld [vmem:[%s9634_s3 + $0x1b0] sm:$0x33] }
 0x536   :  { %5421 = vmatmul.msk.bf16.gmra.mxu1 %vm2568_vm5, %v8494_v61  ;;  %v3262_v37 = vpack.c.b16 %v3250_v14, %v3250_v14  ;;  %v3263_v21 = vpack.c.b16 %v3251_v32, %v3251_v32  ;;  %v3489_v18 = vunpack.c.l.b16 %v5587_v33 }
 0x537   :  { %v2434_v62 = vpack.c.bf16 %v2406_v52, %v2406_v52  ;;  %v3490_v52 = vunpack.c.h.b16 %v5587_v33 }
 0x538   :  { %v3278_v39 = vsel %vm2599_vm3, %v3262_v37, 0  ;;  %v3281_v5 = vsel %vm2599_vm3, %v3263_v21, 0  ;;  %v5527_v37 = vld [vmem:[%s9634_s3 + $0x118] sm:$0xf] }
 0x539   :  { %3285 = vmatpush.bf16.msra.mxu1 %v3278_v39  ;;  %3344 = vmatpush.bf16.msra.mxu3 %v3281_v5  ;;  %v8581_v39 = vld [vmem:[%s9635_s4] sm:$0x3] }
 0x53a   :  { %v2362_v26 = vpop.f32.mrf.mxu3 }
 0x53b   :  { %v2363_v35 = vadd.f32 %v2362_v26, %v8377_v16  ;;  %v2499_v16 = vunpack.c.l.b16 %v2434_v62  ;;  %v8567_v45 = vpop.f32.mrf.mxu1  ;;  %v9871_v26 = vld [vmem:[#allocation18_spill] sm:$0xff] }
 0x53c   :  { %v2122_v14 = vadd.f32 %v8199_v49, %v9871_v26  ;;  %v6124_v62 = vld [vmem:[%s9634_s3 + $0x11c] sm:$0xf0] }
 0x53d   :  { %v2407_v19 = vmax.f32 %v2117_v48, %v2363_v35  ;;  %3286 = vmatpush.bf16.msra.mxu1 %v5552_v31  ;;  %v3501_v48 = vpack.c.b16 %v3489_v18, %v3489_v18  ;;  %v3502_v35 = vpack.c.b16 %v3490_v52, %v3490_v52  ;;  %v5519_v31 = vld [vmem:[%s9634_s3 + $0x108] sm:$0xf] }
 0x53f   :  { %v2435_v30 = vpack.c.bf16 %v2407_v19, %v2407_v19  ;;  %5428 = vmatmul.msk.bf16.gmra.mxu3 %vm2568_vm5, %v8424_v23  ;;  %v3517_v46 = vsel %vm2599_vm3, %v3501_v48, 0  ;;  %v3520_v34 = vsel %vm2599_vm3, %v3502_v35, 0 }
 0x540   :  { %3524 = vmatpush.bf16.msra.mxu2 %v3517_v46  ;;  %3583 = vmatpush.bf16.msra.mxu0 %v3520_v34 }
 0x541   :  { %v2500_v1 = vunpack.c.l.b16 %v2435_v30  ;;  %3287 = vmatpush.bf16.msra.mxu1 %v5544_v0  ;;  %v5528_v30 = vor.u32 %v6124_v62, %v5527_v37 }
 0x542   :  { %v2365_v50 = vpop.f32.mrf.mxu3  ;;  %v8536_v17 = vpop.f32.mrf.mxu0 }
 0x543   :  { %v8538_v38 = vpack.c.b16 %v2500_v1, %v2499_v16  ;;  %v2366_v57 = vadd.f32 %v2365_v50, %v8392_v42  ;;  %v5535_v42 = vld [vmem:[%s9634_s3 + $0x128] sm:$0xf]  ;;  %v6122_v50 = vld [vmem:[%s9634_s3 + $0x10c] sm:$0xf0] }
 0x544   :  { %v5536_v20 = vor.u32 %v6126_v51, %v5535_v42  ;;  %v5520_v40 = vor.u32 %v6122_v50, %v5519_v31 }
 0x545   :  { %5352 = vmatmul.msk.bf16.gmra.mxu2 %vm2568_vm5, %v8538_v38  ;;  %5362 = vmatmul.msk.bf16.gmra.mxu0 %vm2568_vm5, %v8538_v38  ;;  %v2408_v59 = vmax.f32 %v2120_v13, %v2366_v57 }
 0x546   :  { %5422 = vmatmul.msk.bf16.gmra.mxu1 %vm2568_vm5, %v8538_v38 }
 0x547   :  { %3288 = vmatpush.bf16.msra.mxu1 %v5536_v20  ;;  %v2436_v19 = vpack.c.bf16 %v2408_v59, %v2408_v59  ;;  %v6129_v20 = vld [vmem:[%s9634_s3 + $0x14c] sm:$0xf] }
 0x548   :  { %v2615_v7 = vpop.f32.mrf.mxu2 }
 0x549   :  { %v2501_v32 = vunpack.c.l.b16 %v2436_v19 }
 0x54a   :  { %v2367_v24 = vpop.f32.mrf.mxu3  ;;  %v8565_v44 = vpop.f32.mrf.mxu0 }
 0x54b   :  { %v2368_v27 = vadd.f32 %v2367_v24, %v8417_v10  ;;  %v8584_v10 = vperm.slane %v8581_v39, 0  ;;  %3289 = vmatpush.bf16.msra.mxu1 %v5528_v30 }
 0x54d   :  { %v2409_v49 = vmax.f32 %v2122_v14, %v2368_v27  ;;  %9872 = vst [vmem:[#allocation27_spill] sm:$0xff] %v8584_v10  ;;  %v2616_v57 = vadd.f32 %v2615_v7, %v8584_v10  ;;  %v9873_v7 = vld [vmem:[#allocation12_spill] sm:$0xff]  ;;  %v9874_v14 = vld [vmem:[#allocation39_spill] sm:$0xff] }
 0x54e   :  { %v2125_v51 = vadd.f32 %v8205_v11, %v9873_v7  ;;  %v2127_v27 = vadd.f32 %v8209_v36, %v9874_v14  ;;  %v2130_v36 = vadd.f32 %v8213_v56, %v7880_v22  ;;  %v5624_v56 = vld [vmem:[%s9634_s3 + $0x1a8] sm:$0xf0] }
 0x54f   :  { %v2437_v16 = vpack.c.bf16 %v2409_v49, %v2409_v49  ;;  %5429 = vmatmul.msk.bf16.gmra.mxu3 %vm2568_vm5, %v8444_v15  ;;  %3290 = vmatpush.bf16.msra.mxu1 %v5520_v40  ;;  %v6139_v40 = vld [vmem:[%s9634_s3 + $0x1a4] sm:$0xf] }
 0x550   :  { %v2617_v1 = vpop.f32.mrf.mxu2 }
 0x551   :  { %v2502_v53 = vunpack.c.l.b16 %v2437_v16  ;;  %v2618_v24 = vadd.f32 %v2617_v1, %v8584_v10 }
 0x552   :  { %v2370_v21 = vpop.f32.mrf.mxu3  ;;  %v8597_v0 = vpop.f32.mrf.mxu0 }
 0x553   :  { %v8599_v58 = vpack.c.b16 %v2502_v53, %v2501_v32  ;;  %v2814_v13 = vpop.f32.mrf.mxu1  ;;  %v2371_v42 = vadd.f32 %v2370_v21, %v8426_v47  ;;  %v5553_v47 = vld [vmem:[%s9634_s3 + $0x150] sm:$0xf0]  ;;  %v5622_v32 = vld [vmem:[%s9634_s3 + $0x1a0] sm:$0xf]  ;;  %v6140_v53 = vld [vmem:[%s9634_s3 + $0x1a4] sm:$0xf0]  ;;  %v5627_v21 = vor.u32 %v6139_v40, %v5624_v56 }
 0x554   :  { %v8601_v5 = vadd.f32 %v2814_v13, %v2616_v57  ;;  %v5556_v26 = vor.u32 %v6129_v20, %v5553_v47  ;;  %v5623_v22 = vor.u32 %v6140_v53, %v5622_v32  ;;  %v5614_v53 = vld [vmem:[%s9634_s3 + $0x190] sm:$0xf]  ;;  %v6138_v40 = vld [vmem:[%s9634_s3 + $0x194] sm:$0xf0] }
 0x555   :  { %5353 = vmatmul.msk.bf16.gmra.mxu2 %vm2568_vm5, %v8599_v58  ;;  %5363 = vmatmul.msk.bf16.gmra.mxu0 %vm2568_vm5, %v8599_v58  ;;  %v2410_v33 = vmax.f32 %v2125_v51, %v2371_v42 }
 0x556   :  { %5423 = vmatmul.msk.bf16.gmra.mxu1 %vm2568_vm5, %v8599_v58  ;;  %3345 = vmatpush.bf16.msra.mxu3 %v5556_v26 }
 0x557   :  { %v2438_v37 = vpack.c.bf16 %v2410_v33, %v2410_v33  ;;  %3525 = vmatpush.bf16.msra.mxu2 %v5623_v22  ;;  %3584 = vmatpush.bf16.msra.mxu0 %v5627_v21  ;;  %v6137_v22 = vld [vmem:[%s9634_s3 + $0x194] sm:$0xf] }
 0x558   :  { %v2620_v59 = vpop.f32.mrf.mxu2 }
 0x559   :  { %v2738_v30 = vunpack.c.l.b16 %v2438_v37  ;;  %v2621_v34 = vadd.f32 %v2620_v59, %v8584_v10  ;;  %v2132_v59 = vadd.f32 %v8223_v8, %v7889_v12  ;;  %v2135_v12 = vadd.f32 %v8235_v25, %v7902_v3 }
 0x55a   :  { %v2372_v18 = vpop.f32.mrf.mxu3  ;;  %v8619_v52 = vpop.f32.mrf.mxu0 }
 0x55b   :  { %v2373_v11 = vadd.f32 %v2372_v18, %v8440_v4  ;;  %v2816_v48 = vpop.f32.mrf.mxu1 }
 0x55c   :  { %v8624_v35 = vadd.f32 %v2816_v48, %v2618_v24 }
 0x55d   :  { %v2411_v62 = vmax.f32 %v2127_v27, %v2373_v11 }
 0x55f   :  { %v2439_v19 = vpack.c.bf16 %v2411_v62, %v2411_v62  ;;  %5430 = vmatmul.msk.bf16.gmra.mxu3 %vm2568_vm5, %v8476_v9 }
 0x560   :  { %v2622_v49 = vpop.f32.mrf.mxu2 }
 0x561   :  { %v2739_v46 = vunpack.c.l.b16 %v2439_v19  ;;  %v2623_v42 = vadd.f32 %v2622_v49, %v8584_v10  ;;  %v6127_v49 = vld [vmem:[%s9634_s3 + $0x13c] sm:$0xf] }
 0x562   :  { %v2375_v16 = vpop.f32.mrf.mxu3  ;;  %v8629_v1 = vpop.f32.mrf.mxu0 }
 0x563   :  { %v8633_v4 = vpack.c.b16 %v2739_v46, %v2738_v30  ;;  %v2376_v31 = vadd.f32 %v2375_v16, %v8467_v2  ;;  %v2819_v50 = vpop.f32.mrf.mxu1  ;;  %v5545_v30 = vld [vmem:[%s9634_s3 + $0x140] sm:$0xf0] }
 0x564   :  { %v8645_v57 = vadd.f32 %v2819_v50, %v2621_v34  ;;  %v5548_v3 = vor.u32 %v6127_v49, %v5545_v30 }
 0x565   :  { %v2412_v2 = vmax.f32 %v2130_v36, %v2376_v31  ;;  %5486 = vmatmul.msk.bf16.vlgmr.msrb.gmra.mxu2 %vm2568_vm5, %v8350_v60  ;;  %5496 = vmatmul.msk.bf16.vlgmr.msrb.gmra.mxu0 %vm2568_vm5, %v8350_v60  ;;  %v2137_v36 = vadd.f32 %v8239_v41, %v7914_v63  ;;  %v5615_v63 = vor.u32 %v6138_v40, %v5614_v53  ;;  %v5616_v41 = vld [vmem:[%s9634_s3 + $0x198] sm:$0xf0] }
 0x566   :  { %5424 = vmatmul.msk.bf16.gmra.mxu1 %vm2568_vm5, %v8633_v4  ;;  %3346 = vmatpush.bf16.msra.mxu3 %v5548_v3 }
 0x567   :  { %v2440_v60 = vpack.c.bf16 %v2412_v2, %v2412_v2  ;;  %3526 = vmatpush.bf16.msra.mxu2 %v5615_v63 }
 0x568   :  { %v2625_v13 = vpop.f32.mrf.mxu2 }
 0x569   :  { %v2977_v14 = vunpack.c.l.b16 %v2440_v60  ;;  %v2626_v11 = vadd.f32 %v2625_v13, %v8584_v10  ;;  %v6125_v60 = vld [vmem:[%s9634_s3 + $0x12c] sm:$0xf] }
 0x56a   :  { %v2377_v7 = vpop.f32.mrf.mxu3  ;;  %v8657_v51 = vpop.f32.mrf.mxu0 }
 0x56b   :  { %v2378_v33 = vadd.f32 %v2377_v7, %v8474_v28  ;;  %v2821_v20 = vpop.f32.mrf.mxu1 }
 0x56c   :  { %v8662_v47 = vadd.f32 %v2821_v20, %v2623_v42 }
 0x56d   :  { %v2413_v24 = vmax.f32 %v2132_v59, %v2378_v33 }
 0x56f   :  { %v2441_v18 = vpack.c.bf16 %v2413_v24, %v2413_v24  ;;  %5431 = vmatmul.msk.bf16.gmra.mxu3 %vm2568_vm5, %v8494_v61  ;;  %v5537_v24 = vld [vmem:[%s9634_s3 + $0x130] sm:$0xf0] }
 0x570   :  { %v2627_v26 = vpop.f32.mrf.mxu2 }
 0x571   :  { %v2978_v27 = vunpack.c.l.b16 %v2441_v18  ;;  %v9875_v18 = vld [vmem:[#allocation44_spill] sm:$0xff] }
 0x572   :  { %v2380_v48 = vpop.f32.mrf.mxu3  ;;  %v8667_v37 = vpop.f32.mrf.mxu0 }
 0x573   :  { %v8671_v8 = vpack.c.b16 %v2978_v27, %v2977_v14  ;;  %v2381_v28 = vadd.f32 %v2380_v48, %v8490_v55  ;;  %v2824_v62 = vpop.f32.mrf.mxu1  ;;  %v2628_v55 = vadd.f32 %v2627_v26, %v8584_v10  ;;  %v2140_v26 = vadd.f32 %v9875_v18, %v7926_v29  ;;  %v6123_v29 = vld [vmem:[%s9634_s3 + $0x11c] sm:$0xf]  ;;  %v6136_v18 = vld [vmem:[%s9634_s3 + $0x184] sm:$0xf0] }
 0x574   :  { %v8674_v19 = vadd.f32 %v2824_v62, %v2626_v11  ;;  %v5540_v48 = vor.u32 %v6125_v60, %v5537_v24 }
 0x575   :  { %v2414_v46 = vmax.f32 %v2135_v12, %v2381_v28  ;;  %5487 = vmatmul.msk.bf16.gmra.mxu2 %vm2568_vm5, %v8394_v54  ;;  %5497 = vmatmul.msk.bf16.gmra.mxu0 %vm2568_vm5, %v8394_v54 }
 0x576   :  { %5557 = vmatmul.msk.bf16.vlgmr.msra.gmra.mxu1 %vm2568_vm5, %v8394_v54  ;;  %3347 = vmatpush.bf16.msra.mxu3 %v5540_v48 }
 0x577   :  { %v2442_v56 = vpack.c.bf16 %v2414_v46, %v2414_v46 }
 0x578   :  { %v2630_v25 = vpop.f32.mrf.mxu2 }
 0x579   :  { %v3216_v42 = vunpack.c.l.b16 %v2442_v56  ;;  %v2631_v59 = vadd.f32 %v2630_v25, %v8584_v10  ;;  %v6121_v25 = vld [vmem:[%s9634_s3 + $0x10c] sm:$0xf]  ;;  %v8753_v56 = vperm.slane %v8581_v39, 1 }
 0x57a   :  { %v2382_v34 = vpop.f32.mrf.mxu3  ;;  %v8689_v16 = vpop.f32.mrf.mxu0 }
 0x57b   :  { %v2383_v31 = vadd.f32 %v2382_v34, %v8515_v6  ;;  %v2826_v50 = vpop.f32.mrf.mxu1  ;;  %v5619_v6 = vor.u32 %v6137_v22, %v5616_v41  ;;  %v9876_v34 = vld [vmem:[#allocation24_spill] sm:$0xff]  ;;  %9878 = vst [vmem:[#allocation47_spill] sm:$0xff] %v8753_v56 }
 0x57c   :  { %v8694_v32 = vadd.f32 %v2826_v50, %v2628_v55  ;;  %v5521_v55 = vld [vmem:[%s9634_s3 + $0x110] sm:$0xf0] }
 0x57d   :  { %v2415_v2 = vmax.f32 %v2137_v36, %v2383_v31  ;;  %3585 = vmatpush.bf16.msra.mxu0 %v5619_v6  ;;  %v9877_v36 = vld [vmem:[#allocation16_spill] sm:$0xff]  ;;  %v5524_v40 = vor.u32 %v6121_v25, %v5521_v55 }
 0x57e   :  { %v2142_v31 = vadd.f32 %v9877_v36, %v9876_v34  ;;  %v2680_v34 = vadd.f32 %v8597_v0, %v8753_v56 }
 0x57f   :  { %v2443_v21 = vpack.c.bf16 %v2415_v2, %v2415_v2  ;;  %5432 = vmatmul.msk.bf16.gmra.mxu3 %vm2568_vm5, %v8538_v38 }
 0x580   :  { %v2632_v13 = vpop.f32.mrf.mxu2 }
 0x581   :  { %v3217_v7 = vunpack.c.l.b16 %v2443_v21  ;;  %v2633_v30 = vadd.f32 %v2632_v13, %v8584_v10  ;;  %v2675_v21 = vadd.f32 %v8536_v17, %v8753_v56  ;;  %v5606_v17 = vld [vmem:[%s9634_s3 + $0x180] sm:$0xf] }
 0x582   :  { %v2385_v33 = vpop.f32.mrf.mxu3  ;;  %v8711_v20 = vpop.f32.mrf.mxu0 }
 0x583   :  { %v8721_v14 = vpack.c.b16 %v3217_v7, %v3216_v42  ;;  %v2386_v27 = vadd.f32 %v2385_v33, %v8534_v43  ;;  %v2829_v11 = vpop.f32.mrf.mxu1  ;;  %v5529_v43 = vld [vmem:[%s9634_s3 + $0x120] sm:$0xf0] }
 0x584   :  { %v8724_v12 = vadd.f32 %v2829_v11, %v2631_v59  ;;  %v5532_v62 = vor.u32 %v6123_v29, %v5529_v43  ;;  %v5608_v11 = vld [vmem:[%s9634_s3 + $0x188] sm:$0xf0]  ;;  %v2677_v29 = vadd.f32 %v8565_v44, %v8753_v56 }
 0x585   :  { %v2416_v28 = vmax.f32 %v2140_v26, %v2386_v27  ;;  %5488 = vmatmul.msk.bf16.gmra.mxu2 %vm2568_vm5, %v8424_v23  ;;  %5498 = vmatmul.msk.bf16.gmra.mxu0 %vm2568_vm5, %v8424_v23  ;;  %v6135_v26 = vld [vmem:[%s9634_s3 + $0x184] sm:$0xf]  ;;  %v5607_v27 = vor.u32 %v6136_v18, %v5606_v17  ;;  %v6133_v17 = vld [vmem:[%s9634_s3 + $0x174] sm:$0xf] }
 0x586   :  { %5558 = vmatmul.msk.bf16.gmra.mxu1 %vm2568_vm5, %v8424_v23  ;;  %3348 = vmatpush.bf16.msra.mxu3 %v5532_v62 }
 0x587   :  { %v2444_v2 = vpack.c.bf16 %v2416_v28, %v2416_v28  ;;  %v5611_v28 = vor.u32 %v6135_v26, %v5608_v11  ;;  %3527 = vmatpush.bf16.msra.mxu2 %v5607_v27 }
 0x588   :  { %v2635_v49 = vpop.f32.mrf.mxu2 }
 0x589   :  { %v3455_v13 = vunpack.c.l.b16 %v2444_v2  ;;  %v2636_v42 = vadd.f32 %v2635_v49, %v8584_v10  ;;  %3586 = vmatpush.bf16.msra.mxu0 %v5611_v28  ;;  %v2682_v2 = vadd.f32 %v8619_v52, %v8753_v56  ;;  %v5598_v52 = vld [vmem:[%s9634_s3 + $0x170] sm:$0xf] }
 0x58a   :  { %v2387_v46 = vpop.f32.mrf.mxu3  ;;  %v8739_v3 = vpop.f32.mrf.mxu0  ;;  %3349 = vmatpush.bf16.msra.mxu3 %v5524_v40 }
 0x58b   :  { %v2388_v50 = vadd.f32 %v2387_v46, %v8567_v45  ;;  %v2831_v53 = vpop.f32.mrf.mxu1 }
 0x58c   :  { %v8750_v22 = vadd.f32 %v2831_v53, %v2633_v30 }
 0x58d   :  { %v2417_v63 = vmax.f32 %v2142_v31, %v2388_v50 }
 0x58f   :  { %v2445_v41 = vpack.c.bf16 %v2417_v63, %v2417_v63  ;;  %5433 = vmatmul.msk.bf16.gmra.mxu3 %vm2568_vm5, %v8599_v58 }
 0x590   :  { %v2637_v6 = vpop.f32.mrf.mxu2 }
 0x591   :  { %v3456_v45 = vunpack.c.l.b16 %v2445_v41  ;;  %v2638_v43 = vadd.f32 %v2637_v6, %v8584_v10 }
 0x592   :  { %v8760_v7 = vpop.f32.mrf.mxu0  ;;  %v2873_v59 = vpop.f32.mrf.mxu3 }
 0x593   :  { %v8762_v39 = vpack.c.b16 %v3456_v45, %v3455_v13  ;;  %v2834_v33 = vpop.f32.mrf.mxu1  ;;  %v8764_v60 = vadd.f32 %v2873_v59, %v2675_v21  ;;  %v2685_v59 = vadd.f32 %v8629_v1, %v8753_v56  ;;  %v5600_v1 = vld [vmem:[%s9634_s3 + $0x178] sm:$0xf0] }
 0x594   :  { %v8766_v24 = vadd.f32 %v2834_v33, %v2636_v42  ;;  %v6134_v33 = vld [vmem:[%s9634_s3 + $0x174] sm:$0xf0]  ;;  %v5603_v28 = vor.u32 %v6133_v17, %v5600_v1 }
 0x595   :  { %5489 = vmatmul.msk.bf16.gmra.mxu2 %vm2568_vm5, %v8444_v15  ;;  %5499 = vmatmul.msk.bf16.gmra.mxu0 %vm2568_vm5, %v8444_v15  ;;  %v5599_v27 = vor.u32 %v6134_v33, %v5598_v52  ;;  %v2692_v52 = vadd.f32 %v8689_v16, %v8753_v56  ;;  %v6131_v16 = vld [vmem:[%s9634_s3 + $0x164] sm:$0xf] }
 0x596   :  { %5559 = vmatmul.msk.bf16.gmra.mxu1 %vm2568_vm5, %v8444_v15  ;;  %3587 = vmatpush.bf16.msra.mxu0 %v5603_v28  ;;  %v6132_v28 = vld [vmem:[%s9634_s3 + $0x164] sm:$0xf0] }
 0x597   :  { %3528 = vmatpush.bf16.msra.mxu2 %v5599_v27 }
 0x598   :  { %v2640_v48 = vpop.f32.mrf.mxu2 }
 0x599   :  { %v2641_v44 = vadd.f32 %v2640_v48, %v8584_v10 }
 0x59a   :  { %v8789_v62 = vpop.f32.mrf.mxu0  ;;  %v2875_v49 = vpop.f32.mrf.mxu3 }
 0x59b   :  { %v2836_v30 = vpop.f32.mrf.mxu1  ;;  %v8791_v46 = vadd.f32 %v2875_v49, %v2677_v29  ;;  %v2687_v49 = vadd.f32 %v8657_v51, %v8753_v56 }
 0x59c   :  { %v8793_v25 = vadd.f32 %v2836_v30, %v2638_v43 }
 0x59f   :  { %5434 = vmatmul.msk.bf16.gmra.mxu3 %vm2568_vm5, %v8633_v4 }
 0x5a0   :  { %v2642_v55 = vpop.f32.mrf.mxu2 }
 0x5a1   :  { %v2643_v63 = vadd.f32 %v2642_v55, %v8584_v10 }
 0x5a2   :  { %v8800_v36 = vpop.f32.mrf.mxu0  ;;  %v2878_v31 = vpop.f32.mrf.mxu3 }
 0x5a3   :  { %v2839_v50 = vpop.f32.mrf.mxu1  ;;  %v8802_v53 = vadd.f32 %v2878_v31, %v2680_v34 }
 0x5a4   :  { %v8804_v40 = vadd.f32 %v2839_v50, %v2641_v44 }
 0x5a5   :  { %5490 = vmatmul.msk.bf16.gmra.mxu2 %vm2568_vm5, %v8476_v9  ;;  %5500 = vmatmul.msk.bf16.gmra.mxu0 %vm2568_vm5, %v8476_v9 }
 0x5a6   :  { %5560 = vmatmul.msk.bf16.gmra.mxu1 %vm2568_vm5, %v8476_v9 }
 0x5a8   :  { %v2645_v0 = vpop.f32.mrf.mxu2 }
 0x5a9   :  { %v2646_v18 = vadd.f32 %v2645_v0, %v8584_v10 }
 0x5aa   :  { %v8815_v41 = vpop.f32.mrf.mxu0  ;;  %v2880_v6 = vpop.f32.mrf.mxu3 }
 0x5ab   :  { %v2841_v21 = vpop.f32.mrf.mxu1  ;;  %v8817_v13 = vadd.f32 %v2880_v6, %v2682_v2  ;;  %v2690_v2 = vadd.f32 %v8667_v37, %v8753_v56 }
 0x5ac   :  { %v8819_v45 = vadd.f32 %v2841_v21, %v2643_v63 }
 0x5af   :  { %5567 = vmatmul.msk.bf16.vlgmr.msra.gmra.mxu3 %vm2568_vm5, %v8394_v54 }
 0x5b0   :  { %v2647_v42 = vpop.f32.mrf.mxu2 }
 0x5b1   :  { %v2648_v30 = vadd.f32 %v2647_v42, %v8584_v10 }
 0x5b2   :  { %v8835_v26 = vpop.f32.mrf.mxu0  ;;  %v2883_v54 = vpop.f32.mrf.mxu3 }
 0x5b3   :  { %v2844_v11 = vpop.f32.mrf.mxu1  ;;  %v8840_v48 = vadd.f32 %v2883_v54, %v2685_v59 }
 0x5b4   :  { %v8842_v29 = vadd.f32 %v2844_v11, %v2646_v18  ;;  %v5590_v11 = vld [vmem:[%s9634_s3 + $0x160] sm:$0xf] }
 0x5b5   :  { %5491 = vmatmul.msk.bf16.gmra.mxu2 %vm2568_vm5, %v8494_v61  ;;  %5501 = vmatmul.msk.bf16.gmra.mxu0 %vm2568_vm5, %v8494_v61 }
 0x5b6   :  { %5561 = vmatmul.msk.bf16.gmra.mxu1 %vm2568_vm5, %v8494_v61 }
 0x5b8   :  { %v2650_v43 = vpop.f32.mrf.mxu2 }
 0x5b9   :  { %v2651_v63 = vadd.f32 %v2650_v43, %v8584_v10  ;;  %v5591_v43 = vor.u32 %v6132_v28, %v5590_v11 }
 0x5ba   :  { %v8853_v55 = vpop.f32.mrf.mxu0  ;;  %v2885_v34 = vpop.f32.mrf.mxu3 }
 0x5bb   :  { %v2846_v44 = vpop.f32.mrf.mxu1  ;;  %v8855_v31 = vadd.f32 %v2885_v34, %v2687_v49  ;;  %v5592_v49 = vld [vmem:[%s9634_s3 + $0x168] sm:$0xf0]  ;;  %3529 = vmatpush.bf16.msra.mxu2 %v5591_v43 }
 0x5bc   :  { %v8857_v50 = vadd.f32 %v2846_v44, %v2648_v30  ;;  %v5595_v30 = vor.u32 %v6131_v16, %v5592_v49  ;;  %v2695_v44 = vadd.f32 %v8711_v20, %v8753_v56  ;;  %v2700_v16 = vadd.f32 %v8760_v7, %v8753_v56  ;;  %v8933_v43 = vld [vmem:[%s9636_s6 + $0x48] sm:$0xff]  ;;  %v8953_v7 = vld [vmem:[%s9636_s6 + $0x38] sm:$0xff] }
 0x5bd   :  { %9884 = vst [vmem:[#allocation25_spill] sm:$0xff] %v8933_v43  ;;  %3791 = vmatpush.bf16.msrb.mxu3 %v8933_v43  ;;  %3771 = vmatpush.bf16.msrb.mxu1 %v8953_v7 }
 0x5be   :  { %3588 = vmatpush.bf16.msra.mxu0 %v5595_v30 }
 0x5bf   :  { %5568 = vmatmul.msk.bf16.gmra.mxu3 %vm2568_vm5, %v8424_v23 }
 0x5c0   :  { %v2652_v0 = vpop.f32.mrf.mxu2 }
 0x5c1   :  { %v2653_v33 = vadd.f32 %v2652_v0, %v8584_v10 }
 0x5c2   :  { %v8864_v51 = vpop.f32.mrf.mxu0  ;;  %v2888_v6 = vpop.f32.mrf.mxu3  ;;  %4239 = vmatpush.bf16.msrb.mxu0 %v8953_v7 }
 0x5c3   :  { %v2849_v21 = vpop.f32.mrf.mxu1  ;;  %v8866_v42 = vadd.f32 %v2888_v6, %v2690_v2 }
 0x5c4   :  { %v8868_v59 = vadd.f32 %v2849_v21, %v2651_v63 }
 0x5c5   :  { %5492 = vmatmul.msk.bf16.gmra.mxu2 %vm2568_vm5, %v8538_v38  ;;  %5502 = vmatmul.msk.bf16.gmra.mxu0 %vm2568_vm5, %v8538_v38 }
 0x5c6   :  { %5562 = vmatmul.msk.bf16.gmra.mxu1 %vm2568_vm5, %v8538_v38 }
 0x5c8   :  { %v2655_v37 = vpop.f32.mrf.mxu2 }
 0x5c9   :  { %v2656_v0 = vadd.f32 %v2655_v37, %v8584_v10  ;;  %v2697_v37 = vadd.f32 %v8739_v3, %v8753_v56 }
 0x5ca   :  { %v8879_v17 = vpop.f32.mrf.mxu0  ;;  %v2890_v18 = vpop.f32.mrf.mxu3 }
 0x5cb   :  { %9879 = vst [vmem:[#allocation19_spill] sm:$0xff] %v8879_v17  ;;  %v2851_v54 = vpop.f32.mrf.mxu1  ;;  %v8881_v27 = vadd.f32 %v2890_v18, %v2692_v52 }
 0x5cc   :  { %v8883_v1 = vadd.f32 %v2851_v54, %v2653_v33 }
 0x5cf   :  { %5569 = vmatmul.msk.bf16.gmra.mxu3 %vm2568_vm5, %v8444_v15 }
 0x5d0   :  { %v8899_v34 = vpop.f32.mrf.mxu2 }
 0x5d1   :  { %9880 = vst [vmem:[#allocation30_spill] sm:$0xff] %v8899_v34 }
 0x5d2   :  { %v8904_v2 = vpop.f32.mrf.mxu0  ;;  %v2893_v63 = vpop.f32.mrf.mxu3 }
 0x5d3   :  { %v2854_v6 = vpop.f32.mrf.mxu1  ;;  %v8906_v21 = vadd.f32 %v2893_v63, %v2695_v44 }
 0x5d4   :  { %v8908_v52 = vadd.f32 %v2854_v6, %v2656_v0 }
 0x5d5   :  { %5493 = vmatmul.msk.bf16.gmra.mxu2 %vm2568_vm5, %v8599_v58  ;;  %5503 = vmatmul.msk.bf16.gmra.mxu0 %vm2568_vm5, %v8599_v58 }
 0x5d6   :  { %5563 = vmatmul.msk.bf16.gmra.mxu1 %vm2568_vm5, %v8599_v58 }
 0x5d8   :  { %v2660_v20 = vpop.f32.mrf.mxu2 }
 0x5d9   :  { %v2661_v3 = vadd.f32 %v2660_v20, %v8584_v10  ;;  %v2702_v20 = vadd.f32 %v8789_v62, %v8753_v56 }
 0x5da   :  { %v8918_v33 = vpop.f32.mrf.mxu0  ;;  %v2895_v18 = vpop.f32.mrf.mxu3 }
 0x5db   :  { %9881 = vst [vmem:[#allocation50_spill] sm:$0xff] %v8918_v33  ;;  %v8920_v54 = vpop.f32.mrf.mxu1  ;;  %v8922_v11 = vadd.f32 %v2895_v18, %v2697_v37 }
 0x5dc   :  { %9882 = vst [vmem:[#allocation22_spill] sm:$0xff] %v8920_v54 }
 0x5df   :  { %5570 = vmatmul.msk.bf16.gmra.mxu3 %vm2568_vm5, %v8476_v9 }
 0x5e0   :  { %v8926_v28 = vpop.f32.mrf.mxu2 }
 0x5e1   :  { %9883 = vst [vmem:[#allocation33_spill] sm:$0xff] %v8926_v28 }
 0x5e2   :  { %v2898_v49 = vpop.f32.mrf.mxu3  ;;  %v3112_v30 = vpop.f32.mrf.mxu0 }
 0x5e3   :  { %v2859_v44 = vpop.f32.mrf.mxu1  ;;  %v8936_v0 = vadd.f32 %v2898_v49, %v2700_v16  ;;  %v8939_v63 = vadd.f32 %v3112_v30, %v8764_v60 }
 0x5e4   :  { %v8942_v6 = vadd.f32 %v2859_v44, %v2661_v3  ;;  %v2705_v44 = vadd.f32 %v8800_v36, %v8753_v56 }
 0x5e5   :  { %5494 = vmatmul.msk.bf16.gmra.mxu2 %vm2568_vm5, %v8633_v4  ;;  %5504 = vmatmul.msk.bf16.gmra.mxu0 %vm2568_vm5, %v8633_v4 }
 0x5e6   :  { %5564 = vmatmul.msk.bf16.gmra.mxu1 %vm2568_vm5, %v8633_v4 }
 0x5e8   :  { %v3053_v60 = vpop.f32.mrf.mxu2 }
 0x5e9   :  { %v8960_v37 = vadd.f32 %v3053_v60, %v8601_v5 }
 0x5ea   :  { %v2900_v18 = vpop.f32.mrf.mxu3  ;;  %v3114_v16 = vpop.f32.mrf.mxu0 }
 0x5eb   :  { %v8962_v3 = vadd.f32 %v2900_v18, %v2702_v20  ;;  %v8965_v49 = vadd.f32 %v3114_v16, %v8791_v46 }
 0x5ef   :  { %5571 = vmatmul.msk.bf16.gmra.mxu3 %vm2568_vm5, %v8494_v61 }
 0x5f0   :  { %v3055_v30 = vpop.f32.mrf.mxu2 }
 0x5f1   :  { %v8972_v54 = vadd.f32 %v3055_v30, %v8624_v35  ;;  %v2707_v35 = vadd.f32 %v8815_v41, %v8753_v56  ;;  %v2710_v41 = vadd.f32 %v8835_v26, %v8753_v56 }
 0x5f2   :  { %v2903_v62 = vpop.f32.mrf.mxu3  ;;  %v3117_v5 = vpop.f32.mrf.mxu0 }
 0x5f3   :  { %v8974_v60 = vadd.f32 %v2903_v62, %v2705_v44  ;;  %v8977_v20 = vadd.f32 %v3117_v5, %v8802_v53  ;;  %v8998_v44 = vld [vmem:[%s9636_s6 + $0x30] sm:$0xff] }
 0x5f4   :  { %3772 = vmatpush.bf16.msrb.mxu1 %v8998_v44  ;;  %4240 = vmatpush.bf16.msrb.mxu0 %v8998_v44 }
 0x5f5   :  { %5495 = vmatmul.msk.bf16.gmra.mxu2 %vm2568_vm5, %v8671_v8  ;;  %5505 = vmatmul.msk.bf16.gmra.mxu0 %vm2568_vm5, %v8671_v8 }
 0x5f6   :  { %5565 = vmatmul.msk.bf16.gmra.mxu1 %vm2568_vm5, %v8671_v8 }
 0x5f8   :  { %v3058_v46 = vpop.f32.mrf.mxu2 }
 0x5f9   :  { %v8988_v36 = vadd.f32 %v3058_v46, %v8645_v57 }
 0x5fa   :  { %v2905_v18 = vpop.f32.mrf.mxu3  ;;  %v3119_v16 = vpop.f32.mrf.mxu0 }
 0x5fb   :  { %v8990_v53 = vadd.f32 %v2905_v18, %v2707_v35  ;;  %v8993_v30 = vadd.f32 %v3119_v16, %v8817_v13 }
 0x5ff   :  { %5572 = vmatmul.msk.bf16.gmra.mxu3 %vm2568_vm5, %v8538_v38 }
 0x600   :  { %v3060_v57 = vpop.f32.mrf.mxu2 }
 0x601   :  { %v9007_v62 = vadd.f32 %v3060_v57, %v8662_v47  ;;  %v2712_v47 = vadd.f32 %v8853_v55, %v8753_v56 }
 0x602   :  { %v2908_v13 = vpop.f32.mrf.mxu3  ;;  %v3122_v5 = vpop.f32.mrf.mxu0 }
 0x603   :  { %v9009_v46 = vadd.f32 %v2908_v13, %v2710_v41  ;;  %v9012_v35 = vadd.f32 %v3122_v5, %v8840_v48 }
 0x605   :  { %5628 = vmatmul.msk.bf16.vlgmr.msra.gmra.mxu2 %vm2568_vm5, %v8424_v23  ;;  %5638 = vmatmul.msk.bf16.vlgmr.msra.gmra.mxu0 %vm2568_vm5, %v8424_v23  ;;  %v9035_v23 = vld [vmem:[%s9636_s6 + $0x28] sm:$0xff] }
 0x606   :  { %5566 = vmatmul.msk.bf16.gmra.mxu1 %vm2568_vm5, %v8721_v14  ;;  %4241 = vmatpush.bf16.msrb.mxu0 %v9035_v23 }
 0x607   :  { %3773 = vmatpush.bf16.msrb.mxu1 %v9035_v23 }
 0x608   :  { %v3063_v26 = vpop.f32.mrf.mxu2 }
 0x609   :  { %v9023_v18 = vadd.f32 %v3063_v26, %v8674_v19  ;;  %v2715_v19 = vadd.f32 %v8864_v51, %v8753_v56 }
 0x60a   :  { %v2910_v16 = vpop.f32.mrf.mxu3  ;;  %v3124_v57 = vpop.f32.mrf.mxu0 }
 0x60b   :  { %v9025_v48 = vadd.f32 %v2910_v16, %v2712_v47  ;;  %v9028_v41 = vadd.f32 %v3124_v57, %v8855_v31 }
 0x60f   :  { %5573 = vmatmul.msk.bf16.gmra.mxu3 %vm2568_vm5, %v8599_v58 }
 0x610   :  { %v3065_v13 = vpop.f32.mrf.mxu2 }
 0x611   :  { %v9040_v55 = vadd.f32 %v3065_v13, %v8694_v32 }
 0x612   :  { %v2913_v31 = vpop.f32.mrf.mxu3  ;;  %v3127_v5 = vpop.f32.mrf.mxu0 }
 0x613   :  { %v9044_v26 = vadd.f32 %v2913_v31, %v2715_v19  ;;  %v9047_v47 = vadd.f32 %v3127_v5, %v8866_v42  ;;  %v2720_v19 = vadd.f32 %v8904_v2, %v8753_v56 }
 0x615   :  { %5629 = vmatmul.msk.bf16.gmra.mxu2 %vm2568_vm5, %v8444_v15  ;;  %5639 = vmatmul.msk.bf16.gmra.mxu0 %vm2568_vm5, %v8444_v15 }
 0x618   :  { %v3068_v51 = vpop.f32.mrf.mxu2 }
 0x619   :  { %v9054_v32 = vadd.f32 %v3068_v51, %v8724_v12 }
 0x61a   :  { %v9056_v16 = vpop.f32.mrf.mxu3  ;;  %v3129_v57 = vpop.f32.mrf.mxu0 }
 0x61b   :  { %9885 = vst [vmem:[#allocation36_spill] sm:$0xff] %v9056_v16  ;;  %v9059_v13 = vadd.f32 %v3129_v57, %v8881_v27  ;;  %v9076_v27 = vld [vmem:[%s9636_s6 + $0x20] sm:$0xff] }
 0x61c   :  { %3774 = vmatpush.bf16.msrb.mxu1 %v9076_v27  ;;  %4242 = vmatpush.bf16.msrb.mxu0 %v9076_v27 }
 0x61f   :  { %5574 = vmatmul.msk.bf16.gmra.mxu3 %vm2568_vm5, %v8633_v4 }
 0x620   :  { %v3070_v42 = vpop.f32.mrf.mxu2 }
 0x621   :  { %v9066_v31 = vadd.f32 %v3070_v42, %v8750_v22 }
 0x622   :  { %v2918_v15 = vpop.f32.mrf.mxu3  ;;  %v3132_v5 = vpop.f32.mrf.mxu0 }
 0x623   :  { %v9068_v12 = vadd.f32 %v2918_v15, %v2720_v19  ;;  %v9071_v51 = vadd.f32 %v3132_v5, %v8906_v21  ;;  %v9100_v15 = vld [vmem:[%s9636_s6 + $0x40] sm:$0xff] }
 0x624   :  { %9888 = vst [vmem:[#allocation31_spill] sm:$0xff] %v9100_v15  ;;  %3792 = vmatpush.bf16.msrb.mxu3 %v9100_v15 }
 0x625   :  { %5630 = vmatmul.msk.bf16.gmra.mxu2 %vm2568_vm5, %v8476_v9  ;;  %5640 = vmatmul.msk.bf16.gmra.mxu0 %vm2568_vm5, %v8476_v9 }
 0x628   :  { %v3073_v22 = vpop.f32.mrf.mxu2 }
 0x629   :  { %v9085_v2 = vadd.f32 %v3073_v22, %v8766_v24 }
 0x62a   :  { %v9087_v21 = vpop.f32.mrf.mxu3  ;;  %v3134_v57 = vpop.f32.mrf.mxu0 }
 0x62b   :  { %9886 = vst [vmem:[#allocation28_spill] sm:$0xff] %v9087_v21  ;;  %v9090_v42 = vadd.f32 %v3134_v57, %v8922_v11 }
 0x62f   :  { %5575 = vmatmul.msk.bf16.gmra.mxu3 %vm2568_vm5, %v8671_v8 }
 0x630   :  { %v3075_v19 = vpop.f32.mrf.mxu2 }
 0x631   :  { %v9095_v9 = vadd.f32 %v3075_v19, %v8793_v25  ;;  %v9115_v25 = vld [vmem:[%s9636_s6 + $0x18] sm:$0xff] }
 0x632   :  { %v3137_v24 = vpop.f32.mrf.mxu0  ;;  %v9102_v5 = vpop.f32.mrf.mxu3  ;;  %3775 = vmatpush.bf16.msrb.mxu1 %v9115_v25  ;;  %4243 = vmatpush.bf16.msrb.mxu0 %v9115_v25 }
 0x633   :  { %9887 = vst [vmem:[#allocation40_spill] sm:$0xff] %v9095_v9  ;;  %v9105_v22 = vadd.f32 %v3137_v24, %v8936_v0 }
 0x635   :  { %5631 = vmatmul.msk.bf16.gmra.mxu2 %vm2568_vm5, %v8494_v61  ;;  %5641 = vmatmul.msk.bf16.gmra.mxu0 %vm2568_vm5, %v8494_v61 }
 0x638   :  { %v3078_v11 = vpop.f32.mrf.mxu2 }
 0x639   :  { %v9120_v0 = vadd.f32 %v3078_v11, %v8804_v40 }
 0x63a   :  { %v3139_v57 = vpop.f32.mrf.mxu0  ;;  %v9122_v19 = vpop.f32.mrf.mxu3 }
 0x63b   :  { %v9125_v24 = vadd.f32 %v3139_v57, %v8962_v3 }
 0x63d   :  { %9889 = vst [vmem:[#allocation45_spill] sm:$0xff] %v9125_v24 }
 0x63f   :  { %5576 = vmatmul.msk.bf16.gmra.mxu3 %vm2568_vm5, %v8721_v14 }
 0x640   :  { %v3080_v61 = vpop.f32.mrf.mxu2 }
 0x641   :  { %v9130_v28 = vadd.f32 %v3080_v61, %v8819_v45 }
 0x642   :  { %v3142_v34 = vpop.f32.mrf.mxu0  ;;  %v9132_v10 = vpop.f32.mrf.mxu3 }
 0x643   :  { %9890 = vst [vmem:[#allocation34_spill] sm:$0xff] %v9130_v28  ;;  %v9135_v21 = vadd.f32 %v3142_v34, %v8974_v60  ;;  %v9152_v34 = vld [vmem:[%s9636_s6 + $0x10] sm:$0xff] }
 0x644   :  { %3776 = vmatpush.bf16.msrb.mxu1 %v9152_v34  ;;  %4244 = vmatpush.bf16.msrb.mxu0 %v9152_v34 }
 0x645   :  { %9891 = vst [vmem:[#allocation48_spill] sm:$0xff] %v9135_v21  ;;  %5632 = vmatmul.msk.bf16.gmra.mxu2 %vm2568_vm5, %v8538_v38  ;;  %5642 = vmatmul.msk.bf16.gmra.mxu0 %vm2568_vm5, %v8538_v38  ;;  %v3406_v21 = vadd.f32 %v9132_v10, %v8977_v20  ;;  %v3404_v20 = vadd.f32 %v9122_v19, %v8965_v49 }
 0x648   :  { %v3083_v40 = vpop.f32.mrf.mxu2 }
 0x649   :  { %v9142_v3 = vadd.f32 %v3083_v40, %v8842_v29  ;;  %v9161_v40 = vpop.f32.mrf.mxu1 }
 0x64a   :  { %v3144_v11 = vpop.f32.mrf.mxu0  ;;  %v9144_v57 = vpop.f32.mrf.mxu3  ;;  %9895 = vst [vmem:[#allocation46_spill] sm:$0xff] %v9161_v40 }
 0x64b   :  { %9892 = vst [vmem:[#allocation37_spill] sm:$0xff] %v9142_v3  ;;  %v9147_v45 = vadd.f32 %v3144_v11, %v8990_v53 }
 0x64d   :  { %9893 = vst [vmem:[#allocation51_spill] sm:$0xff] %v9147_v45 }
 0x650   :  { %v3085_v38 = vpop.f32.mrf.mxu2 }
 0x651   :  { %v9157_v60 = vadd.f32 %v3085_v38, %v8857_v50 }
 0x652   :  { %v3147_v29 = vpop.f32.mrf.mxu0  ;;  %v9159_v61 = vpop.f32.mrf.mxu3 }
 0x653   :  { %9894 = vst [vmem:[#allocation42_spill] sm:$0xff] %v9157_v60  ;;  %v9164_v53 = vadd.f32 %v3147_v29, %v9009_v46  ;;  %v9181_v46 = vld [vmem:[%s9636_s6 + $0x8] sm:$0xff]  ;;  %v9183_v29 = vpop.f32.mrf.mxu1 }
 0x654   :  { %3777 = vmatpush.bf16.msrb.mxu1 %v9181_v46  ;;  %4245 = vmatpush.bf16.msrb.mxu0 %v9181_v46 }
 0x655   :  { %9896 = vst [vmem:[#allocation49_spill] sm:$0xff] %v9164_v53  ;;  %5633 = vmatmul.msk.bf16.gmra.mxu2 %vm2568_vm5, %v8599_v58  ;;  %5643 = vmatmul.msk.bf16.gmra.mxu0 %vm2568_vm5, %v8599_v58  ;;  %v3402_v53 = vadd.f32 %v9102_v5, %v8939_v63  ;;  %v3401_v63 = vadd.f32 %v9183_v29, %v8960_v37 }
 0x658   :  { %v3088_v11 = vpop.f32.mrf.mxu2 }
 0x659   :  { %v9171_v16 = vadd.f32 %v3088_v11, %v8868_v59 }
 0x65a   :  { %v3149_v50 = vpop.f32.mrf.mxu0  ;;  %v9173_v38 = vpop.f32.mrf.mxu3 }
 0x65b   :  { %9897 = vst [vmem:[#allocation52_spill] sm:$0xff] %v9171_v16  ;;  %v9176_v33 = vadd.f32 %v3149_v50, %v9025_v48  ;;  %v9199_v50 = vpop.f32.mrf.mxu1 }
 0x65c   :  { %v3403_v37 = vadd.f32 %v9199_v50, %v8972_v54 }
 0x65d   :  { %9898 = vst [vmem:[#allocation53_spill] sm:$0xff] %v9176_v33 }
 0x660   :  { %v3090_v58 = vpop.f32.mrf.mxu2 }
 0x661   :  { %v9188_v59 = vadd.f32 %v3090_v58, %v8883_v1  ;;  %v9207_v1 = vld [vmem:[%s9636_s6] sm:$0xff] }
 0x662   :  { %v3152_v11 = vpop.f32.mrf.mxu0  ;;  %v9190_v40 = vpop.f32.mrf.mxu3  ;;  %3778 = vmatpush.bf16.msrb.mxu1 %v9207_v1  ;;  %4246 = vmatpush.bf16.msrb.mxu0 %v9207_v1 }
 0x663   :  { %9899 = vst [vmem:[#allocation54_spill] sm:$0xff] %v9188_v59  ;;  %v9193_v48 = vadd.f32 %v3152_v11, %v9044_v26  ;;  %v9216_v11 = vld [vmem:[%s9636_s6 + $0x88] sm:$0xff] }
 0x664   :  { %9903 = vst [vmem:[#allocation35_spill] sm:$0xff] %v9216_v11  ;;  %4139 = vmatpush.bf16.msrb.mxu2 %v9216_v11 }
 0x665   :  { %9900 = vst [vmem:[#allocation55_spill] sm:$0xff] %v9193_v48  ;;  %5634 = vmatmul.msk.bf16.gmra.mxu2 %vm2568_vm5, %v8633_v4  ;;  %5644 = vmatmul.msk.bf16.gmra.mxu0 %vm2568_vm5, %v8633_v4  ;;  %v9224_v4 = vld [vmem:[%s9636_s6 + $0x80] sm:$0xff]  ;;  %v9236_v48 = vld [vmem:[%s9636_s6 + $0x78] sm:$0xff] }
 0x666   :  { %3880 = vmatpush.bf16.msra.mxu1 %v9216_v11  ;;  %4259 = vmatpush.bf16.msra.mxu0 %v8933_v43  ;;  %9905 = vst [vmem:[#allocation14_spill] sm:$0xff] %v9236_v48 }
 0x668   :  { %v3093_v17 = vpop.f32.mrf.mxu2  ;;  %4140 = vmatpush.bf16.msrb.mxu2 %v9224_v4 }
 0x669   :  { %v9202_v56 = vadd.f32 %v3093_v17, %v8908_v52  ;;  %v3297_v52 = vpop.f32.mrf.mxu1 }
 0x66a   :  { %v9209_v58 = vpop.f32.mrf.mxu0  ;;  %v9211_v26 = vpop.f32.mrf.mxu3  ;;  %3881 = vmatpush.bf16.msra.mxu1 %v9224_v4  ;;  %4260 = vmatpush.bf16.msra.mxu0 %v9100_v15  ;;  %v9274_v15 = vld [vmem:[%s9636_s6 + $0x60] sm:$0xff]  ;;  %v3405_v5 = vadd.f32 %v3297_v52, %v8988_v36 }
 0x66b   :  { %9901 = vst [vmem:[#allocation6_spill] sm:$0xff] %v9202_v56 }
 0x66c   :  { %9902 = vst [vmem:[#allocation10_spill] sm:$0xff] %v9209_v58  ;;  %4141 = vmatpush.bf16.msrb.mxu2 %v9236_v48 }
 0x66e   :  { %3882 = vmatpush.bf16.msra.mxu1 %v9236_v48 }
 0x670   :  { %v9228_v17 = vpop.f32.mrf.mxu2 }
 0x671   :  { %9904 = vst [vmem:[#allocation21_spill] sm:$0xff] %v9228_v17  ;;  %v9253_v17 = vld [vmem:[%s9636_s6 + $0x70] sm:$0xff] }
 0x672   :  { %v3157_v56 = vpop.f32.mrf.mxu0  ;;  %v3371_v58 = vpop.f32.mrf.mxu3  ;;  %9907 = vst [vmem:[#allocation17_spill] sm:$0xff] %v9253_v17  ;;  %3883 = vmatpush.bf16.msra.mxu1 %v9253_v17  ;;  %4142 = vmatpush.bf16.msrb.mxu2 %v9253_v17 }
 0x673   :  { %v9239_v59 = vadd.f32 %v3157_v56, %v9068_v12  ;;  %v9242_v43 = vadd.f32 %v3371_v58, %v9071_v51 }
 0x675   :  { %9906 = vst [vmem:[#allocation5_spill] sm:$0xff] %v9239_v59  ;;  %5635 = vmatmul.msk.bf16.gmra.mxu2 %vm2568_vm5, %v8671_v8  ;;  %5645 = vmatmul.msk.bf16.gmra.mxu0 %vm2568_vm5, %v8671_v8  ;;  %v9267_v8 = vld [vmem:[%s9636_s6 + $0x68] sm:$0xff]  ;;  %v3299_v59 = vpop.f32.mrf.mxu1 }
 0x676   :  { %3884 = vmatpush.bf16.msra.mxu1 %v9267_v8  ;;  %4143 = vmatpush.bf16.msrb.mxu2 %v9267_v8  ;;  %v3407_v49 = vadd.f32 %v3299_v59, %v9007_v62  ;;  %v3410_v59 = vadd.f32 %v9159_v61, %v9012_v35  ;;  %v3412_v35 = vadd.f32 %v9173_v38, %v9028_v41 }
 0x678   :  { %v3098_v56 = vpop.f32.mrf.mxu2 }
 0x679   :  { %v9258_v12 = vadd.f32 %v3098_v56, %v8942_v6 }
 0x67a   :  { %v9260_v51 = vpop.f32.mrf.mxu0  ;;  %v9262_v58 = vpop.f32.mrf.mxu3  ;;  %3885 = vmatpush.bf16.msra.mxu1 %v9274_v15  ;;  %4144 = vmatpush.bf16.msrb.mxu2 %v9274_v15 }
 0x67b   :  { %9908 = vst [vmem:[#allocation38_spill] sm:$0xff] %v9258_v12 }
 0x67c   :  { %9909 = vst [vmem:[#allocation2_spill] sm:$0xff] %v9260_v51  ;;  %v9283_v51 = vld [vmem:[%s9636_s6 + $0x58] sm:$0xff] }
 0x67d   :  { %v9299_v33 = vpop.f32.mrf.mxu1 }
 0x67e   :  { %3886 = vmatpush.bf16.msra.mxu1 %v9283_v51  ;;  %4145 = vmatpush.bf16.msrb.mxu2 %v9283_v51 }
 0x680   :  { %v9276_v6 = vpop.f32.mrf.mxu2 }
 0x681   :  { %9910 = vst [vmem:[#allocation41_spill] sm:$0xff] %v9276_v6  ;;  %v9297_v6 = vld [vmem:[%s9636_s6 + $0x98] sm:$0xff] }
 0x682   :  { %v3376_v56 = vpop.f32.mrf.mxu3  ;;  %v3590_v12 = vpop.f32.mrf.mxu0  ;;  %3900 = vmatpush.bf16.msra.mxu3 %v9297_v6 }
 0x683   :  { %v9286_v60 = vadd.f32 %v3376_v56, %v9105_v22  ;;  %v9304_v22 = vld [vmem:[%s9636_s6 + $0x50] sm:$0xff]  ;;  %v3641_v9 = vadd.f32 %v3590_v12, %v3402_v53 }
 0x684   :  { %3887 = vmatpush.bf16.msra.mxu1 %v9304_v22  ;;  %4146 = vmatpush.bf16.msrb.mxu2 %v9304_v22 }
 0x685   :  { %5636 = vmatmul.msk.bf16.gmra.mxu2 %vm2568_vm5, %v8721_v14  ;;  %5646 = vmatmul.msk.bf16.gmra.mxu0 %vm2568_vm5, %v8721_v14  ;;  %v9312_v14 = vld [vmem:[%s9636_s6 + $0x90] sm:$0xff]  ;;  %v9317_v16 = vpop.f32.mrf.mxu1 }
 0x686   :  { %3901 = vmatpush.bf16.msra.mxu3 %v9312_v14 }
 0x688   :  { %v3531_v56 = vpop.f32.mrf.mxu2  ;;  %4267 = vmatpush.bf16.msra.mxu2 %v9216_v11 }
 0x68a   :  { %v3592_v45 = vpop.f32.mrf.mxu0 }
 0x68c   :  { %4268 = vmatpush.bf16.msra.mxu2 %v9224_v4 }
 0x690   :  { %v3533_v3 = vpop.f32.mrf.mxu2  ;;  %4269 = vmatpush.bf16.msra.mxu2 %v9236_v48 }
 0x691   :  { %v3642_v19 = vadd.f32 %v3533_v3, %v3403_v37 }
 0x692   :  { %v3595_v28 = vpop.f32.mrf.mxu0 }
 0x693   :  { %v3645_v24 = vadd.f32 %v3595_v28, %v3406_v21  ;;  %v3408_v28 = vadd.f32 %v9144_v57, %v8993_v30  ;;  %v3640_v21 = vadd.f32 %v3531_v56, %v3401_v63 }
 0x694   :  { %4270 = vmatpush.bf16.msra.mxu2 %v9253_v17 }
 0x695   :  { %v3682_v11 = vmax.f32 %v3641_v9, %v3645_v24  ;;  %5637 = vmatmul.msk.bf16.gmra.mxu2 %vm2568_vm5, %v8762_v39  ;;  %5647 = vmatmul.msk.bf16.gmra.mxu0 %vm2568_vm5, %v8762_v39  ;;  %v3307_v24 = vpop.f32.mrf.mxu1  ;;  %v3643_v39 = vadd.f32 %v3592_v45, %v3404_v20 }
 0x696   :  { %v3413_v20 = vadd.f32 %v3307_v24, %v9054_v32 }
 0x698   :  { %v3536_v10 = vpop.f32.mrf.mxu2  ;;  %4271 = vmatpush.bf16.msra.mxu2 %v9267_v8 }
 0x699   :  { %v3644_v9 = vadd.f32 %v3536_v10, %v3405_v5  ;;  %v3409_v10 = vadd.f32 %v9299_v33, %v9023_v18  ;;  %v3411_v18 = vadd.f32 %v9317_v16, %v9040_v55  ;;  %v3378_v55 = vpop.f32.mrf.mxu3 }
 0x69a   :  { %v3597_v53 = vpop.f32.mrf.mxu0 }
 0x69b   :  { %v3681_v12 = vmax.f32 %v3640_v21, %v3644_v9  ;;  %v3647_v17 = vadd.f32 %v3597_v53, %v3408_v28 }
 0x69c   :  { %4272 = vmatpush.bf16.msra.mxu2 %v9274_v15 }
 0x69d   :  { %v3684_v48 = vmax.f32 %v3643_v39, %v3647_v17  ;;  %v3309_v52 = vpop.f32.mrf.mxu1 }
 0x69e   :  { %v3415_v32 = vadd.f32 %v3309_v52, %v9066_v31  ;;  %v3420_v31 = vadd.f32 %v9262_v58, %v9090_v42  ;;  %v9911_v58 = vld [vmem:[#allocation45_spill] sm:$0xff] }
 0x69f   :  { %v3686_v36 = vpack.c.bf16 %v3684_v48, %v3682_v11  ;;  %v3414_v48 = vadd.f32 %v9190_v40, %v9047_v47  ;;  %v3416_v47 = vadd.f32 %v9211_v26, %v9059_v13 }
 0x6a0   :  { %v3538_v30 = vpop.f32.mrf.mxu2  ;;  %4273 = vmatpush.bf16.msra.mxu2 %v9283_v51 }
 0x6a1   :  { %v3646_v57 = vadd.f32 %v3538_v30, %v3407_v49  ;;  %5688 = vmatmul.msk.bf16.vlgmr.msrb.gmra.mxu3 %vm3767_vm6, %v3686_v36 }
 0x6a2   :  { %v3600_v29 = vpop.f32.mrf.mxu0 }
 0x6a3   :  { %v3683_v45 = vmax.f32 %v3642_v19, %v3646_v57  ;;  %v3649_v11 = vadd.f32 %v3600_v29, %v3410_v59 }
 0x6a4   :  { %4274 = vmatpush.bf16.msra.mxu2 %v9304_v22 }
 0x6a5   :  { %v3685_v17 = vpack.c.bf16 %v3683_v45, %v3681_v12  ;;  %v3312_v62 = vpop.f32.mrf.mxu1  ;;  %v3381_v45 = vpop.f32.mrf.mxu3 }
 0x6a7   :  { %3779 = vmatmul.bf16.vlgmr.msrb.gmra.mxu1 %v3685_v17 }
 0x6a8   :  { %v3541_v56 = vpop.f32.mrf.mxu2  ;;  %3983 = vmatpush.bf16.msrb.mxu1 %v8953_v7 }
 0x6a9   :  { %v3648_v61 = vadd.f32 %v3541_v56, %v3409_v10 }
 0x6aa   :  { %v3602_v54 = vpop.f32.mrf.mxu0 }
 0x6ab   :  { %v3651_v53 = vadd.f32 %v3602_v54, %v3412_v35 }
 0x6ac   :  { %3984 = vmatpush.bf16.msrb.mxu1 %v8998_v44 }
 0x6ad   :  { %v3314_v28 = vpop.f32.mrf.mxu1 }
 0x6b0   :  { %v3543_v3 = vpop.f32.mrf.mxu2  ;;  %3985 = vmatpush.bf16.msrb.mxu1 %v9035_v23 }
 0x6b1   :  { %5749 = vmatmul.msk.bf16.vlgmr.msra.gmra.mxu3 %vm3767_vm6, %v3686_v36  ;;  %v3650_v13 = vadd.f32 %v3543_v3, %v3411_v18  ;;  %v3417_v3 = vadd.f32 %v3312_v62, %v9085_v2 }
 0x6b2   :  { %v3605_v50 = vpop.f32.mrf.mxu0 }
 0x6b3   :  { %v3653_v63 = vadd.f32 %v3605_v50, %v3414_v48  ;;  %v3424_v48 = vadd.f32 %v3378_v55, %v9911_v58  ;;  %v9921_v58 = vld [vmem:[#allocation51_spill] sm:$0xff] }
 0x6b4   :  { %3986 = vmatpush.bf16.msrb.mxu1 %v9076_v27 }
 0x6b5   :  { %v3975_v5 = vmax.f32 %v3649_v11, %v3653_v63  ;;  %v3317_v26 = vpop.f32.mrf.mxu1  ;;  %v3383_v63 = vpop.f32.mrf.mxu3 }
 0x6b6   :  { %v3421_v59 = vadd.f32 %v3317_v26, %v9120_v0  ;;  %v9915_v26 = vld [vmem:[#allocation14_spill] sm:$0xff] }
 0x6b7   :  { %3888 = vmatmul.bf16.vlgmr.msra.gmra.mxu1 %v3685_v17 }
 0x6b8   :  { %v3546_v21 = vpop.f32.mrf.mxu2  ;;  %3987 = vmatpush.bf16.msrb.mxu1 %v9115_v25 }
 0x6b9   :  { %v3652_v40 = vadd.f32 %v3546_v21, %v3413_v20 }
 0x6ba   :  { %v3607_v9 = vpop.f32.mrf.mxu0 }
 0x6bb   :  { %v3974_v39 = vmax.f32 %v3648_v61, %v3652_v40  ;;  %v3655_v12 = vadd.f32 %v3607_v9, %v3416_v47  ;;  %v9913_v47 = vld [vmem:[#allocation34_spill] sm:$0xff] }
 0x6bc   :  { %3988 = vmatpush.bf16.msrb.mxu1 %v9152_v34 }
 0x6bd   :  { %v3977_v33 = vmax.f32 %v3651_v53, %v3655_v12  ;;  %v3319_v29 = vpop.f32.mrf.mxu1  ;;  %v3386_v12 = vpop.f32.mrf.mxu3 }
 0x6be   :  { %v3423_v61 = vadd.f32 %v3319_v29, %v9913_v47  ;;  %v9918_v29 = vld [vmem:[#allocation17_spill] sm:$0xff]  ;;  %v9923_v47 = vld [vmem:[#allocation42_spill] sm:$0xff] }
 0x6bf   :  { %v9365_v24 = vpack.c.bf16 %v3977_v33, %v3975_v5 }
 0x6c0   :  { %v3548_v41 = vpop.f32.mrf.mxu2  ;;  %3989 = vmatpush.bf16.msrb.mxu1 %v9181_v46 }
 0x6c1   :  { %v3654_v38 = vadd.f32 %v3548_v41, %v3415_v32  ;;  %v9914_v32 = vld [vmem:[#allocation35_spill] sm:$0xff] }
 0x6c2   :  { %v3610_v37 = vpop.f32.mrf.mxu0 }
 0x6c3   :  { %v3976_v49 = vmax.f32 %v3650_v13, %v3654_v38  ;;  %v3657_v36 = vadd.f32 %v3610_v37, %v9242_v43  ;;  %v9916_v37 = vld [vmem:[#allocation48_spill] sm:$0xff] }
 0x6c4   :  { %3990 = vmatpush.bf16.msrb.mxu1 %v9207_v1 }
 0x6c5   :  { %v9370_v30 = vpack.c.bf16 %v3976_v49, %v3974_v39  ;;  %v3322_v54 = vpop.f32.mrf.mxu1  ;;  %v3388_v13 = vpop.f32.mrf.mxu3  ;;  %v3426_v49 = vadd.f32 %v3381_v45, %v9916_v37  ;;  %v9922_v45 = vld [vmem:[#allocation53_spill] sm:$0xff] }
 0x6c7   :  { %3991 = vmatmul.bf16.vlgmr.msrb.gmra.mxu1 %v9370_v30 }
 0x6c8   :  { %4031 = vmatpush.bf16.msra.mxu1 %v9297_v6  ;;  %v3551_v16 = vpop.f32.mrf.mxu2 }
 0x6c9   :  { %v3656_v50 = vadd.f32 %v3551_v16, %v3417_v3 }
 0x6ca   :  { %v3612_v19 = vpop.f32.mrf.mxu0 }
 0x6cb   :  { %v3659_v57 = vadd.f32 %v3612_v19, %v3420_v31 }
 0x6cc   :  { %4032 = vmatpush.bf16.msra.mxu1 %v9312_v14 }
 0x6cd   :  { %v3324_v0 = vpop.f32.mrf.mxu1 }
 0x6d0   :  { %v3553_v43 = vpop.f32.mrf.mxu2 }
 0x6d2   :  { %v3615_v52 = vpop.f32.mrf.mxu0 }
 0x6d3   :  { %v3661_v17 = vadd.f32 %v3615_v52, %v9286_v60  ;;  %v9912_v60 = vld [vmem:[#allocation40_spill] sm:$0xff]  ;;  %v9919_v52 = vld [vmem:[#allocation37_spill] sm:$0xff] }
 0x6d4   :  { %v3419_v35 = vadd.f32 %v3314_v28, %v9912_v60 }
 0x6d5   :  { %v4103_v56 = vmax.f32 %v3657_v36, %v3661_v17  ;;  %v3327_v41 = vpop.f32.mrf.mxu1  ;;  %v9917_v36 = vld [vmem:[#allocation49_spill] sm:$0xff]  ;;  %v3425_v17 = vadd.f32 %v3322_v54, %v9919_v52 }
 0x6d6   :  { %v3658_v40 = vadd.f32 %v3553_v43, %v3419_v35  ;;  %v3430_v55 = vadd.f32 %v3386_v12, %v9917_v36 }
 0x6d7   :  { %5772 = vmatmul.msk.bf16.vlgmr.msra.gmra.mxu1 %vm3767_vm6, %v9365_v24 }
 0x6d8   :  { %v3556_v42 = vpop.f32.mrf.mxu2 }
 0x6d9   :  { %v3660_v11 = vadd.f32 %v3556_v42, %v3421_v59  ;;  %v3391_v59 = vpop.f32.mrf.mxu3 }
 0x6da   :  { %v3617_v5 = vpop.f32.mrf.mxu0 }
 0x6db   :  { %v4102_v10 = vmax.f32 %v3656_v50, %v3660_v11  ;;  %v3663_v20 = vadd.f32 %v3617_v5, %v3424_v48  ;;  %v3428_v48 = vadd.f32 %v3383_v63, %v9921_v58  ;;  %v3432_v50 = vadd.f32 %v3388_v13, %v9922_v45 }
 0x6dd   :  { %v4105_v21 = vmax.f32 %v3659_v57, %v3663_v20  ;;  %v3329_v57 = vpop.f32.mrf.mxu1 }
 0x6df   :  { %v9385_v2 = vpack.c.bf16 %v4105_v21, %v4103_v56  ;;  %v9920_v56 = vld [vmem:[#allocation52_spill] sm:$0xff] }
 0x6e0   :  { %v3558_v62 = vpop.f32.mrf.mxu2  ;;  %v3429_v3 = vadd.f32 %v3327_v41, %v9920_v56 }
 0x6e1   :  { %v3662_v9 = vadd.f32 %v3558_v62, %v3423_v61  ;;  %v3427_v61 = vadd.f32 %v3324_v0, %v9923_v47  ;;  %v9924_v62 = vld [vmem:[#allocation54_spill] sm:$0xff]  ;;  %v3393_v12 = vpop.f32.mrf.mxu3  ;;  %v9925_v0 = vld [vmem:[#allocation25_spill] sm:$0xff] }
 0x6e2   :  { %v3620_v53 = vpop.f32.mrf.mxu0  ;;  %v9934_v47 = vld [vmem:[#allocation10_spill] sm:$0xff] }
 0x6e3   :  { %v4104_v39 = vmax.f32 %v3658_v40, %v3662_v9  ;;  %v3665_v31 = vadd.f32 %v3620_v53, %v3426_v49  ;;  %v3431_v40 = vadd.f32 %v3329_v57, %v9924_v62  ;;  %v9935_v62 = vld [vmem:[#allocation6_spill] sm:$0xff] }
 0x6e5   :  { %v9387_v33 = vpack.c.bf16 %v4104_v39, %v4102_v10  ;;  %v3332_v54 = vpop.f32.mrf.mxu1 }
 0x6e7   :  { %4147 = vmatmul.bf16.vlgmr.msrb.gmra.mxu2 %v9387_v33 }
 0x6e8   :  { %v3561_v18 = vpop.f32.mrf.mxu2  ;;  %4395 = vmatpush.bf16.msrb.mxu2 %v9914_v32 }
 0x6e9   :  { %v3664_v11 = vadd.f32 %v3561_v18, %v3425_v17  ;;  %v3396_v36 = vpop.f32.mrf.mxu3 }
 0x6ea   :  { %v3622_v28 = vpop.f32.mrf.mxu0 }
 0x6eb   :  { %v3667_v20 = vadd.f32 %v3622_v28, %v3428_v48  ;;  %v9931_v48 = vld [vmem:[#allocation50_spill] sm:$0xff] }
 0x6ec   :  { %4396 = vmatpush.bf16.msrb.mxu2 %v9224_v4 }
 0x6ed   :  { %v3334_v13 = vpop.f32.mrf.mxu1 }
 0x6f0   :  { %v3563_v38 = vpop.f32.mrf.mxu2  ;;  %4397 = vmatpush.bf16.msrb.mxu2 %v9915_v26 }
 0x6f1   :  { %v3666_v63 = vadd.f32 %v3563_v38, %v3427_v61  ;;  %v6165_v38 = vld [vmem:[%s9637_s7 + $0x20] sm:$0xff] }
 0x6f2   :  { %v3625_v16 = vpop.f32.mrf.mxu0  ;;  %3958 = vmatpush.bf16.msrb.mxu3 %v6165_v38 }
 0x6f3   :  { %v3669_v19 = vadd.f32 %v3625_v16, %v3430_v55  ;;  %v9926_v55 = vld [vmem:[#allocation31_spill] sm:$0xff]  ;;  %v6164_v16 = vld [vmem:[%s9637_s7 + $0x18] sm:$0xff] }
 0x6f4   :  { %4398 = vmatpush.bf16.msrb.mxu2 %v9918_v29 }
 0x6f5   :  { %v4231_v43 = vmax.f32 %v3665_v31, %v3669_v19  ;;  %v9927_v19 = vld [vmem:[#allocation55_spill] sm:$0xff]  ;;  %v3337_v17 = vpop.f32.mrf.mxu1 }
 0x6f6   :  { %v3434_v57 = vadd.f32 %v3391_v59, %v9927_v19  ;;  %3959 = vmatpush.bf16.msrb.mxu3 %v6164_v16  ;;  %v9933_v59 = vld [vmem:[#allocation28_spill] sm:$0xff]  ;;  %v9940_v16 = vld [vmem:[#allocation33_spill] sm:$0xff] }
 0x6f8   :  { %v3566_v42 = vpop.f32.mrf.mxu2  ;;  %4399 = vmatpush.bf16.msrb.mxu2 %v9267_v8 }
 0x6f9   :  { %v3668_v5 = vadd.f32 %v3566_v42, %v3429_v3  ;;  %v9929_v3 = vld [vmem:[#allocation47_spill] sm:$0xff] }
 0x6fa   :  { %v3627_v10 = vpop.f32.mrf.mxu0  ;;  %v9930_v42 = vld [vmem:[#allocation19_spill] sm:$0xff]  ;;  %v2722_v45 = vadd.f32 %v9931_v48, %v9929_v3 }
 0x6fb   :  { %v4230_v21 = vmax.f32 %v3664_v11, %v3668_v5  ;;  %v3671_v60 = vadd.f32 %v3627_v10, %v3432_v50  ;;  %v2717_v58 = vadd.f32 %v9930_v42, %v9929_v3  ;;  %v6163_v5 = vld [vmem:[%s9637_s7 + $0x10] sm:$0xff]  ;;  %v9941_v3 = vld [vmem:[#allocation22_spill] sm:$0xff] }
 0x6fc   :  { %4400 = vmatpush.bf16.msrb.mxu2 %v9274_v15  ;;  %v9932_v10 = vld [vmem:[#allocation36_spill] sm:$0xff]  ;;  %3960 = vmatpush.bf16.msrb.mxu3 %v6163_v5 }
 0x6fd   :  { %v4233_v35 = vmax.f32 %v3667_v20, %v3671_v60  ;;  %v2958_v20 = vadd.f32 %v9932_v10, %v2717_v58  ;;  %v9942_v58 = vld [vmem:[#allocation46_spill] sm:$0xff]  ;;  %v3339_v5 = vpop.f32.mrf.mxu1 }
 0x6fe   :  { %v6161_v10 = vld [vmem:[%s9637_s7] sm:$0xff] }
 0x6ff   :  { %v9404_v9 = vpack.c.bf16 %v4233_v35, %v4231_v43  ;;  %v9928_v43 = vld [vmem:[#allocation5_spill] sm:$0xff]  ;;  %v3398_v35 = vpop.f32.mrf.mxu3  ;;  %v3197_v61 = vadd.f32 %v9934_v47, %v2958_v20 }
 0x700   :  { %v3568_v53 = vpop.f32.mrf.mxu2  ;;  %4401 = vmatpush.bf16.msrb.mxu2 %v9283_v51  ;;  %v3438_v52 = vadd.f32 %v3396_v36, %v9928_v43  ;;  %v9939_v36 = vld [vmem:[#allocation30_spill] sm:$0xff]  ;;  %v9943_v20 = vld [vmem:[#allocation21_spill] sm:$0xff] }
 0x701   :  { %v3670_v39 = vadd.f32 %v3568_v53, %v3431_v40  ;;  %v3433_v40 = vadd.f32 %v3332_v54, %v9935_v62  ;;  %v9936_v53 = vld [vmem:[#allocation2_spill] sm:$0xff]  ;;  %v3436_v43 = vadd.f32 %v3393_v12, %v3197_v61  ;;  %v9944_v12 = vld [vmem:[#allocation41_spill] sm:$0xff] }
 0x702   :  { %v3630_v18 = vpop.f32.mrf.mxu0 }
 0x703   :  { %v4232_v41 = vmax.f32 %v3666_v63, %v3670_v39  ;;  %v3673_v50 = vadd.f32 %v3630_v18, %v3434_v57  ;;  %v9937_v39 = vld [vmem:[#allocation38_spill] sm:$0xff] }
 0x704   :  { %4402 = vmatpush.bf16.msrb.mxu2 %v9304_v22  ;;  %v3437_v18 = vadd.f32 %v3337_v17, %v9937_v39 }
 0x705   :  { %v4234_v28 = vpack.c.bf16 %v4232_v41, %v4230_v21  ;;  %v2962_v21 = vadd.f32 %v9933_v59, %v2722_v45  ;;  %v6162_v41 = vld [vmem:[%s9637_s7 + $0x8] sm:$0xff] }
 0x706   :  { %3961 = vmatpush.bf16.msrb.mxu3 %v6162_v41 }
 0x707   :  { %4247 = vmatmul.bf16.vlgmr.msrb.gmra.mxu0 %v4234_v28  ;;  %4275 = vmatmul.bf16.vlgmr.msra.gmra.mxu2 %v4234_v28  ;;  %v3201_v63 = vadd.f32 %v9936_v53, %v2962_v21  ;;  %v9938_v28 = vld [vmem:[#allocation27_spill] sm:$0xff] }
 0x708   :  { %v3571_v37 = vpop.f32.mrf.mxu2  ;;  %4387 = vmatpush.bf16.msrb.mxu0 %v9925_v0  ;;  %v2658_v38 = vadd.f32 %v9939_v36, %v9938_v28  ;;  %v2663_v19 = vadd.f32 %v9940_v16, %v9938_v28 }
 0x709   :  { %v3440_v54 = vadd.f32 %v3398_v35, %v3201_v63 }
 0x70a   :  { %v3632_v49 = vpop.f32.mrf.mxu0  ;;  %v2957_v17 = vadd.f32 %v9941_v3, %v2658_v38  ;;  %v2961_v48 = vadd.f32 %v9942_v58, %v2663_v19  ;;  %3962 = vmatpush.bf16.msrb.mxu3 %v6161_v10 }
 0x70b   :  { %v3675_v45 = vadd.f32 %v3632_v49, %v3436_v43 }
 0x70c   :  { %4388 = vmatpush.bf16.msrb.mxu0 %v9926_v55  ;;  %v3196_v59 = vadd.f32 %v9943_v20, %v2957_v17  ;;  %v3200_v21 = vadd.f32 %v9944_v12, %v2961_v48  ;;  %v6172_v12 = vld [vmem:[%s9637_s7 + $0x58] sm:$0xff] }
 0x70e   :  { %v3435_v35 = vadd.f32 %v3334_v13, %v3196_v59  ;;  %v3439_v47 = vadd.f32 %v3339_v5, %v3200_v21  ;;  %4003 = vmatpush.bf16.msra.mxu3 %v9925_v0  ;;  %v6174_v5 = vld [vmem:[%s9637_s7 + $0x68] sm:$0xff] }
 0x710   :  { %v3573_v31 = vpop.f32.mrf.mxu2 }
 0x711   :  { %v3674_v62 = vadd.f32 %v3573_v31, %v3435_v35 }
 0x712   :  { %v3635_v56 = vpop.f32.mrf.mxu0  ;;  %4004 = vmatpush.bf16.msra.mxu3 %v9926_v55 }
 0x713   :  { %v3677_v11 = vadd.f32 %v3635_v56, %v3438_v52  ;;  %v3672_v52 = vadd.f32 %v3571_v37, %v3433_v40 }
 0x715   :  { %v4359_v60 = vmax.f32 %v3673_v50, %v3677_v11 }
 0x717   :  { %5837 = vmatmul.msk.bf16.vlgmr.msra.gmra.mxu0 %vm3767_vm6, %v9404_v9 }
 0x718   :  { %v3576_v57 = vpop.f32.mrf.mxu2 }
 0x719   :  { %v3676_v56 = vadd.f32 %v3576_v57, %v3437_v18 }
 0x71a   :  { %v3637_v42 = vpop.f32.mrf.mxu0 }
 0x71b   :  { %v4358_v50 = vmax.f32 %v3672_v52, %v3676_v56  ;;  %v3679_v11 = vadd.f32 %v3637_v42, %v3440_v54 }
 0x71d   :  { %v4361_v37 = vmax.f32 %v3675_v45, %v3679_v11 }
 0x71f   :  { %v9447_v61 = vpack.c.bf16 %v4361_v37, %v4359_v60 }
 0x720   :  { %v3578_v49 = vpop.f32.mrf.mxu2 }
 0x721   :  { %v3678_v40 = vadd.f32 %v3578_v49, %v3439_v47  ;;  %v6171_v47 = vld [vmem:[%s9637_s7 + $0x50] sm:$0xff] }
 0x723   :  { %v4360_v53 = vmax.f32 %v3674_v62, %v3678_v40 }
 0x724   :  { %v3780_v63 = vpop.f32.mrf.mxu1  ;;  %v3794_v39 = vpop.f32.mrf.mxu3 }
 0x725   :  { %v9451_v18 = vpack.c.bf16 %v4360_v53, %v4358_v50  ;;  %v3795_v16 = vadd.f32 %v3794_v39, %v3780_v63 }
 0x727   :  { %5870 = vmatmul.msk.bf16.vlgmr.msrb.gmra.mxu0 %vm3767_vm6, %v9447_v61  ;;  %4403 = vmatmul.bf16.vlgmr.msrb.gmra.mxu2 %v9451_v18 }
 0x72c   :  { %v3782_v13 = vpop.f32.mrf.mxu1  ;;  %v3796_v60 = vpop.f32.mrf.mxu3 }
 0x72d   :  { %v3797_v19 = vadd.f32 %v3796_v60, %v3782_v13 }
 0x734   :  { %v3889_v41 = vpop.f32.mrf.mxu1  ;;  %v3903_v28 = vpop.f32.mrf.mxu3 }
 0x735   :  { %v3904_v36 = vadd.f32 %v3903_v28, %v3889_v41 }
 0x737   :  { %v3908_v43 = vmax.f32 %v3795_v16, %v3904_v36 }
 0x73c   :  { %v3891_v38 = vpop.f32.mrf.mxu1  ;;  %v3905_v31 = vpop.f32.mrf.mxu3 }
 0x73d   :  { %v3906_v57 = vadd.f32 %v3905_v31, %v3891_v38 }
 0x73f   :  { %v3909_v54 = vmax.f32 %v3797_v19, %v3906_v57  ;;  %v6202_v57 = vld [vmem:[%s9636_s6 + $0x38] sm:$0xff] }
 0x741   :  { %v3910_v52 = vpack.c.bf16 %v3909_v54, %v3908_v43  ;;  %v6203_v43 = vld [vmem:[%s9636_s6 + $0x30] sm:$0xff]  ;;  %v6180_v54 = vld [vmem:[%s9637_s7 + $0x98] sm:$0xff] }
 0x743   :  { %5770 = vmatmul.msk.bf16.vlgmr.msrb.gmra.mxu3 %vm3951_vm7, %v3910_v52 }
 0x744   :  { %4011 = vmatpush.bf16.msrb.mxu3 %v9914_v32 }
 0x748   :  { %4012 = vmatpush.bf16.msrb.mxu3 %v9224_v4  ;;  %v6168_v4 = vld [vmem:[%s9637_s7 + $0x38] sm:$0xff] }
 0x74c   :  { %4013 = vmatpush.bf16.msrb.mxu3 %v9915_v26 }
 0x750   :  { %4014 = vmatpush.bf16.msrb.mxu3 %v9918_v29 }
 0x753   :  { %5771 = vmatmul.msk.bf16.vlgmr.msra.gmra.mxu3 %vm3767_vm6, %v9365_v24  ;;  %v6166_v24 = vld [vmem:[%s9637_s7 + $0x28] sm:$0xff] }
 0x754   :  { %4015 = vmatpush.bf16.msrb.mxu3 %v9267_v8 }
 0x758   :  { %4016 = vmatpush.bf16.msrb.mxu3 %v9274_v15 }
 0x75c   :  { %4017 = vmatpush.bf16.msrb.mxu3 %v9283_v51  ;;  %v6167_v51 = vld [vmem:[%s9637_s7 + $0x30] sm:$0xff] }
 0x760   :  { %4018 = vmatpush.bf16.msrb.mxu3 %v9304_v22  ;;  %v3992_v22 = vpop.f32.mrf.mxu1 }
 0x763   :  { %4019 = vmatmul.bf16.vlgmr.msrb.gmra.mxu3 %v9370_v30 }
 0x764   :  { %4111 = vmatpush.bf16.msra.mxu3 %v8953_v7  ;;  %v6170_v7 = vld [vmem:[%s9637_s7 + $0x48] sm:$0xff] }
 0x765   :  { %4089 = vmatpush.bf16.msrb.mxu1 %v6170_v7 }
 0x768   :  { %4112 = vmatpush.bf16.msra.mxu3 %v8998_v44  ;;  %v6169_v44 = vld [vmem:[%s9637_s7 + $0x40] sm:$0xff] }
 0x769   :  { %4090 = vmatpush.bf16.msrb.mxu1 %v6169_v44 }
 0x76a   :  { %v4148_v40 = vpop.f32.mrf.mxu2 }
 0x76c   :  { %4113 = vmatpush.bf16.msra.mxu3 %v9035_v23 }
 0x76d   :  { %4091 = vmatpush.bf16.msrb.mxu1 %v6168_v4 }
 0x770   :  { %4114 = vmatpush.bf16.msra.mxu3 %v9076_v27 }
 0x771   :  { %4092 = vmatpush.bf16.msrb.mxu1 %v6167_v51 }
 0x772   :  { %v4150_v39 = vpop.f32.mrf.mxu2 }
 0x774   :  { %4115 = vmatpush.bf16.msra.mxu3 %v9115_v25 }
 0x775   :  { %4093 = vmatpush.bf16.msrb.mxu1 %v6166_v24 }
 0x778   :  { %4116 = vmatpush.bf16.msra.mxu3 %v9152_v34 }
 0x779   :  { %4131 = vmatpush.bf16.msra.mxu1 %v9925_v0  ;;  %v6175_v0 = vld [vmem:[%s9637_s7 + $0x70] sm:$0xff] }
 0x77c   :  { %4117 = vmatpush.bf16.msra.mxu3 %v9181_v46 }
 0x77d   :  { %4132 = vmatpush.bf16.msra.mxu1 %v9926_v55  ;;  %v6198_v55 = vld [vmem:[%s9638_s8] ss:$0 sm:$0xff] }
 0x780   :  { %4118 = vmatpush.bf16.msra.mxu3 %v9207_v1 }
 0x783   :  { %4119 = vmatmul.bf16.vlgmr.msra.gmra.mxu3 %v9387_v33  ;;  %v3994_v33 = vpop.f32.mrf.mxu1 }
 0x784   :  { %4217 = vmatpush.bf16.msrb.mxu3 %v6175_v0  ;;  %v6192_v0 = vld [vmem:[%s9639_s9 + $0x30] sm:$0xff] }
 0x788   :  { %4218 = vmatpush.bf16.msrb.mxu3 %v6174_v5 }
 0x78b   :  { %v4034_v26 = vpop.f32.mrf.mxu1 }
 0x793   :  { %v4036_v3 = vpop.f32.mrf.mxu1 }
 0x7c6   :  { %v3964_v15 = vpop.f32.mrf.mxu3 }
 0x7c7   :  { %v3972_v10 = vadd.f32 %v6198_v55, %v3964_v15  ;;  %v4276_v15 = vpop.f32.mrf.mxu2 }
 0x7ce   :  { %v3966_v8 = vpop.f32.mrf.mxu3 }
 0x7cf   :  { %v3973_v21 = vadd.f32 %v6198_v55, %v3966_v8 }
 0x7d6   :  { %v4006_v30 = vpop.f32.mrf.mxu3 }
 0x7d7   :  { %v4007_v42 = vadd.f32 %v4006_v30, %v3992_v22  ;;  %v4278_v22 = vpop.f32.mrf.mxu2 }
 0x7de   :  { %v4008_v32 = vpop.f32.mrf.mxu3 }
 0x7df   :  { %v4009_v58 = vadd.f32 %v4008_v32, %v3994_v33 }
 0x7e6   :  { %v4020_v29 = vpop.f32.mrf.mxu3 }
 0x7e7   :  { %v4035_v56 = vadd.f32 %v4034_v26, %v4020_v29 }
 0x7e9   :  { %v4039_v45 = vmax.f32 %v4007_v42, %v4035_v56  ;;  %v6184_v56 = vld [vmem:[%s9637_s7 + $0xb8] sm:$0xff] }
 0x7ea   :  { %v4501_v42 = vld [vmem:[%s9639_s9 + $0x38] sm:$0xf] }
 0x7ee   :  { %v4022_v17 = vpop.f32.mrf.mxu3 }
 0x7ef   :  { %v4037_v48 = vadd.f32 %v4036_v3, %v4022_v17  ;;  %v6183_v3 = vld [vmem:[%s9637_s7 + $0xb0] sm:$0xff]  ;;  %v6182_v17 = vld [vmem:[%s9637_s7 + $0xa8] sm:$0xff] }
 0x7f1   :  { %v4040_v50 = vmax.f32 %v4009_v58, %v4037_v48  ;;  %v4535_v48 = vunpack.c.l.b16 %v4501_v42 }
 0x7f3   :  { %v4041_v11 = vpack.c.bf16 %v4040_v50, %v4039_v45  ;;  %v4543_v50 = vpack.c.b16 %v4535_v48, %v4535_v48 }
 0x7f5   :  { %5803 = vmatmul.msk.bf16.vlgmr.msrb.gmra.mxu1 %vm3951_vm7, %v4041_v11  ;;  %v4556_v11 = vsel %vm1982_vm2, %v4543_v50, 0 }
 0x7f6   :  { %4159 = vmatpush.bf16.msrb.mxu1 %v9297_v6 }
 0x7fa   :  { %4160 = vmatpush.bf16.msrb.mxu1 %v9312_v14 }
 0x805   :  { %5804 = vmatmul.msk.bf16.vlgmr.msra.gmra.mxu1 %vm3767_vm6, %v9385_v2 }
 0x806   :  { %v4120_v53 = vpop.f32.mrf.mxu3  ;;  %4345 = vmatpush.bf16.msra.mxu1 %v6180_v54  ;;  %v6196_v54 = vld [vmem:[%s9641_s11 + $0x18] sm:$0xff] }
 0x80e   :  { %v4122_v60 = vpop.f32.mrf.mxu3 }
 0x815   :  { %5805 = vmatmul.msk.bf16.vlgmr.msrb.gmra.mxu1 %vm3767_vm6, %v9385_v2  ;;  %v6173_v2 = vld [vmem:[%s9637_s7 + $0x60] sm:$0xff] }
 0x816   :  { %4219 = vmatpush.bf16.msrb.mxu3 %v6173_v2  ;;  %v6190_v2 = vld [vmem:[%s9639_s9 + $0x20] sm:$0xff] }
 0x81a   :  { %4220 = vmatpush.bf16.msrb.mxu3 %v6172_v12  ;;  %v4404_v12 = vpop.f32.mrf.mxu2 }
 0x81e   :  { %4221 = vmatpush.bf16.msrb.mxu3 %v6171_v47 }
 0x822   :  { %4287 = vmatpush.bf16.msra.mxu3 %v9297_v6 }
 0x826   :  { %4288 = vmatpush.bf16.msra.mxu3 %v9312_v14 }
 0x872   :  { %v4095_v20 = vpop.f32.mrf.mxu1 }
 0x873   :  { %v4100_v59 = vadd.f32 %v4095_v20, %v3972_v10  ;;  %v6191_v10 = vld [vmem:[%s9639_s9 + $0x28] sm:$0xff] }
 0x87a   :  { %v4097_v37 = vpop.f32.mrf.mxu1 }
 0x87b   :  { %v4101_v35 = vadd.f32 %v4097_v37, %v3973_v21  ;;  %v6189_v37 = vld [vmem:[%s9639_s9 + $0x18] sm:$0xff] }
 0x882   :  { %v4134_v49 = vpop.f32.mrf.mxu1 }
 0x883   :  { %v4135_v28 = vadd.f32 %v4134_v49, %v4120_v53 }
 0x88a   :  { %v4136_v62 = vpop.f32.mrf.mxu1 }
 0x88b   :  { %v4137_v36 = vadd.f32 %v4136_v62, %v4122_v60  ;;  %v4406_v62 = vpop.f32.mrf.mxu2 }
 0x892   :  { %v4162_v63 = vpop.f32.mrf.mxu1 }
 0x893   :  { %v4163_v13 = vadd.f32 %v4162_v63, %v4148_v40 }
 0x895   :  { %v4167_v31 = vmax.f32 %v4135_v28, %v4163_v13  ;;  %v6188_v28 = vld [vmem:[%s9639_s9 + $0x10] sm:$0xff] }
 0x89a   :  { %v4164_v41 = vpop.f32.mrf.mxu1 }
 0x89b   :  { %v4165_v38 = vadd.f32 %v4164_v41, %v4150_v39 }
 0x89d   :  { %v4168_v16 = vmax.f32 %v4137_v36, %v4165_v38  ;;  %v6187_v36 = vld [vmem:[%s9639_s9 + $0x8] sm:$0xff]  ;;  %v6186_v38 = vld [vmem:[%s9639_s9] sm:$0xff] }
 0x89f   :  { %v4169_v19 = vpack.c.bf16 %v4168_v16, %v4167_v31  ;;  %v4583_v31 = vld [vmem:[%s9641_s11 + $0x28] sm:$0x3] }
 0x8a0   :  { %v4609_v16 = vunpack.c.l.b16 %v4583_v31 }
 0x8a1   :  { %5836 = vmatmul.msk.bf16.vlgmr.msrb.gmra.mxu3 %vm3951_vm7, %v4169_v19 }
 0x8a2   :  { %4367 = vmatpush.bf16.msrb.mxu3 %v6202_v57  ;;  %v4615_v19 = vpack.c.b16 %v4609_v16, %v4609_v16 }
 0x8a4   :  { %v4625_v57 = vsel %vm2599_vm3, %v4615_v19, 0 }
 0x8a6   :  { %4368 = vmatpush.bf16.msrb.mxu3 %v6203_v43  ;;  %v6197_v43 = vld [vmem:[%s9641_s11 + $0x20] sm:$0xff] }
 0x8aa   :  { %4369 = vmatpush.bf16.msrb.mxu3 %v9035_v23  ;;  %v6179_v23 = vld [vmem:[%s9637_s7 + $0x90] sm:$0xff] }
 0x8ab   :  { %4346 = vmatpush.bf16.msra.mxu1 %v6179_v23 }
 0x8ae   :  { %4370 = vmatpush.bf16.msrb.mxu3 %v9076_v27  ;;  %v6178_v27 = vld [vmem:[%s9637_s7 + $0x88] sm:$0xff] }
 0x8af   :  { %4347 = vmatpush.bf16.msra.mxu1 %v6178_v27 }
 0x8b1   :  { %5838 = vmatmul.msk.bf16.vlgmr.msra.gmra.mxu3 %vm3767_vm6, %v9404_v9 }
 0x8b2   :  { %4371 = vmatpush.bf16.msrb.mxu3 %v9115_v25  ;;  %v6177_v25 = vld [vmem:[%s9637_s7 + $0x80] sm:$0xff] }
 0x8b3   :  { %4348 = vmatpush.bf16.msra.mxu1 %v6177_v25 }
 0x8b6   :  { %4372 = vmatpush.bf16.msrb.mxu3 %v9152_v34  ;;  %v4248_v34 = vpop.f32.mrf.mxu0 }
 0x8ba   :  { %4373 = vmatpush.bf16.msrb.mxu3 %v9181_v46  ;;  %v6176_v46 = vld [vmem:[%s9637_s7 + $0x78] sm:$0xff] }
 0x8bb   :  { %4349 = vmatpush.bf16.msra.mxu1 %v6176_v46 }
 0x8be   :  { %4374 = vmatpush.bf16.msrb.mxu3 %v9207_v1 }
 0x8bf   :  { %4415 = vmatpush.bf16.msrb.mxu1 %v9297_v6 }
 0x8c1   :  { %4375 = vmatmul.bf16.vlgmr.msrb.gmra.mxu3 %v9451_v18  ;;  %v4250_v18 = vpop.f32.mrf.mxu0 }
 0x8c2   :  { %4629 = vmatpush.bf16.msra.mxu3 %v4625_v57 }
 0x8c3   :  { %4416 = vmatpush.bf16.msrb.mxu1 %v9312_v14  ;;  %v6185_v14 = vld [vmem:[%s9637_s7 + $0xc0] sm:$0xff] }
 0x8c4   :  { %4473 = vmatpush.bf16.msra.mxu0 %v6185_v14 }
 0x8c6   :  { %4630 = vmatpush.bf16.msra.mxu3 %v6197_v43 }
 0x8c8   :  { %4474 = vmatpush.bf16.msra.mxu0 %v6184_v56 }
 0x8c9   :  { %v4262_v44 = vpop.f32.mrf.mxu0 }
 0x8ca   :  { %v4263_v30 = vadd.f32 %v4262_v44, %v4248_v34  ;;  %4631 = vmatpush.bf16.msra.mxu3 %v6196_v54 }
 0x8cc   :  { %4475 = vmatpush.bf16.msra.mxu0 %v6183_v3 }
 0x8d0   :  { %4476 = vmatpush.bf16.msra.mxu0 %v6182_v17 }
 0x8d1   :  { %v4264_v51 = vpop.f32.mrf.mxu0 }
 0x8d2   :  { %v4265_v33 = vadd.f32 %v4264_v51, %v4250_v18  ;;  %v6193_v18 = vld [vmem:[%s9641_s11] sm:$0xff] }
 0x924   :  { %v4223_v1 = vpop.f32.mrf.mxu3 }
 0x925   :  { %v4228_v9 = vadd.f32 %v4223_v1, %v4100_v59  ;;  %v4390_v59 = vpop.f32.mrf.mxu0  ;;  %v6195_v1 = vld [vmem:[%s9641_s11 + $0x10] sm:$0xff] }
 0x926   :  { %4632 = vmatpush.bf16.msra.mxu3 %v6195_v1 }
 0x92c   :  { %v4225_v52 = vpop.f32.mrf.mxu3 }
 0x92d   :  { %v4229_v7 = vadd.f32 %v4225_v52, %v4101_v35  ;;  %v4392_v47 = vpop.f32.mrf.mxu0 }
 0x934   :  { %v4290_v4 = vpop.f32.mrf.mxu3 }
 0x935   :  { %v4291_v8 = vadd.f32 %v4290_v4, %v4276_v15 }
 0x937   :  { %v4295_v26 = vmax.f32 %v4263_v30, %v4291_v8  ;;  %v6200_v8 = vld [vmem:[%s9642_s12] ss:$0 sm:$0xff] }
 0x93c   :  { %v4292_v24 = vpop.f32.mrf.mxu3 }
 0x93d   :  { %v4293_v32 = vadd.f32 %v4292_v24, %v4278_v22 }
 0x93f   :  { %v4296_v29 = vmax.f32 %v4265_v33, %v4293_v32 }
 0x941   :  { %v4297_v6 = vpack.c.bf16 %v4296_v29, %v4295_v26 }
 0x943   :  { %5869 = vmatmul.msk.bf16.vlgmr.msra.gmra.mxu1 %vm3951_vm7, %v4297_v6 }
 0x944   :  { %4558 = vmatpush.bf16.msra.mxu1 %v4556_v11  ;;  %v4376_v20 = vpop.f32.mrf.mxu3 }
 0x945   :  { %v4391_v53 = vadd.f32 %v4390_v59, %v4376_v20 }
 0x948   :  { %4559 = vmatpush.bf16.msra.mxu1 %v6192_v0 }
 0x94c   :  { %4560 = vmatpush.bf16.msra.mxu1 %v6191_v10  ;;  %v4378_v35 = vpop.f32.mrf.mxu3 }
 0x94d   :  { %v4393_v63 = vadd.f32 %v4392_v47, %v4378_v35 }
 0x950   :  { %4561 = vmatpush.bf16.msra.mxu1 %v6190_v2 }
 0x953   :  { %5871 = vmatmul.msk.bf16.vlgmr.msrb.gmra.mxu1 %vm3767_vm6, %v9447_v61  ;;  %v6181_v61 = vld [vmem:[%s9637_s7 + $0xa0] sm:$0xff] }
 0x954   :  { %4477 = vmatpush.bf16.msra.mxu0 %v6181_v61  ;;  %4562 = vmatpush.bf16.msra.mxu1 %v6189_v37 }
 0x958   :  { %4563 = vmatpush.bf16.msra.mxu1 %v6188_v28 }
 0x95c   :  { %4564 = vmatpush.bf16.msra.mxu1 %v6187_v36 }
 0x960   :  { %4565 = vmatpush.bf16.msra.mxu1 %v6186_v38 }
 0x9c0   :  { %v4351_v58 = vpop.f32.mrf.mxu1 }
 0x9c1   :  { %v4356_v45 = vadd.f32 %v4351_v58, %v4228_v9  ;;  %v6194_v9 = vld [vmem:[%s9641_s11 + $0x8] sm:$0xff] }
 0x9c2   :  { %4633 = vmatpush.bf16.msra.mxu3 %v6194_v9 }
 0x9c6   :  { %4634 = vmatpush.bf16.msra.mxu3 %v6193_v18 }
 0x9c8   :  { %v4353_v55 = vpop.f32.mrf.mxu1 }
 0x9c9   :  { %v4357_v5 = vadd.f32 %v4353_v55, %v4229_v7  ;;  %v6199_v7 = vld [vmem:[%s9640_s10] ss:$0 sm:$0xff] }
 0x9d0   :  { %v4418_v21 = vpop.f32.mrf.mxu1 }
 0x9d1   :  { %v4419_v49 = vadd.f32 %v4418_v21, %v4404_v12 }
 0x9d3   :  { %v4423_v13 = vmax.f32 %v4391_v53, %v4419_v49 }
 0x9d8   :  { %v4420_v40 = vpop.f32.mrf.mxu1 }
 0x9d9   :  { %v4421_v39 = vadd.f32 %v4420_v40, %v4406_v62 }
 0x9db   :  { %v4424_v60 = vmax.f32 %v4393_v63, %v4421_v39 }
 0x9dd   :  { %v4425_v41 = vpack.c.bf16 %v4424_v60, %v4423_v13 }
 0x9df   :  { %5902 = vmatmul.msk.bf16.vlgmr.msra.gmra.mxu0 %vm3951_vm7, %v4425_v41 }
 0xa5c   :  { %v4479_v23 = vpop.f32.mrf.mxu0 }
 0xa5d   :  { %v4484_v25 = vadd.f32 %v4479_v23, %v4356_v45 }
 0xa64   :  { %v4481_v27 = vpop.f32.mrf.mxu0 }
 0xa65   :  { %v4485_v34 = vadd.f32 %v4481_v27, %v4357_v5 }
 0xa67   :  { %v4486_v46 = vpack.c.bf16 %v4485_v34, %v4484_v25 }
 0xa69   :  { %5931 = vmatmul.msk.bf16.vlgmr.msra.gmra.mxu1 %vm4551_vm8, %v4486_v46 }
 0xae6   :  { %v4567_v52 = vpop.f32.mrf.mxu1 }
 0xae7   :  { %v4568_v15 = vadd.f32 %v6199_v7, %v4567_v52 }
 0xaee   :  { %v4569_v44 = vpop.f32.mrf.mxu1 }
 0xaef   :  { %v4570_v4 = vadd.f32 %v6199_v7, %v4569_v44 }
 0xaf1   :  { %v4572_v51 = vpack.c.bf16 %v4570_v4, %v4568_v15 }
 0xaf3   :  { %5952 = vmatmul.msk.bf16.vlgmr.msra.gmra.mxu3 %vm2568_vm5, %v4572_v51 }
 0xb76   :  { %v4636_v22 = vpop.f32.mrf.mxu3 }
 0xb77   :  { %v4637_v24 = vadd.f32 %v6200_v8, %v4636_v22 }
 0xb79   :  { %4641 = vst [vmem:[%s9643_s13] sm:$0xff] %v4637_v24 }
 0xb7e   :  { %v4638_v30 = vpop.f32.mrf.mxu3 }
 0xb7f   :  { %v4639_v33 = vadd.f32 %v6200_v8, %v4638_v30 }
 0xb81   :  { %4642 = vst [vmem:[%s9643_s13 + $0x8] sm:$0xff] %v4639_v33 }

</bundles_post_ra>
